<compile_context>
chip_gen: v7x
topology: tpu7x:2x2x1
jax: 0.10.0
libtpu: 0.0.40
codegen_flags: <defaults>
</compile_context>

<pallas_src>
import jax
import jax.numpy as jnp
from jax import lax
from jax.experimental import pallas as pl
from jax.experimental.pallas import tpu as pltpu

# ---------------- configuration (mirrors args) ----------------
CLASSES_NUM = 10                              # args.classesNum -> num_capsules
PC_CHANNELS = 2                               # args.PCchannels
PREV_NODES = 32 * PC_CHANNELS * PC_CHANNELS   # previous_layer_nodes = 128
IN_CHANNELS = 8
OUT_CHANNELS = 16
ROUTING_ITERS = 3
BATCH = 2


def _squash(s):
    """Squash over the capsule-vector (sublane, O) axis.  s: (C,B,O,1) f32."""
    sq = jnp.sum(s * s, axis=-2, keepdims=True)             # (C,B,1,1)
    scale = sq * pl.reciprocal(1.0 + sq, approx=True)       # (C,B,1,1)
    return scale * s * lax.rsqrt(sq)                        # (C,B,O,1)


def digitcaps_kernel(wt_ref, ut_ref, u_hat_ref, v_ref, a_ref):
    # wt_ref: (C, I, O, N) bf16  -- weights, lane-dense (N on lanes, O on sublanes)
    # ut_ref: (B, I, 1, N) f32   -- primary-capsule inputs, lane-dense
    C, I, O, N = wt_ref.shape
    B = ut_ref.shape[0]

    w = wt_ref[...]                            # (C, I, O, N) bf16
    u = ut_ref[...]                            # (B, I, 1, N) f32

    # ---- u_hat[c,b,o,n] = sum_i W[c,n,i,o] * u[b,n,i]  (f32 accumulation) ----
    # Per-lane (per-node) contraction over i: VPU MACs, I=8 static unroll.
    u_hat = jnp.zeros((C, B, O, N), jnp.float32)
    for i in range(I):
        wi = w[:, i].astype(jnp.float32)       # (C, O, N)
        ui = u[:, i]                           # (B, 1, N)
        u_hat = u_hat + wi[:, None] * ui[None]  # (C, B, O, N)

    # ---- dynamic routing ----
    # Logits are constant over the O axis -> keep them as (C,B,1,N).
    inv_n = jnp.float32(1.0 / N)

    # Iteration 0: b_ij == 0 everywhere, softmax over N is exactly uniform.
    s = jnp.sum(u_hat, axis=-1, keepdims=True) * inv_n               # (C,B,O,1)
    v = _squash(s)                                                   # (C,B,O,1)
    a_ij = jnp.sum(u_hat * v, axis=-2, keepdims=True)                # (C,B,1,N)
    b_log = a_ij                                                     # (C,B,1,N)

    for it in range(1, ROUTING_ITERS):
        # softmax over the node (lane) axis
        m = jnp.max(b_log, axis=-1, keepdims=True)                   # (C,B,1,1)
        e = jnp.exp(b_log - m)                                       # (C,B,1,N)
        c_ij = e * pl.reciprocal(jnp.sum(e, axis=-1, keepdims=True),
                                 approx=True)                        # (C,B,1,N)
        # weighted sum over nodes (lane reduction)
        s = jnp.sum(c_ij * u_hat, axis=-1, keepdims=True)            # (C,B,O,1)
        v = _squash(s)                                               # (C,B,O,1)
        if it < ROUTING_ITERS - 1:
            a_ij = jnp.sum(u_hat * v, axis=-2, keepdims=True)        # (C,B,1,N)
            b_log = b_log + a_ij

    u_hat_ref[...] = u_hat
    v_ref[...] = v
    a_ref[...] = a_ij


@jax.jit
def digitcaps_forward(u, wt_bf16):
    """u: (B, N, I) f32; wt_bf16: (C, I, O, N) bf16 (kernel-native weight storage).

    Returns (v_j, a_ij, u_hat) in the PyTorch shapes:
      v_j   : (C, B, 1, 1, O)
      a_ij  : (C, B, N, 1, 1)   (the PyTorch code names this return `c_ij`)
      u_hat : (C, B, N, 1, O)
    """
    B, N, I = u.shape
    C, _, O, _ = wt_bf16.shape

    # layout plumbing (HBM side, outside the kernel): put N on the lane axis
    ut = jnp.transpose(u, (0, 2, 1))[:, :, None, :]    # (B, I, 1, N) f32

    vmem = pl.BlockSpec(memory_space=pltpu.MemorySpace.VMEM)
    u_hat_t, v_t, a_t = pl.pallas_call(
        digitcaps_kernel,
        out_shape=(
            jax.ShapeDtypeStruct((C, B, O, N), jnp.float32),   # u_hat (lane-dense)
            jax.ShapeDtypeStruct((C, B, O, 1), jnp.float32),   # v_j
            jax.ShapeDtypeStruct((C, B, 1, N), jnp.float32),   # a_ij
        ),
        in_specs=[vmem, vmem],
        out_specs=(vmem, vmem, vmem),
    )(wt_bf16, ut)

    v_j = v_t.reshape(C, B, 1, 1, O)
    a_ij = a_t.reshape(C, B, N, 1, 1)
    u_hat = jnp.swapaxes(u_hat_t, -1, -2)[:, :, :, None, :]    # (C,B,N,1,O)
    return v_j, a_ij, u_hat


def digitcaps_ref(u, W):
    """Pure-JAX mirror of the PyTorch DigitCaps.forward (f32)."""
    u_hat = jnp.einsum('bni,cnio->cbno', u, W,
                       precision=lax.Precision.HIGHEST)[:, :, :, None, :]
    b_ij = jnp.zeros_like(u_hat)
    a_ij = None
    for it in range(ROUTING_ITERS):
        c_ij = jax.nn.softmax(b_ij, axis=2)
        s_j = jnp.sum(c_ij * u_hat, axis=2, keepdims=True)
        sq = jnp.sum(s_j * s_j, axis=-1, keepdims=True)
        v_j = (sq / (1.0 + sq)) * s_j / jnp.sqrt(sq)
        if it < ROUTING_ITERS - 1:
            a_ij = jnp.sum(u_hat * v_j, axis=-1, keepdims=True)
            b_ij = b_ij + a_ij
    return v_j, a_ij, u_hat


if __name__ == "__main__":
    key = jax.random.PRNGKey(0)
    ku, kw = jax.random.split(key)
    B, N, I, O, C = BATCH, PREV_NODES, IN_CHANNELS, OUT_CHANNELS, CLASSES_NUM

    u = jax.random.normal(ku, (B, N, I), jnp.float32)        # PrimaryCaps vectors
    W = jax.random.normal(kw, (C, N, I, O), jnp.float32)     # ~ torch.randn

    # bf16, kernel-native (C, I, O, N) storage format for the streamed weights
    wt_bf16 = jnp.transpose(W, (0, 2, 3, 1)).astype(jnp.bfloat16)

    v_j, a_ij, u_hat = digitcaps_forward(u, wt_bf16)
    jax.block_until_ready((v_j, a_ij, u_hat))

    # ---- correctness vs pure-JAX reference using identical bf16-rounded weights ----
    W_ref = jnp.transpose(wt_bf16.astype(jnp.float32), (0, 3, 1, 2))   # (C,N,I,O)
    v_ref, a_ref, u_hat_ref = digitcaps_ref(u, W_ref)

    assert v_j.shape == (C, B, 1, 1, O)
    assert a_ij.shape == (C, B, N, 1, 1)
    assert u_hat.shape == (C, B, N, 1, O)
    assert bool(jnp.all(jnp.isfinite(v_j)))
    assert bool(jnp.all(jnp.isfinite(u_hat)))
    # u_hat path has no approximate ops -> tight tolerance
    assert bool(jnp.allclose(u_hat, u_hat_ref, rtol=1e-3, atol=1e-3))
    # routing uses approx (EUP) reciprocals -> looser tolerance
    assert bool(jnp.allclose(v_j, v_ref, rtol=5e-2, atol=5e-2))
    assert bool(jnp.allclose(a_ij, a_ref, rtol=5e-2, atol=5e-2))

    print("KERNEL_OK")
</pallas_src>

<mosaic_0001>
module attributes {stable_mosaic.version = 11 : i64} {
  func.func @digitcaps_kernel(%arg0: memref<10x8x16x128xbf16, #tpu.memory_space<vmem>>, %arg1: memref<2x8x1x128xf32, #tpu.memory_space<vmem>>, %arg2: memref<10x2x16x128xf32, #tpu.memory_space<vmem>>, %arg3: memref<10x2x16x1xf32, #tpu.memory_space<vmem>>, %arg4: memref<10x2x1x128xf32, #tpu.memory_space<vmem>>) attributes {dimension_semantics = [], scalar_prefetch = 0 : i64, scratch_operands = 0 : i64, tpu.core_type = #tpu.core_type<tc>} {
    %c0 = arith.constant 0 : index
    %c0_0 = arith.constant 0 : index
    %c0_1 = arith.constant 0 : index
    %c0_2 = arith.constant 0 : index
    %0 = vector.load %arg0[%c0, %c0_0, %c0_1, %c0_2] : memref<10x8x16x128xbf16, #tpu.memory_space<vmem>>, vector<10x8x16x128xbf16>
    %c0_3 = arith.constant 0 : index
    %c0_4 = arith.constant 0 : index
    %c0_5 = arith.constant 0 : index
    %c0_6 = arith.constant 0 : index
    %1 = vector.load %arg1[%c0_3, %c0_4, %c0_5, %c0_6] : memref<2x8x1x128xf32, #tpu.memory_space<vmem>>, vector<2x8x1x128xf32>
    %cst = arith.constant 0.000000e+00 : f32
    %2 = vector.broadcast %cst : f32 to vector<10x2x16x128xf32>
    %3 = vector.extract_strided_slice %0 {offsets = [0, 0, 0, 0], sizes = [10, 1, 16, 128], strides = [1, 1, 1, 1]} : vector<10x8x16x128xbf16> to vector<10x1x16x128xbf16>
    %4 = vector.shape_cast %3 : vector<10x1x16x128xbf16> to vector<10x16x128xbf16>
    %5 = arith.extf %4 : vector<10x16x128xbf16> to vector<10x16x128xf32>
    %6 = vector.extract_strided_slice %1 {offsets = [0, 0, 0, 0], sizes = [2, 1, 1, 128], strides = [1, 1, 1, 1]} : vector<2x8x1x128xf32> to vector<2x1x1x128xf32>
    %7 = vector.shape_cast %6 : vector<2x1x1x128xf32> to vector<2x1x128xf32>
    %8 = vector.shape_cast %5 : vector<10x16x128xf32> to vector<10x1x16x128xf32>
    %9 = vector.shape_cast %7 : vector<2x1x128xf32> to vector<1x2x1x128xf32>
    %10 = vector.broadcast %8 : vector<10x1x16x128xf32> to vector<10x2x16x128xf32>
    %11 = vector.broadcast %9 : vector<1x2x1x128xf32> to vector<10x2x16x128xf32>
    %12 = arith.mulf %10, %11 : vector<10x2x16x128xf32>
    %13 = arith.addf %2, %12 : vector<10x2x16x128xf32>
    %14 = vector.extract_strided_slice %0 {offsets = [0, 1, 0, 0], sizes = [10, 1, 16, 128], strides = [1, 1, 1, 1]} : vector<10x8x16x128xbf16> to vector<10x1x16x128xbf16>
    %15 = vector.shape_cast %14 : vector<10x1x16x128xbf16> to vector<10x16x128xbf16>
    %16 = arith.extf %15 : vector<10x16x128xbf16> to vector<10x16x128xf32>
    %17 = vector.extract_strided_slice %1 {offsets = [0, 1, 0, 0], sizes = [2, 1, 1, 128], strides = [1, 1, 1, 1]} : vector<2x8x1x128xf32> to vector<2x1x1x128xf32>
    %18 = vector.shape_cast %17 : vector<2x1x1x128xf32> to vector<2x1x128xf32>
    %19 = vector.shape_cast %16 : vector<10x16x128xf32> to vector<10x1x16x128xf32>
    %20 = vector.shape_cast %18 : vector<2x1x128xf32> to vector<1x2x1x128xf32>
    %21 = vector.broadcast %19 : vector<10x1x16x128xf32> to vector<10x2x16x128xf32>
    %22 = vector.broadcast %20 : vector<1x2x1x128xf32> to vector<10x2x16x128xf32>
    %23 = arith.mulf %21, %22 : vector<10x2x16x128xf32>
    %24 = arith.addf %13, %23 : vector<10x2x16x128xf32>
    %25 = vector.extract_strided_slice %0 {offsets = [0, 2, 0, 0], sizes = [10, 1, 16, 128], strides = [1, 1, 1, 1]} : vector<10x8x16x128xbf16> to vector<10x1x16x128xbf16>
    %26 = vector.shape_cast %25 : vector<10x1x16x128xbf16> to vector<10x16x128xbf16>
    %27 = arith.extf %26 : vector<10x16x128xbf16> to vector<10x16x128xf32>
    %28 = vector.extract_strided_slice %1 {offsets = [0, 2, 0, 0], sizes = [2, 1, 1, 128], strides = [1, 1, 1, 1]} : vector<2x8x1x128xf32> to vector<2x1x1x128xf32>
    %29 = vector.shape_cast %28 : vector<2x1x1x128xf32> to vector<2x1x128xf32>
    %30 = vector.shape_cast %27 : vector<10x16x128xf32> to vector<10x1x16x128xf32>
    %31 = vector.shape_cast %29 : vector<2x1x128xf32> to vector<1x2x1x128xf32>
    %32 = vector.broadcast %30 : vector<10x1x16x128xf32> to vector<10x2x16x128xf32>
    %33 = vector.broadcast %31 : vector<1x2x1x128xf32> to vector<10x2x16x128xf32>
    %34 = arith.mulf %32, %33 : vector<10x2x16x128xf32>
    %35 = arith.addf %24, %34 : vector<10x2x16x128xf32>
    %36 = vector.extract_strided_slice %0 {offsets = [0, 3, 0, 0], sizes = [10, 1, 16, 128], strides = [1, 1, 1, 1]} : vector<10x8x16x128xbf16> to vector<10x1x16x128xbf16>
    %37 = vector.shape_cast %36 : vector<10x1x16x128xbf16> to vector<10x16x128xbf16>
    %38 = arith.extf %37 : vector<10x16x128xbf16> to vector<10x16x128xf32>
    %39 = vector.extract_strided_slice %1 {offsets = [0, 3, 0, 0], sizes = [2, 1, 1, 128], strides = [1, 1, 1, 1]} : vector<2x8x1x128xf32> to vector<2x1x1x128xf32>
    %40 = vector.shape_cast %39 : vector<2x1x1x128xf32> to vector<2x1x128xf32>
    %41 = vector.shape_cast %38 : vector<10x16x128xf32> to vector<10x1x16x128xf32>
    %42 = vector.shape_cast %40 : vector<2x1x128xf32> to vector<1x2x1x128xf32>
    %43 = vector.broadcast %41 : vector<10x1x16x128xf32> to vector<10x2x16x128xf32>
    %44 = vector.broadcast %42 : vector<1x2x1x128xf32> to vector<10x2x16x128xf32>
    %45 = arith.mulf %43, %44 : vector<10x2x16x128xf32>
    %46 = arith.addf %35, %45 : vector<10x2x16x128xf32>
    %47 = vector.extract_strided_slice %0 {offsets = [0, 4, 0, 0], sizes = [10, 1, 16, 128], strides = [1, 1, 1, 1]} : vector<10x8x16x128xbf16> to vector<10x1x16x128xbf16>
    %48 = vector.shape_cast %47 : vector<10x1x16x128xbf16> to vector<10x16x128xbf16>
    %49 = arith.extf %48 : vector<10x16x128xbf16> to vector<10x16x128xf32>
    %50 = vector.extract_strided_slice %1 {offsets = [0, 4, 0, 0], sizes = [2, 1, 1, 128], strides = [1, 1, 1, 1]} : vector<2x8x1x128xf32> to vector<2x1x1x128xf32>
    %51 = vector.shape_cast %50 : vector<2x1x1x128xf32> to vector<2x1x128xf32>
    %52 = vector.shape_cast %49 : vector<10x16x128xf32> to vector<10x1x16x128xf32>
    %53 = vector.shape_cast %51 : vector<2x1x128xf32> to vector<1x2x1x128xf32>
    %54 = vector.broadcast %52 : vector<10x1x16x128xf32> to vector<10x2x16x128xf32>
    %55 = vector.broadcast %53 : vector<1x2x1x128xf32> to vector<10x2x16x128xf32>
    %56 = arith.mulf %54, %55 : vector<10x2x16x128xf32>
    %57 = arith.addf %46, %56 : vector<10x2x16x128xf32>
    %58 = vector.extract_strided_slice %0 {offsets = [0, 5, 0, 0], sizes = [10, 1, 16, 128], strides = [1, 1, 1, 1]} : vector<10x8x16x128xbf16> to vector<10x1x16x128xbf16>
    %59 = vector.shape_cast %58 : vector<10x1x16x128xbf16> to vector<10x16x128xbf16>
    %60 = arith.extf %59 : vector<10x16x128xbf16> to vector<10x16x128xf32>
    %61 = vector.extract_strided_slice %1 {offsets = [0, 5, 0, 0], sizes = [2, 1, 1, 128], strides = [1, 1, 1, 1]} : vector<2x8x1x128xf32> to vector<2x1x1x128xf32>
    %62 = vector.shape_cast %61 : vector<2x1x1x128xf32> to vector<2x1x128xf32>
    %63 = vector.shape_cast %60 : vector<10x16x128xf32> to vector<10x1x16x128xf32>
    %64 = vector.shape_cast %62 : vector<2x1x128xf32> to vector<1x2x1x128xf32>
    %65 = vector.broadcast %63 : vector<10x1x16x128xf32> to vector<10x2x16x128xf32>
    %66 = vector.broadcast %64 : vector<1x2x1x128xf32> to vector<10x2x16x128xf32>
    %67 = arith.mulf %65, %66 : vector<10x2x16x128xf32>
    %68 = arith.addf %57, %67 : vector<10x2x16x128xf32>
    %69 = vector.extract_strided_slice %0 {offsets = [0, 6, 0, 0], sizes = [10, 1, 16, 128], strides = [1, 1, 1, 1]} : vector<10x8x16x128xbf16> to vector<10x1x16x128xbf16>
    %70 = vector.shape_cast %69 : vector<10x1x16x128xbf16> to vector<10x16x128xbf16>
    %71 = arith.extf %70 : vector<10x16x128xbf16> to vector<10x16x128xf32>
    %72 = vector.extract_strided_slice %1 {offsets = [0, 6, 0, 0], sizes = [2, 1, 1, 128], strides = [1, 1, 1, 1]} : vector<2x8x1x128xf32> to vector<2x1x1x128xf32>
    %73 = vector.shape_cast %72 : vector<2x1x1x128xf32> to vector<2x1x128xf32>
    %74 = vector.shape_cast %71 : vector<10x16x128xf32> to vector<10x1x16x128xf32>
    %75 = vector.shape_cast %73 : vector<2x1x128xf32> to vector<1x2x1x128xf32>
    %76 = vector.broadcast %74 : vector<10x1x16x128xf32> to vector<10x2x16x128xf32>
    %77 = vector.broadcast %75 : vector<1x2x1x128xf32> to vector<10x2x16x128xf32>
    %78 = arith.mulf %76, %77 : vector<10x2x16x128xf32>
    %79 = arith.addf %68, %78 : vector<10x2x16x128xf32>
    %80 = vector.extract_strided_slice %0 {offsets = [0, 7, 0, 0], sizes = [10, 1, 16, 128], strides = [1, 1, 1, 1]} : vector<10x8x16x128xbf16> to vector<10x1x16x128xbf16>
    %81 = vector.shape_cast %80 : vector<10x1x16x128xbf16> to vector<10x16x128xbf16>
    %82 = arith.extf %81 : vector<10x16x128xbf16> to vector<10x16x128xf32>
    %83 = vector.extract_strided_slice %1 {offsets = [0, 7, 0, 0], sizes = [2, 1, 1, 128], strides = [1, 1, 1, 1]} : vector<2x8x1x128xf32> to vector<2x1x1x128xf32>
    %84 = vector.shape_cast %83 : vector<2x1x1x128xf32> to vector<2x1x128xf32>
    %85 = vector.shape_cast %82 : vector<10x16x128xf32> to vector<10x1x16x128xf32>
    %86 = vector.shape_cast %84 : vector<2x1x128xf32> to vector<1x2x1x128xf32>
    %87 = vector.broadcast %85 : vector<10x1x16x128xf32> to vector<10x2x16x128xf32>
    %88 = vector.broadcast %86 : vector<1x2x1x128xf32> to vector<10x2x16x128xf32>
    %89 = arith.mulf %87, %88 : vector<10x2x16x128xf32>
    %90 = arith.addf %79, %89 : vector<10x2x16x128xf32>
    %cst_7 = arith.constant dense<0.000000e+00> : vector<10x2x16xf32>
    %91 = vector.multi_reduction <add>, %90, %cst_7 [3] : vector<10x2x16x128xf32> to vector<10x2x16xf32>
    %92 = vector.shape_cast %91 : vector<10x2x16xf32> to vector<10x2x16x1xf32>
    %cst_8 = arith.constant 7.812500e-03 : f32
    %93 = vector.broadcast %cst_8 : f32 to vector<10x2x16x1xf32>
    %94 = arith.mulf %92, %93 : vector<10x2x16x1xf32>
    %95 = arith.mulf %94, %94 : vector<10x2x16x1xf32>
    %cst_9 = arith.constant dense<0.000000e+00> : vector<10x2x1xf32>
    %96 = vector.multi_reduction <add>, %95, %cst_9 [2] : vector<10x2x16x1xf32> to vector<10x2x1xf32>
    %97 = vector.shape_cast %96 : vector<10x2x1xf32> to vector<10x2x1x1xf32>
    %cst_10 = arith.constant 1.000000e+00 : f32
    %98 = vector.broadcast %cst_10 : f32 to vector<10x2x1x1xf32>
    %99 = arith.addf %98, %97 : vector<10x2x1x1xf32>
    %100 = tpu.reciprocal %99 {approx = true} : vector<10x2x1x1xf32> -> vector<10x2x1x1xf32>
    %101 = arith.mulf %97, %100 : vector<10x2x1x1xf32>
    %102 = vector.broadcast %101 : vector<10x2x1x1xf32> to vector<10x2x16x1xf32>
    %103 = arith.mulf %102, %94 : vector<10x2x16x1xf32>
    %104 = math.rsqrt %97 : vector<10x2x1x1xf32>
    %105 = vector.broadcast %104 : vector<10x2x1x1xf32> to vector<10x2x16x1xf32>
    %106 = arith.mulf %103, %105 : vector<10x2x16x1xf32>
    %107 = vector.broadcast %106 : vector<10x2x16x1xf32> to vector<10x2x16x128xf32>
    %108 = arith.mulf %90, %107 : vector<10x2x16x128xf32>
    %cst_11 = arith.constant dense<0.000000e+00> : vector<10x2x128xf32>
    %109 = vector.multi_reduction <add>, %108, %cst_11 [2] : vector<10x2x16x128xf32> to vector<10x2x128xf32>
    %110 = vector.shape_cast %109 : vector<10x2x128xf32> to vector<10x2x1x128xf32>
    %cst_12 = arith.constant dense<0xFF800000> : vector<10x2x1xf32>
    %111 = vector.multi_reduction <maximumf>, %110, %cst_12 [3] : vector<10x2x1x128xf32> to vector<10x2x1xf32>
    %112 = vector.shape_cast %111 : vector<10x2x1xf32> to vector<10x2x1x1xf32>
    %113 = vector.broadcast %112 : vector<10x2x1x1xf32> to vector<10x2x1x128xf32>
    %114 = arith.subf %110, %113 : vector<10x2x1x128xf32>
    %115 = math.exp %114 : vector<10x2x1x128xf32>
    %cst_13 = arith.constant dense<0.000000e+00> : vector<10x2x1xf32>
    %116 = vector.multi_reduction <add>, %115, %cst_13 [3] : vector<10x2x1x128xf32> to vector<10x2x1xf32>
    %117 = vector.shape_cast %116 : vector<10x2x1xf32> to vector<10x2x1x1xf32>
    %118 = tpu.reciprocal %117 {approx = true} : vector<10x2x1x1xf32> -> vector<10x2x1x1xf32>
    %119 = vector.broadcast %118 : vector<10x2x1x1xf32> to vector<10x2x1x128xf32>
    %120 = arith.mulf %115, %119 : vector<10x2x1x128xf32>
    %121 = vector.broadcast %120 : vector<10x2x1x128xf32> to vector<10x2x16x128xf32>
    %122 = arith.mulf %121, %90 : vector<10x2x16x128xf32>
    %cst_14 = arith.constant dense<0.000000e+00> : vector<10x2x16xf32>
    %123 = vector.multi_reduction <add>, %122, %cst_14 [3] : vector<10x2x16x128xf32> to vector<10x2x16xf32>
    %124 = vector.shape_cast %123 : vector<10x2x16xf32> to vector<10x2x16x1xf32>
    %125 = arith.mulf %124, %124 : vector<10x2x16x1xf32>
    %cst_15 = arith.constant dense<0.000000e+00> : vector<10x2x1xf32>
    %126 = vector.multi_reduction <add>, %125, %cst_15 [2] : vector<10x2x16x1xf32> to vector<10x2x1xf32>
    %127 = vector.shape_cast %126 : vector<10x2x1xf32> to vector<10x2x1x1xf32>
    %cst_16 = arith.constant 1.000000e+00 : f32
    %128 = vector.broadcast %cst_16 : f32 to vector<10x2x1x1xf32>
    %129 = arith.addf %128, %127 : vector<10x2x1x1xf32>
    %130 = tpu.reciprocal %129 {approx = true} : vector<10x2x1x1xf32> -> vector<10x2x1x1xf32>
    %131 = arith.mulf %127, %130 : vector<10x2x1x1xf32>
    %132 = vector.broadcast %131 : vector<10x2x1x1xf32> to vector<10x2x16x1xf32>
    %133 = arith.mulf %132, %124 : vector<10x2x16x1xf32>
    %134 = math.rsqrt %127 : vector<10x2x1x1xf32>
    %135 = vector.broadcast %134 : vector<10x2x1x1xf32> to vector<10x2x16x1xf32>
    %136 = arith.mulf %133, %135 : vector<10x2x16x1xf32>
    %137 = vector.broadcast %136 : vector<10x2x16x1xf32> to vector<10x2x16x128xf32>
    %138 = arith.mulf %90, %137 : vector<10x2x16x128xf32>
    %cst_17 = arith.constant dense<0.000000e+00> : vector<10x2x128xf32>
    %139 = vector.multi_reduction <add>, %138, %cst_17 [2] : vector<10x2x16x128xf32> to vector<10x2x128xf32>
    %140 = vector.shape_cast %139 : vector<10x2x128xf32> to vector<10x2x1x128xf32>
    %141 = arith.addf %110, %140 : vector<10x2x1x128xf32>
    %cst_18 = arith.constant dense<0xFF800000> : vector<10x2x1xf32>
    %142 = vector.multi_reduction <maximumf>, %141, %cst_18 [3] : vector<10x2x1x128xf32> to vector<10x2x1xf32>
    %143 = vector.shape_cast %142 : vector<10x2x1xf32> to vector<10x2x1x1xf32>
    %144 = vector.broadcast %143 : vector<10x2x1x1xf32> to vector<10x2x1x128xf32>
    %145 = arith.subf %141, %144 : vector<10x2x1x128xf32>
    %146 = math.exp %145 : vector<10x2x1x128xf32>
    %cst_19 = arith.constant dense<0.000000e+00> : vector<10x2x1xf32>
    %147 = vector.multi_reduction <add>, %146, %cst_19 [3] : vector<10x2x1x128xf32> to vector<10x2x1xf32>
    %148 = vector.shape_cast %147 : vector<10x2x1xf32> to vector<10x2x1x1xf32>
    %149 = tpu.reciprocal %148 {approx = true} : vector<10x2x1x1xf32> -> vector<10x2x1x1xf32>
    %150 = vector.broadcast %149 : vector<10x2x1x1xf32> to vector<10x2x1x128xf32>
    %151 = arith.mulf %146, %150 : vector<10x2x1x128xf32>
    %152 = vector.broadcast %151 : vector<10x2x1x128xf32> to vector<10x2x16x128xf32>
    %153 = arith.mulf %152, %90 : vector<10x2x16x128xf32>
    %cst_20 = arith.constant dense<0.000000e+00> : vector<10x2x16xf32>
    %154 = vector.multi_reduction <add>, %153, %cst_20 [3] : vector<10x2x16x128xf32> to vector<10x2x16xf32>
    %155 = vector.shape_cast %154 : vector<10x2x16xf32> to vector<10x2x16x1xf32>
    %156 = arith.mulf %155, %155 : vector<10x2x16x1xf32>
    %cst_21 = arith.constant dense<0.000000e+00> : vector<10x2x1xf32>
    %157 = vector.multi_reduction <add>, %156, %cst_21 [2] : vector<10x2x16x1xf32> to vector<10x2x1xf32>
    %158 = vector.shape_cast %157 : vector<10x2x1xf32> to vector<10x2x1x1xf32>
    %cst_22 = arith.constant 1.000000e+00 : f32
    %159 = vector.broadcast %cst_22 : f32 to vector<10x2x1x1xf32>
    %160 = arith.addf %159, %158 : vector<10x2x1x1xf32>
    %161 = tpu.reciprocal %160 {approx = true} : vector<10x2x1x1xf32> -> vector<10x2x1x1xf32>
    %162 = arith.mulf %158, %161 : vector<10x2x1x1xf32>
    %163 = vector.broadcast %162 : vector<10x2x1x1xf32> to vector<10x2x16x1xf32>
    %164 = arith.mulf %163, %155 : vector<10x2x16x1xf32>
    %165 = math.rsqrt %158 : vector<10x2x1x1xf32>
    %166 = vector.broadcast %165 : vector<10x2x1x1xf32> to vector<10x2x16x1xf32>
    %167 = arith.mulf %164, %166 : vector<10x2x16x1xf32>
    %c0_23 = arith.constant 0 : index
    %c0_24 = arith.constant 0 : index
    %c0_25 = arith.constant 0 : index
    %c0_26 = arith.constant 0 : index
    %168 = vector.load %arg2[%c0_23, %c0_24, %c0_25, %c0_26] : memref<10x2x16x128xf32, #tpu.memory_space<vmem>>, vector<10x2x16x128xf32>
    tpu.vector_store %arg2[%c0_23, %c0_24, %c0_25, %c0_26], %90 {strides = array<i32>} : memref<10x2x16x128xf32, #tpu.memory_space<vmem>>, vector<10x2x16x128xf32>,
    %c0_27 = arith.constant 0 : index
    %c0_28 = arith.constant 0 : index
    %c0_29 = arith.constant 0 : index
    %c0_30 = arith.constant 0 : index
    %169 = vector.load %arg3[%c0_27, %c0_28, %c0_29, %c0_30] : memref<10x2x16x1xf32, #tpu.memory_space<vmem>>, vector<10x2x16x1xf32>
    tpu.vector_store %arg3[%c0_27, %c0_28, %c0_29, %c0_30], %167 {strides = array<i32>} : memref<10x2x16x1xf32, #tpu.memory_space<vmem>>, vector<10x2x16x1xf32>,
    %c0_31 = arith.constant 0 : index
    %c0_32 = arith.constant 0 : index
    %c0_33 = arith.constant 0 : index
    %c0_34 = arith.constant 0 : index
    %170 = vector.load %arg4[%c0_31, %c0_32, %c0_33, %c0_34] : memref<10x2x1x128xf32, #tpu.memory_space<vmem>>, vector<10x2x1x128xf32>
    tpu.vector_store %arg4[%c0_31, %c0_32, %c0_33, %c0_34], %140 {strides = array<i32>} : memref<10x2x1x128xf32, #tpu.memory_space<vmem>>, vector<10x2x1x128xf32>,
    return
  }
}

</mosaic_0001>

<bundles_post_ra>
// kernel: digitcaps_forward.1
= control target key start
LH: loop header
LB: loop body
LE: loop exit
PB: predicated region body
PF: predicated region fallthrough
CT: control target
= control target key end

     0   :  { %10 = vsyncpa [#allocation3], 0  ;;  %s6620_s0 = inlined_call_operand.hbm [shape: bf16[10,8,16,128], index: 0, kind: input, shape index: {}]   ;;  %s6621_s1 = inlined_call_operand.hbm [shape: f32[2,8,1,128], index: 1, kind: input, shape index: {}]   ;;  %s6622_s2 = inlined_call_operand.hbm [shape: f32[10,2,16,128], index: 2, kind: output, shape index: {0}]   ;;  %s6623_s3 = inlined_call_operand.vmem [shape: f32[10,2,16,1], index: 3, kind: output, shape index: {1}]   ;;  %s6624_s4 = inlined_call_operand.hbm [shape: f32[10,2,1,128], index: 4, kind: output, shape index: {2}]  }
   0x1   :  { %11 = vsyncpa [#allocation6], 0 }
   0x2   :  { %12 = vsyncpa [#allocation4], 0 }
   0x3   :  { %13 = vsyncpa [#allocation9], 0  ;;  %s4412_s15 = smov [#allocation2]   ;;  %s4316_s19 = scalar_lea.hbm %s6620_s0, 10240 }
   0x4   :  { %s19_s16 = sshll.u32 %s4412_s15, 4  ;;  %p4317_p0 = scmp.ne.s32.totalorder %s6620_s0, %s4316_s19  ;;  %s20_s16 = int_to_ptr.vmem [resolvable:$true] %s19_s16 }
   0x5   :  { %p4320_p1 = scmp.lt.u32.totalorder %s4316_s19, %s6620_s0 }
   0x7   :  { %p4322_p2 = pnand %p4320_p1, %p4317_p0 }
   0x9   :  { %4325 = shalt.err (!%p4322_p2)
}
   0xa   :  { %s4326_s24 = scalar_lea.vmem %s20_s16, 10240  ;;  %p4331_p4 = scmp.lt.s32.totalorder %s20_s16, %s20_s16 }
   0xb   :  { %p4327_p3 = scmp.ne.s32.totalorder %s20_s16, %s4326_s24  ;;  %p4332_p5 = scmp.lt.s32.totalorder %s4326_s24, %s4326_s24 }
   0xd   :  { %p4333_p6 = por %p4332_p5, %p4331_p4 }
   0xf   :  { %p4334_p7 = pnand %p4333_p6, %p4327_p3 }
  0x11   :  { %4337 = shalt.err (!%p4334_p7)
}
  0x12   :  { %s4413_s25 = smov 64   ;;  %s4414_s26 = smov 4  }
  0x13   :  { %25 = dma.hbm_to_vmem [thread:$0]  %s6620_s0, 10240, %s20_s16, [#allocation3], %s4413_s25, %s4413_s25, %s4414_s26  }
  0x14   :  { %s4415_s29 = smov [#allocation5]   ;;  %s4338_s7 = scalar_lea.hbm %s6621_s1, 256 }
  0x15   :  { %s31_s30 = sshll.u32 %s4415_s29, 4  ;;  %p4339_p8 = scmp.ne.s32.totalorder %s6621_s1, %s4338_s7  ;;  %s32_s30 = int_to_ptr.vmem [resolvable:$true] %s31_s30 }
  0x16   :  { %p4342_p9 = scmp.lt.u32.totalorder %s4338_s7, %s6621_s1 }
  0x18   :  { %p4344_p10 = pnand %p4342_p9, %p4339_p8 }
  0x1a   :  { %4347 = shalt.err (!%p4344_p10)
}
  0x1b   :  { %s4348_s12 = scalar_lea.vmem %s32_s30, 256  ;;  %p4353_p12 = scmp.lt.s32.totalorder %s32_s30, %s32_s30 }
  0x1c   :  { %p4349_p11 = scmp.ne.s32.totalorder %s32_s30, %s4348_s12  ;;  %p4354_p13 = scmp.lt.s32.totalorder %s4348_s12, %s4348_s12 }
  0x1e   :  { %p4355_p0 = por %p4354_p13, %p4353_p12 }
  0x20   :  { %p4356_p1 = pnand %p4355_p0, %p4349_p11 }
  0x22   :  { %4359 = shalt.err (!%p4356_p1)
}
  0x23   :  { %s4416_s0 = smov 16   ;;  %s4417_s13 = smov 1  }
  0x24   :  { %37 = dma.hbm_to_vmem [thread:$0]  %s6621_s1, 256, %s32_s30, [#allocation6], %s4416_s0, %s4416_s0, %s4417_s13  }
  0x25   :  { %4404 = dma.done.wait [#allocation3], 10240  }
  0x26   :  { %4405 = vsyncadd [#allocation3], 4294957056 }
  0x27   :  { %4406 = dma.done.wait [#allocation6], 256  }
  0x28   :  { %4407 = vsyncadd [#allocation6], 4294967040  ;;  %v4474_v0 = vld [vmem:[#allocation2] sm:$0xff]   ;;  %v4476_v1 = vld [vmem:[#allocation2 + $0x8] sm:$0xff]   ;;  %vm3276_vm0 = vcmask 7168   ;;  %s4418_s5 = smov [#allocation7]  }
  0x29   :  { %v4478_v2 = vld [vmem:[#allocation2 + $0x10] sm:$0xff]   ;;  %v3393_v3 = vunpack.c.l.bf16 %v4474_v0  ;;  %v3397_v4 = vunpack.c.l.bf16 %v4476_v1  ;;  %v4483_v6 = vld [vmem:[#allocation2 + $0x18] sm:$0xff]   ;;  %v4485_v7 = vld [vmem:[#allocation2 + $0x20] sm:$0xff]   ;;  %v3394_v15 = vunpack.c.h.bf16 %v4474_v0  ;;  %v3398_v22 = vunpack.c.h.bf16 %v4476_v1  ;;  %s3342_s6 = sshll.u32 %s4418_s5, 4  ;;  %s3343_s6 = int_to_ptr.vmem [resolvable:$true] %s3342_s6 }
  0x2a   :  { %v3401_v5 = vunpack.c.l.bf16 %v4478_v2  ;;  %v4487_v8 = vld [vmem:[#allocation2 + $0x28] sm:$0xff]   ;;  %v3405_v9 = vunpack.c.l.bf16 %v4483_v6  ;;  %v3409_v10 = vunpack.c.l.bf16 %v4485_v7  ;;  %v4492_v12 = vld [vmem:[#allocation2 + $0x30] sm:$0xff]   ;;  %v4494_v13 = vld [vmem:[#allocation2 + $0x38] sm:$0xff]   ;;  %v3402_v29 = vunpack.c.h.bf16 %v4478_v2  ;;  %s4360_s7 = scalar_lea.vmem %s3343_s6, 5120  ;;  %p4365_p3 = scmp.lt.s32.totalorder %s3343_s6, %s3343_s6 }
  0x2b   :  { %v3413_v11 = vunpack.c.l.bf16 %v4487_v8  ;;  %v4496_v14 = vld [vmem:[#allocation5 + $0x8] ss:$0 sm:$0xff]  ;;  %v3417_v16 = vunpack.c.l.bf16 %v4492_v12  ;;  %v3421_v17 = vunpack.c.l.bf16 %v4494_v13  ;;  %v4501_v18 = vld [vmem:[#allocation5 + $0x9] ss:$0 sm:$0xff]  ;;  %v4503_v19 = vld [vmem:[#allocation5 + $0xa] ss:$0 sm:$0xff]  ;;  %v3406_v36 = vunpack.c.h.bf16 %v4483_v6  ;;  %p4361_p2 = scmp.ne.s32.totalorder %s3343_s6, %s4360_s7  ;;  %p4366_p4 = scmp.lt.s32.totalorder %s4360_s7, %s4360_s7 }
  0x2c   :  { %v4505_v20 = vld [vmem:[#allocation5 + $0xb] ss:$0 sm:$0xff]  ;;  %v254_v21 = vmul.f32 %v3393_v3, %v4496_v14  ;;  %v4509_v23 = vld [vmem:[#allocation5 + $0xc] ss:$0 sm:$0xff]  ;;  %v4511_v24 = vld [vmem:[#allocation5 + $0xd] ss:$0 sm:$0xff]  ;;  %v366_v26 = vmul.f32 %v3397_v4, %v4501_v18  ;;  %v478_v27 = vmul.f32 %v3401_v5, %v4503_v19  ;;  %v3410_v43 = vunpack.c.h.bf16 %v4485_v7 }
  0x2d   :  { %v4513_v25 = vld [vmem:[#allocation5 + $0xe] ss:$0 sm:$0xff]  ;;  %v590_v28 = vmul.f32 %v3405_v9, %v4505_v20  ;;  %v4519_v30 = vld [vmem:[#allocation5 + $0xf] ss:$0 sm:$0xff]  ;;  %v702_v31 = vmul.f32 %v3409_v10, %v4509_v23  ;;  %v814_v32 = vmul.f32 %v3413_v11, %v4511_v24  ;;  %v4524_v34 = vld [vmem:[#allocation5] ss:$0 sm:$0xff]  ;;  %v3414_v49 = vunpack.c.h.bf16 %v4487_v8  ;;  %p4367_p5 = por %p4366_p4, %p4365_p3 }
  0x2e   :  { %v926_v33 = vmul.f32 %v3417_v16, %v4513_v25  ;;  %v4526_v35 = vld [vmem:[#allocation5 + $0x1] ss:$0 sm:$0xff]  ;;  %v406_v37 = vadd.f32 %v366_v26, %v254_v21  ;;  %v4529_v38 = vld [vmem:[#allocation5 + $0x2] ss:$0 sm:$0xff]  ;;  %v4531_v39 = vld [vmem:[#allocation5 + $0x3] ss:$0 sm:$0xff]  ;;  %v252_v41 = vmul.f32 %v3393_v3, %v4524_v34  ;;  %v1038_v44 = vmul.f32 %v3421_v17, %v4519_v30 }
  0x2f   :  { %v4533_v40 = vld [vmem:[#allocation5 + $0x4] ss:$0 sm:$0xff]  ;;  %v364_v42 = vmul.f32 %v3397_v4, %v4526_v35  ;;  %v4539_v45 = vld [vmem:[#allocation5 + $0x5] ss:$0 sm:$0xff]  ;;  %v4541_v46 = vld [vmem:[#allocation5 + $0x6] ss:$0 sm:$0xff]  ;;  %v476_v47 = vmul.f32 %v3401_v5, %v4529_v38  ;;  %v588_v48 = vmul.f32 %v3405_v9, %v4531_v39  ;;  %v3418_v56 = vunpack.c.h.bf16 %v4492_v12  ;;  %p4368_p6 = pnand %p4367_p5, %p4361_p2 }
  0x30   :  { %v518_v50 = vadd.f32 %v478_v27, %v406_v37  ;;  %v4546_v51 = vld [vmem:[#allocation5 + $0x7] ss:$0 sm:$0xff]  ;;  %v700_v53 = vmul.f32 %v3409_v10, %v4533_v40  ;;  %v812_v54 = vmul.f32 %v3413_v11, %v4539_v45  ;;  %v924_v55 = vmul.f32 %v3417_v16, %v4541_v46  ;;  %v4568_v21 = vld [vmem:[#allocation2 + $0x48] sm:$0xff]   ;;  %v4570_v26 = vld [vmem:[#allocation2 + $0x50] sm:$0xff]  }
  0x31   :  { %v404_v52 = vadd.f32 %v364_v42, %v252_v41  ;;  %v3422_v57 = vunpack.c.h.bf16 %v4494_v13  ;;  %v255_v58 = vmul.f32 %v3394_v15, %v4496_v14  ;;  %v367_v61 = vmul.f32 %v3398_v22, %v4501_v18  ;;  %v4565_v11 = vld [vmem:[#allocation2 + $0x40] sm:$0xff]   ;;  %v4572_v27 = vld [vmem:[#allocation2 + $0x58] sm:$0xff]   ;;  %v4580_v42 = vld [vmem:[#allocation2 + $0x68] sm:$0xff]  }
  0x32   :  { %v630_v59 = vadd.f32 %v590_v28, %v518_v50  ;;  %v479_v62 = vmul.f32 %v3402_v29, %v4503_v19  ;;  %v1036_v63 = vmul.f32 %v3421_v17, %v4546_v51  ;;  %v591_v0 = vmul.f32 %v3406_v36, %v4505_v20 }
  0x33   :  { %v516_v60 = vadd.f32 %v476_v47, %v404_v52  ;;  %v703_v1 = vmul.f32 %v3410_v43, %v4509_v23  ;;  %v815_v2 = vmul.f32 %v3414_v49, %v4511_v24  ;;  %v407_v5 = vadd.f32 %v367_v61, %v255_v58  ;;  %v4582_v47 = vld [vmem:[#allocation2 + $0x70] sm:$0xff]  }
  0x34   :  { %v742_v3 = vadd.f32 %v702_v31, %v630_v59  ;;  %v927_v6 = vmul.f32 %v3418_v56, %v4513_v25  ;;  %v1039_v7 = vmul.f32 %v3422_v57, %v4519_v30  ;;  %v253_v8 = vmul.f32 %v3394_v15, %v4524_v34  ;;  %v4577_v31 = vld [vmem:[#allocation2 + $0x60] sm:$0xff]  }
  0x35   :  { %v628_v4 = vadd.f32 %v588_v48, %v516_v60  ;;  %v365_v9 = vmul.f32 %v3398_v22, %v4526_v35  ;;  %v477_v10 = vmul.f32 %v3402_v29, %v4529_v38  ;;  %v519_v16 = vadd.f32 %v479_v62, %v407_v5 }
  0x36   :  { %v854_v12 = vadd.f32 %v814_v32, %v742_v3  ;;  %v589_v17 = vmul.f32 %v3406_v36, %v4531_v39  ;;  %v701_v15 = vmul.f32 %v3410_v43, %v4533_v40  ;;  %v813_v22 = vmul.f32 %v3414_v49, %v4539_v45 }
  0x37   :  { %v740_v13 = vadd.f32 %v700_v53, %v628_v4  ;;  %v405_v28 = vadd.f32 %v365_v9, %v253_v8  ;;  %v925_v29 = vmul.f32 %v3418_v56, %v4541_v46  ;;  %v631_v41 = vadd.f32 %v591_v0, %v519_v16 }
  0x38   :  { %v966_v32 = vadd.f32 %v926_v33, %v854_v12  ;;  %v3426_v36 = vunpack.c.h.bf16 %v4565_v11  ;;  %v3430_v50 = vunpack.c.h.bf16 %v4568_v21  ;;  %v3434_v43 = vunpack.c.h.bf16 %v4570_v26 }
  0x39   :  { %v852_v37 = vadd.f32 %v812_v54, %v740_v13  ;;  %v517_v48 = vadd.f32 %v477_v10, %v405_v28  ;;  %v3438_v49 = vunpack.c.h.bf16 %v4572_v27  ;;  %v743_v56 = vadd.f32 %v703_v1, %v631_v41  ;;  %v4588_v54 = vld [vmem:[#allocation2 + $0x78] sm:$0xff]  }
  0x3a   :  { %v1078_v52 = vadd.f32 %v1038_v44, %v966_v32  ;;  %v3442_v33 = vunpack.c.h.bf16 %v4577_v31  ;;  %v1037_v59 = vmul.f32 %v3422_v57, %v4546_v51  ;;  %v3446_v60 = vunpack.c.h.bf16 %v4580_v42 }
  0x3b   :  { %v964_v53 = vadd.f32 %v924_v55, %v852_v37  ;;  %v629_v58 = vadd.f32 %v589_v17, %v517_v48  ;;  %v3450_v61 = vunpack.c.h.bf16 %v4582_v47  ;;  %v855_v0 = vadd.f32 %v815_v2, %v743_v56 }
  0x3c   :  { %1120 = vadd.xlane.f32.xlu1 %v1078_v52  ;;  %3238 = vst [vmem:[#allocation7 + $0x10] sm:$0xff] %v1078_v52  ;;  %v257_v3 = vmul.f32 %v3426_v36, %v4524_v34  ;;  %v369_v44 = vmul.f32 %v3430_v50, %v4526_v35  ;;  %v3454_v1 = vunpack.c.h.bf16 %v4588_v54  ;;  %v481_v4 = vmul.f32 %v3434_v43, %v4529_v38 }
  0x3d   :  { %v1076_v62 = vadd.f32 %v1036_v63, %v964_v53  ;;  %v741_v55 = vadd.f32 %v701_v15, %v629_v58  ;;  %v593_v5 = vmul.f32 %v3438_v49, %v4531_v39  ;;  %v967_v57 = vadd.f32 %v927_v6, %v855_v0 }
  0x3e   :  { %v409_v8 = vadd.f32 %v369_v44, %v257_v3  ;;  %v705_v9 = vmul.f32 %v3442_v33, %v4533_v40  ;;  %v817_v63 = vmul.f32 %v3446_v60, %v4539_v45  ;;  %v929_v10 = vmul.f32 %v3450_v61, %v4541_v46 }
  0x3f   :  { %1116 = vadd.xlane.f32.xlu0 %v1076_v62  ;;  %3236 = vst [vmem:[#allocation7] sm:$0xff] %v1076_v62  ;;  %v853_v2 = vadd.f32 %v813_v22, %v741_v55  ;;  %v3425_v12 = vunpack.c.l.bf16 %v4565_v11  ;;  %v3429_v13 = vunpack.c.l.bf16 %v4568_v21  ;;  %v1079_v16 = vadd.f32 %v1039_v7, %v967_v57 }
  0x40   :  { %v521_v17 = vadd.f32 %v481_v4, %v409_v8  ;;  %v3433_v28 = vunpack.c.l.bf16 %v4570_v26  ;;  %v3437_v15 = vunpack.c.l.bf16 %v4572_v27  ;;  %v3441_v6 = vunpack.c.l.bf16 %v4577_v31 }
  0x41   :  { %v965_v32 = vadd.f32 %v925_v29, %v853_v2  ;;  %v3445_v37 = vunpack.c.l.bf16 %v4580_v42  ;;  %v3449_v41 = vunpack.c.l.bf16 %v4582_v47  ;;  %3239 = vst [vmem:[#allocation7 + $0x18] sm:$0xff] %v1079_v16  ;;  %1122 = vadd.xlane.f32.xlu1 %v1079_v16  ;;  %v3453_v11 = vunpack.c.l.bf16 %v4588_v54 }
  0x42   :  { %v633_v22 = vadd.f32 %v593_v5, %v521_v17  ;;  %v256_v21 = vmul.f32 %v3425_v12, %v4524_v34  ;;  %v368_v7 = vmul.f32 %v3429_v13, %v4526_v35  ;;  %v1041_v26 = vmul.f32 %v3454_v1, %v4546_v51  ;;  %v4637_v17 = vld [vmem:[#allocation2 + $0x98] sm:$0xff]  }
  0x43   :  { %v1077_v48 = vadd.f32 %v1037_v59, %v965_v32  ;;  %v480_v27 = vmul.f32 %v3433_v28, %v4529_v38  ;;  %v592_v29 = vmul.f32 %v3437_v15, %v4531_v39  ;;  %v704_v47 = vmul.f32 %v3441_v6, %v4533_v40  ;;  %v4641_v32 = vld [vmem:[#allocation2 + $0xa8] sm:$0xff]  }
  0x44   :  { %v745_v31 = vadd.f32 %v705_v9, %v633_v22  ;;  %v408_v42 = vadd.f32 %v368_v7, %v256_v21  ;;  %v816_v52 = vmul.f32 %v3445_v37, %v4539_v45  ;;  %v928_v53 = vmul.f32 %v3449_v41, %v4541_v46  ;;  %v4646_v21 = vld [vmem:[#allocation2 + $0xb0] sm:$0xff]  }
  0x45   :  { %3237 = vst [vmem:[#allocation7 + $0x8] sm:$0xff] %v1077_v48  ;;  %1118 = vadd.xlane.f32.xlu0 %v1077_v48  ;;  %v259_v56 = vmul.f32 %v3426_v36, %v4496_v14  ;;  %v371_v54 = vmul.f32 %v3430_v50, %v4501_v18  ;;  %v483_v58 = vmul.f32 %v3434_v43, %v4503_v19  ;;  %v4627_v43 = vld [vmem:[#allocation2 + $0x80] sm:$0xff]  }
  0x46   :  { %v857_v59 = vadd.f32 %v817_v63, %v745_v31  ;;  %v520_v62 = vadd.f32 %v480_v27, %v408_v42  ;;  %v1040_v0 = vmul.f32 %v3453_v11, %v4546_v51  ;;  %v595_v3 = vmul.f32 %v3438_v49, %v4505_v20 }
  0x47   :  { %v411_v44 = vadd.f32 %v371_v54, %v259_v56  ;;  %v707_v55 = vmul.f32 %v3442_v33, %v4509_v23  ;;  %v819_v4 = vmul.f32 %v3446_v60, %v4511_v24  ;;  %v931_v5 = vmul.f32 %v3450_v61, %v4513_v25  ;;  %v4632_v33 = vld [vmem:[#allocation2 + $0x88] sm:$0xff]   ;;  %v4634_v60 = vld [vmem:[#allocation2 + $0x90] sm:$0xff]  }
  0x48   :  { %v969_v57 = vadd.f32 %v929_v10, %v857_v59  ;;  %v632_v8 = vadd.f32 %v592_v29, %v520_v62  ;;  %v258_v36 = vmul.f32 %v3425_v12, %v4496_v14  ;;  %v370_v50 = vmul.f32 %v3429_v13, %v4501_v18  ;;  %v4639_v13 = vld [vmem:[#allocation2 + $0xa0] sm:$0xff]  }
  0x49   :  { %v523_v9 = vadd.f32 %v483_v58, %v411_v44  ;;  %v1043_v63 = vmul.f32 %v3454_v1, %v4519_v30  ;;  %v482_v49 = vmul.f32 %v3433_v28, %v4503_v19  ;;  %v594_v2 = vmul.f32 %v3437_v15, %v4505_v20 }
  0x4a   :  { %v1081_v61 = vadd.f32 %v1041_v26, %v969_v57  ;;  %v744_v10 = vadd.f32 %v704_v47, %v632_v8  ;;  %v410_v16 = vadd.f32 %v370_v50, %v258_v36  ;;  %v706_v12 = vmul.f32 %v3441_v6, %v4509_v23 }
  0x4b   :  { %v635_v1 = vadd.f32 %v595_v3, %v523_v9  ;;  %v818_v28 = vmul.f32 %v3445_v37, %v4511_v24  ;;  %v930_v15 = vmul.f32 %v3449_v41, %v4513_v25  ;;  %v3458_v22 = vunpack.c.h.bf16 %v4627_v43  ;;  %v4653_v41 = vld [vmem:[#allocation2 + $0xb8] sm:$0xff]  }
  0x4c   :  { %3241 = vst [vmem:[#allocation7 + $0x28] sm:$0xff] %v1081_v61  ;;  %1126 = vadd.xlane.f32.xlu1 %v1081_v61  ;;  %v856_v7 = vadd.f32 %v816_v52, %v744_v10  ;;  %v522_v48 = vadd.f32 %v482_v49, %v410_v16  ;;  %v3462_v6 = vunpack.c.h.bf16 %v4632_v33  ;;  %v3466_v26 = vunpack.c.h.bf16 %v4634_v60 }
  0x4d   :  { %v747_v27 = vadd.f32 %v707_v55, %v635_v1  ;;  %v3470_v29 = vunpack.c.h.bf16 %v4637_v17  ;;  %v3474_v31 = vunpack.c.h.bf16 %v4639_v13  ;;  %v3478_v37 = vunpack.c.h.bf16 %v4641_v32 }
  0x4e   :  { %v968_v42 = vadd.f32 %v928_v53, %v856_v7  ;;  %v634_v47 = vadd.f32 %v594_v2, %v522_v48  ;;  %v1042_v56 = vmul.f32 %v3453_v11, %v4519_v30  ;;  %v3482_v52 = vunpack.c.h.bf16 %v4646_v21 }
  0x4f   :  { %v859_v54 = vadd.f32 %v819_v4, %v747_v27  ;;  %v261_v58 = vmul.f32 %v3458_v22, %v4524_v34  ;;  %v373_v59 = vmul.f32 %v3462_v6, %v4526_v35  ;;  %v485_v62 = vmul.f32 %v3466_v26, %v4529_v38 }
  0x50   :  { %v1080_v3 = vadd.f32 %v1040_v0, %v968_v42  ;;  %v746_v44 = vadd.f32 %v706_v12, %v634_v47  ;;  %v3486_v55 = vunpack.c.h.bf16 %v4653_v41  ;;  %v597_v57 = vmul.f32 %v3470_v29, %v4531_v39 }
  0x51   :  { %v971_v8 = vadd.f32 %v931_v5, %v859_v54  ;;  %v413_v53 = vadd.f32 %v373_v59, %v261_v58  ;;  %v709_v36 = vmul.f32 %v3474_v31, %v4533_v40  ;;  %v821_v11 = vmul.f32 %v3478_v37, %v4539_v45 }
  0x52   :  { %3240 = vst [vmem:[#allocation7 + $0x20] sm:$0xff] %v1080_v3  ;;  %1124 = vadd.xlane.f32.xlu0 %v1080_v3  ;;  %v858_v4 = vadd.f32 %v818_v28, %v746_v44  ;;  %v933_v50 = vmul.f32 %v3482_v52, %v4541_v46  ;;  %v3457_v9 = vunpack.c.l.bf16 %v4627_v43  ;;  %v3461_v0 = vunpack.c.l.bf16 %v4632_v33 }
  0x53   :  { %v1083_v49 = vadd.f32 %v1043_v63, %v971_v8  ;;  %v525_v2 = vadd.f32 %v485_v62, %v413_v53  ;;  %v3465_v61 = vunpack.c.l.bf16 %v4634_v60  ;;  %v3469_v5 = vunpack.c.l.bf16 %v4637_v17 }
  0x54   :  { %v970_v10 = vadd.f32 %v930_v15, %v858_v4  ;;  %v3473_v16 = vunpack.c.l.bf16 %v4639_v13  ;;  %v3477_v12 = vunpack.c.l.bf16 %v4641_v32  ;;  %v3481_v1 = vunpack.c.l.bf16 %v4646_v21 }
  0x55   :  { %3243 = vst [vmem:[#allocation7 + $0x38] sm:$0xff] %v1083_v49  ;;  %1130 = vadd.xlane.f32.xlu1 %v1083_v49  ;;  %v637_v28 = vadd.f32 %v597_v57, %v525_v2  ;;  %v3485_v43 = vunpack.c.l.bf16 %v4653_v41  ;;  %v260_v33 = vmul.f32 %v3457_v9, %v4524_v34  ;;  %v372_v63 = vmul.f32 %v3461_v0, %v4526_v35  ;;  %v4701_v2 = vld [vmem:[#allocation2 + $0xd8] sm:$0xff]  }
  0x56   :  { %v1082_v7 = vadd.f32 %v1042_v56, %v970_v10  ;;  %v1045_v60 = vmul.f32 %v3486_v55, %v4546_v51  ;;  %v484_v17 = vmul.f32 %v3465_v61, %v4529_v38  ;;  %v596_v13 = vmul.f32 %v3469_v5, %v4531_v39  ;;  %v4705_v10 = vld [vmem:[#allocation2 + $0xe8] sm:$0xff]  }
  0x57   :  { %v749_v15 = vadd.f32 %v709_v36, %v637_v28  ;;  %v412_v32 = vadd.f32 %v372_v63, %v260_v33  ;;  %v708_v21 = vmul.f32 %v3473_v16, %v4533_v40  ;;  %v820_v48 = vmul.f32 %v3477_v12, %v4539_v45  ;;  %v4710_v33 = vld [vmem:[#allocation2 + $0xf0] sm:$0xff]  }
  0x58   :  { %3242 = vst [vmem:[#allocation7 + $0x30] sm:$0xff] %v1082_v7  ;;  %1128 = vadd.xlane.f32.xlu0 %v1082_v7  ;;  %v932_v27 = vmul.f32 %v3481_v1, %v4541_v46  ;;  %v263_v41 = vmul.f32 %v3458_v22, %v4496_v14  ;;  %v375_v42 = vmul.f32 %v3462_v6, %v4501_v18 }
  0x59   :  { %v487_v47 = vmul.f32 %v3466_v26, %v4503_v19  ;;  %v861_v56 = vadd.f32 %v821_v11, %v749_v15  ;;  %v524_v54 = vadd.f32 %v484_v17, %v412_v32  ;;  %v1044_v58 = vmul.f32 %v3485_v43, %v4546_v51  ;;  %v4691_v26 = vld [vmem:[#allocation2 + $0xc0] sm:$0xff]  }
  0x5a   :  { %v599_v59 = vmul.f32 %v3470_v29, %v4505_v20  ;;  %v415_v62 = vadd.f32 %v375_v42, %v263_v41  ;;  %v711_v3 = vmul.f32 %v3474_v31, %v4509_v23  ;;  %v823_v44 = vmul.f32 %v3478_v37, %v4511_v24  ;;  %v4696_v31 = vld [vmem:[#allocation2 + $0xc8] sm:$0xff]   ;;  %v4698_v37 = vld [vmem:[#allocation2 + $0xd0] sm:$0xff]  }
  0x5b   :  { %v935_v57 = vmul.f32 %v3482_v52, %v4513_v25  ;;  %v973_v8 = vadd.f32 %v933_v50, %v861_v56  ;;  %v636_v53 = vadd.f32 %v596_v13, %v524_v54  ;;  %v262_v22 = vmul.f32 %v3457_v9, %v4496_v14 }
  0x5c   :  { %v374_v6 = vmul.f32 %v3461_v0, %v4501_v18  ;;  %v527_v36 = vadd.f32 %v487_v47, %v415_v62  ;;  %v1047_v11 = vmul.f32 %v3486_v55, %v4519_v30  ;;  %v486_v29 = vmul.f32 %v3465_v61, %v4503_v19  ;;  %v4703_v0 = vld [vmem:[#allocation2 + $0xe0] sm:$0xff]  }
  0x5d   :  { %v598_v4 = vmul.f32 %v3469_v5, %v4505_v20  ;;  %v1085_v52 = vadd.f32 %v1045_v60, %v973_v8  ;;  %v748_v50 = vadd.f32 %v708_v21, %v636_v53  ;;  %v710_v9 = vmul.f32 %v3473_v16, %v4509_v23 }
  0x5e   :  { %v414_v49 = vadd.f32 %v374_v6, %v262_v22  ;;  %v639_v55 = vadd.f32 %v599_v59, %v527_v36  ;;  %v822_v61 = vmul.f32 %v3477_v12, %v4511_v24  ;;  %v934_v5 = vmul.f32 %v3481_v1, %v4513_v25  ;;  %v4717_v1 = vld [vmem:[#allocation2 + $0xf8] sm:$0xff]  }
  0x5f   :  { %v3490_v28 = vunpack.c.h.bf16 %v4691_v26  ;;  %3245 = vst [vmem:[#allocation7 + $0x48] sm:$0xff] %v1085_v52  ;;  %1134 = vadd.xlane.f32.xlu1 %v1085_v52  ;;  %v860_v63 = vadd.f32 %v820_v48, %v748_v50  ;;  %v3494_v16 = vunpack.c.h.bf16 %v4696_v31  ;;  %v3498_v60 = vunpack.c.h.bf16 %v4698_v37 }
  0x60   :  { %v526_v7 = vadd.f32 %v486_v29, %v414_v49  ;;  %v751_v17 = vadd.f32 %v711_v3, %v639_v55  ;;  %v3502_v13 = vunpack.c.h.bf16 %v4701_v2  ;;  %v3506_v15 = vunpack.c.h.bf16 %v4703_v0 }
  0x61   :  { %v3510_v12 = vunpack.c.h.bf16 %v4705_v10  ;;  %v972_v32 = vadd.f32 %v932_v27, %v860_v63  ;;  %v1046_v41 = vmul.f32 %v3485_v43, %v4519_v30  ;;  %v3514_v48 = vunpack.c.h.bf16 %v4710_v33 }
  0x62   :  { %v638_v21 = vadd.f32 %v598_v4, %v526_v7  ;;  %v863_v42 = vadd.f32 %v823_v44, %v751_v17  ;;  %v265_v47 = vmul.f32 %v3490_v28, %v4524_v34  ;;  %v377_v56 = vmul.f32 %v3494_v16, %v4526_v35 }
  0x63   :  { %v489_v54 = vmul.f32 %v3498_v60, %v4529_v38  ;;  %v1084_v59 = vadd.f32 %v1044_v58, %v972_v32  ;;  %v3518_v3 = vunpack.c.h.bf16 %v4717_v1  ;;  %v601_v8 = vmul.f32 %v3502_v13, %v4531_v39 }
  0x64   :  { %v750_v62 = vadd.f32 %v710_v9, %v638_v21  ;;  %v975_v53 = vadd.f32 %v935_v57, %v863_v42  ;;  %v417_v27 = vadd.f32 %v377_v56, %v265_v47  ;;  %v713_v22 = vmul.f32 %v3506_v15, %v4533_v40 }
  0x65   :  { %v825_v43 = vmul.f32 %v3510_v12, %v4539_v45  ;;  %3244 = vst [vmem:[#allocation7 + $0x40] sm:$0xff] %v1084_v59  ;;  %1132 = vadd.xlane.f32.xlu0 %v1084_v59  ;;  %v937_v6 = vmul.f32 %v3514_v48, %v4541_v46  ;;  %v3489_v36 = vunpack.c.l.bf16 %v4691_v26  ;;  %v3493_v58 = vunpack.c.l.bf16 %v4696_v31 }
  0x66   :  { %v862_v44 = vadd.f32 %v822_v61, %v750_v62  ;;  %v1087_v29 = vadd.f32 %v1047_v11, %v975_v53  ;;  %v529_v4 = vadd.f32 %v489_v54, %v417_v27  ;;  %v3497_v52 = vunpack.c.l.bf16 %v4698_v37 }
  0x67   :  { %v3501_v57 = vunpack.c.l.bf16 %v4701_v2  ;;  %v3505_v49 = vunpack.c.l.bf16 %v4703_v0  ;;  %v3509_v9 = vunpack.c.l.bf16 %v4705_v10  ;;  %v3513_v55 = vunpack.c.l.bf16 %v4710_v33 }
  0x68   :  { %v974_v50 = vadd.f32 %v934_v5, %v862_v44  ;;  %3247 = vst [vmem:[#allocation7 + $0x58] sm:$0xff] %v1087_v29  ;;  %1138 = vadd.xlane.f32.xlu1 %v1087_v29  ;;  %v641_v61 = vadd.f32 %v601_v8, %v529_v4  ;;  %v3517_v26 = vunpack.c.l.bf16 %v4717_v1  ;;  %v264_v31 = vmul.f32 %v3489_v36, %v4524_v34  ;;  %v4765_v4 = vld [vmem:[#allocation2 + $0x118] sm:$0xff]  }
  0x69   :  { %v376_v11 = vmul.f32 %v3493_v58, %v4526_v35  ;;  %v1049_v37 = vmul.f32 %v3518_v3, %v4546_v51  ;;  %v488_v2 = vmul.f32 %v3497_v52, %v4529_v38  ;;  %v600_v0 = vmul.f32 %v3501_v57, %v4531_v39 }
  0x6a   :  { %v1086_v63 = vadd.f32 %v1046_v41, %v974_v50  ;;  %v753_v5 = vadd.f32 %v713_v22, %v641_v61  ;;  %v712_v33 = vmul.f32 %v3505_v49, %v4533_v40  ;;  %v824_v7 = vmul.f32 %v3509_v9, %v4539_v45  ;;  %v4769_v50 = vld [vmem:[#allocation2 + $0x128] sm:$0xff]  }
  0x6b   :  { %v416_v10 = vadd.f32 %v376_v11, %v264_v31  ;;  %v936_v17 = vmul.f32 %v3513_v55, %v4541_v46  ;;  %v267_v1 = vmul.f32 %v3490_v28, %v4496_v14  ;;  %v379_v32 = vmul.f32 %v3494_v16, %v4501_v18  ;;  %v4774_v31 = vld [vmem:[#allocation2 + $0x130] sm:$0xff]  }
  0x6c   :  { %3246 = vst [vmem:[#allocation7 + $0x50] sm:$0xff] %v1086_v63  ;;  %1136 = vadd.xlane.f32.xlu0 %v1086_v63  ;;  %v491_v21 = vmul.f32 %v3498_v60, %v4503_v19  ;;  %v865_v41 = vadd.f32 %v825_v43, %v753_v5  ;;  %v1048_v47 = vmul.f32 %v3517_v26, %v4546_v51  ;;  %v4755_v60 = vld [vmem:[#allocation2 + $0x100] sm:$0xff]  }
  0x6d   :  { %v528_v42 = vadd.f32 %v488_v2, %v416_v10  ;;  %v603_v56 = vmul.f32 %v3502_v13, %v4505_v20  ;;  %v419_v54 = vadd.f32 %v379_v32, %v267_v1  ;;  %v715_v59 = vmul.f32 %v3506_v15, %v4509_v23  ;;  %v4760_v15 = vld [vmem:[#allocation2 + $0x108] sm:$0xff]  }
  0x6e   :  { %v827_v62 = vmul.f32 %v3510_v12, %v4511_v24  ;;  %v939_v8 = vmul.f32 %v3514_v48, %v4513_v25  ;;  %v977_v53 = vadd.f32 %v937_v6, %v865_v41  ;;  %v266_v28 = vmul.f32 %v3489_v36, %v4496_v14  ;;  %v4762_v12 = vld [vmem:[#allocation2 + $0x110] sm:$0xff]  }
  0x6f   :  { %v640_v27 = vadd.f32 %v600_v0, %v528_v42  ;;  %v378_v16 = vmul.f32 %v3493_v58, %v4501_v18  ;;  %v531_v22 = vadd.f32 %v491_v21, %v419_v54  ;;  %v1051_v43 = vmul.f32 %v3518_v3, %v4519_v30  ;;  %v4767_v58 = vld [vmem:[#allocation2 + $0x120] sm:$0xff]  }
  0x70   :  { %v490_v13 = vmul.f32 %v3497_v52, %v4503_v19  ;;  %v602_v44 = vmul.f32 %v3501_v57, %v4505_v20  ;;  %v1089_v48 = vadd.f32 %v1049_v37, %v977_v53  ;;  %v714_v36 = vmul.f32 %v3505_v49, %v4509_v23 }
  0x71   :  { %v752_v6 = vadd.f32 %v712_v33, %v640_v27  ;;  %v418_v29 = vadd.f32 %v378_v16, %v266_v28  ;;  %v643_v3 = vadd.f32 %v603_v56, %v531_v22  ;;  %v826_v52 = vmul.f32 %v3509_v9, %v4511_v24 }
  0x72   :  { %v938_v57 = vmul.f32 %v3513_v55, %v4513_v25  ;;  %v3522_v61 = vunpack.c.h.bf16 %v4755_v60  ;;  %3249 = vst [vmem:[#allocation7 + $0x68] sm:$0xff] %v1089_v48  ;;  %1142 = vadd.xlane.f32.xlu1 %v1089_v48  ;;  %v3526_v49 = vunpack.c.h.bf16 %v4760_v15  ;;  %v3530_v37 = vunpack.c.h.bf16 %v4762_v12  ;;  %v4781_v55 = vld [vmem:[#allocation2 + $0x138] sm:$0xff]  }
  0x73   :  { %v864_v11 = vadd.f32 %v824_v7, %v752_v6  ;;  %v530_v63 = vadd.f32 %v490_v13, %v418_v29  ;;  %v755_v2 = vadd.f32 %v715_v59, %v643_v3  ;;  %v3534_v0 = vunpack.c.h.bf16 %v4765_v4 }
  0x74   :  { %v3538_v5 = vunpack.c.h.bf16 %v4767_v58  ;;  %v3542_v9 = vunpack.c.h.bf16 %v4769_v50  ;;  %v1050_v1 = vmul.f32 %v3517_v26, %v4519_v30  ;;  %v3546_v7 = vunpack.c.h.bf16 %v4774_v31 }
  0x75   :  { %v976_v10 = vadd.f32 %v936_v17, %v864_v11  ;;  %v642_v33 = vadd.f32 %v602_v44, %v530_v63  ;;  %v867_v32 = vadd.f32 %v827_v62, %v755_v2  ;;  %v269_v21 = vmul.f32 %v3522_v61, %v4524_v34 }
  0x76   :  { %v381_v41 = vmul.f32 %v3526_v49, %v4526_v35  ;;  %v493_v42 = vmul.f32 %v3530_v37, %v4529_v38  ;;  %v3550_v59 = vunpack.c.h.bf16 %v4781_v55  ;;  %v605_v53 = vmul.f32 %v3534_v0, %v4531_v39 }
  0x77   :  { %v1088_v56 = vadd.f32 %v1048_v47, %v976_v10  ;;  %v754_v54 = vadd.f32 %v714_v36, %v642_v33  ;;  %v979_v27 = vadd.f32 %v939_v8, %v867_v32  ;;  %v717_v28 = vmul.f32 %v3538_v5, %v4533_v40 }
  0x78   :  { %v421_v17 = vadd.f32 %v381_v41, %v269_v21  ;;  %v829_v26 = vmul.f32 %v3542_v9, %v4539_v45  ;;  %v941_v16 = vmul.f32 %v3546_v7, %v4541_v46  ;;  %v3521_v22 = vunpack.c.l.bf16 %v4755_v60 }
  0x79   :  { %3248 = vst [vmem:[#allocation7 + $0x60] sm:$0xff] %v1088_v56  ;;  %1140 = vadd.xlane.f32.xlu0 %v1088_v56  ;;  %v866_v62 = vadd.f32 %v826_v52, %v754_v54  ;;  %v3525_v47 = vunpack.c.l.bf16 %v4760_v15  ;;  %v1091_v13 = vadd.f32 %v1051_v43, %v979_v27  ;;  %v3529_v48 = vunpack.c.l.bf16 %v4762_v12 }
  0x7a   :  { %v533_v44 = vadd.f32 %v493_v42, %v421_v17  ;;  %v3533_v8 = vunpack.c.l.bf16 %v4765_v4  ;;  %v3537_v29 = vunpack.c.l.bf16 %v4767_v58  ;;  %v3541_v36 = vunpack.c.l.bf16 %v4769_v50 }
  0x7b   :  { %v978_v6 = vadd.f32 %v938_v57, %v866_v62  ;;  %v3545_v3 = vunpack.c.l.bf16 %v4774_v31  ;;  %3251 = vst [vmem:[#allocation7 + $0x78] sm:$0xff] %v1091_v13  ;;  %1146 = vadd.xlane.f32.xlu1 %v1091_v13  ;;  %v3549_v60 = vunpack.c.l.bf16 %v4781_v55  ;;  %v268_v15 = vmul.f32 %v3521_v22, %v4524_v34 }
  0x7c   :  { %v645_v52 = vadd.f32 %v605_v53, %v533_v44  ;;  %v380_v43 = vmul.f32 %v3525_v47, %v4526_v35  ;;  %v1053_v12 = vmul.f32 %v3550_v59, %v4546_v51  ;;  %v492_v4 = vmul.f32 %v3529_v48, %v4529_v38  ;;  %v4829_v44 = vld [vmem:[#allocation2 + $0x158] sm:$0xff]  }
  0x7d   :  { %v1090_v11 = vadd.f32 %v1050_v1, %v978_v6  ;;  %v604_v58 = vmul.f32 %v3533_v8, %v4531_v39  ;;  %v716_v31 = vmul.f32 %v3537_v29, %v4533_v40  ;;  %v828_v63 = vmul.f32 %v3541_v36, %v4539_v45  ;;  %v4833_v6 = vld [vmem:[#allocation2 + $0x168] sm:$0xff]  }
  0x7e   :  { %v757_v57 = vadd.f32 %v717_v28, %v645_v52  ;;  %v420_v50 = vadd.f32 %v380_v43, %v268_v15  ;;  %v940_v2 = vmul.f32 %v3545_v3, %v4541_v46  ;;  %v271_v55 = vmul.f32 %v3522_v61, %v4496_v14  ;;  %v4838_v15 = vld [vmem:[#allocation2 + $0x170] sm:$0xff]  }
  0x7f   :  { %3250 = vst [vmem:[#allocation7 + $0x70] sm:$0xff] %v1090_v11  ;;  %1144 = vadd.xlane.f32.xlu0 %v1090_v11  ;;  %v383_v10 = vmul.f32 %v3526_v49, %v4501_v18  ;;  %v495_v33 = vmul.f32 %v3530_v37, %v4503_v19  ;;  %v1052_v21 = vmul.f32 %v3549_v60, %v4546_v51  ;;  %v4819_v37 = vld [vmem:[#allocation2 + $0x140] sm:$0xff]  }
  0x80   :  { %v869_v1 = vadd.f32 %v829_v26, %v757_v57  ;;  %v532_v32 = vadd.f32 %v492_v4, %v420_v50  ;;  %v607_v41 = vmul.f32 %v3534_v0, %v4505_v20  ;;  %v719_v56 = vmul.f32 %v3538_v5, %v4509_v23  ;;  %v4824_v5 = vld [vmem:[#allocation2 + $0x148] sm:$0xff]  }
  0x81   :  { %v423_v42 = vadd.f32 %v383_v10, %v271_v55  ;;  %v831_v54 = vmul.f32 %v3542_v9, %v4511_v24  ;;  %v943_v53 = vmul.f32 %v3546_v7, %v4513_v25  ;;  %v270_v61 = vmul.f32 %v3521_v22, %v4496_v14  ;;  %v4826_v9 = vld [vmem:[#allocation2 + $0x150] sm:$0xff]  }
  0x82   :  { %v981_v27 = vadd.f32 %v941_v16, %v869_v1  ;;  %v644_v17 = vadd.f32 %v604_v58, %v532_v32  ;;  %v382_v49 = vmul.f32 %v3525_v47, %v4501_v18  ;;  %v1055_v26 = vmul.f32 %v3550_v59, %v4519_v30  ;;  %v4831_v47 = vld [vmem:[#allocation2 + $0x160] sm:$0xff]  }
  0x83   :  { %v535_v28 = vadd.f32 %v495_v33, %v423_v42  ;;  %v494_v0 = vmul.f32 %v3529_v48, %v4503_v19  ;;  %v606_v62 = vmul.f32 %v3533_v8, %v4505_v20  ;;  %v718_v22 = vmul.f32 %v3537_v29, %v4509_v23 }
  0x84   :  { %v1093_v7 = vadd.f32 %v1053_v12, %v981_v27  ;;  %v756_v16 = vadd.f32 %v716_v31, %v644_v17  ;;  %v422_v13 = vadd.f32 %v382_v49, %v270_v61  ;;  %v830_v48 = vmul.f32 %v3541_v36, %v4511_v24 }
  0x85   :  { %v647_v59 = vadd.f32 %v607_v41, %v535_v28  ;;  %v942_v8 = vmul.f32 %v3545_v3, %v4513_v25  ;;  %v3554_v52 = vunpack.c.h.bf16 %v4819_v37  ;;  %v3558_v29 = vunpack.c.h.bf16 %v4824_v5  ;;  %v4845_v3 = vld [vmem:[#allocation2 + $0x178] sm:$0xff]  }
  0x86   :  { %3253 = vst [vmem:[#allocation7 + $0x88] sm:$0xff] %v1093_v7  ;;  %1150 = vadd.xlane.f32.xlu1 %v1093_v7  ;;  %v868_v43 = vadd.f32 %v828_v63, %v756_v16  ;;  %v534_v11 = vadd.f32 %v494_v0, %v422_v13  ;;  %v3562_v12 = vunpack.c.h.bf16 %v4826_v9  ;;  %v3566_v58 = vunpack.c.h.bf16 %v4829_v44 }
  0x87   :  { %v759_v4 = vadd.f32 %v719_v56, %v647_v59  ;;  %v3570_v57 = vunpack.c.h.bf16 %v4831_v47  ;;  %v3574_v36 = vunpack.c.h.bf16 %v4833_v6  ;;  %v1054_v55 = vmul.f32 %v3549_v60, %v4519_v30 }
  0x88   :  { %v980_v50 = vadd.f32 %v940_v2, %v868_v43  ;;  %v646_v31 = vadd.f32 %v606_v62, %v534_v11  ;;  %v3578_v63 = vunpack.c.h.bf16 %v4838_v15  ;;  %v273_v33 = vmul.f32 %v3554_v52, %v4524_v34 }
  0x89   :  { %v871_v10 = vadd.f32 %v831_v54, %v759_v4  ;;  %v385_v1 = vmul.f32 %v3558_v29, %v4526_v35  ;;  %v497_v32 = vmul.f32 %v3562_v12, %v4529_v38  ;;  %v3582_v56 = vunpack.c.h.bf16 %v4845_v3 }
  0x8a   :  { %v1092_v41 = vadd.f32 %v1052_v21, %v980_v50  ;;  %v758_v42 = vadd.f32 %v718_v22, %v646_v31  ;;  %v609_v27 = vmul.f32 %v3566_v58, %v4531_v39  ;;  %v721_v61 = vmul.f32 %v3570_v57, %v4533_v40 }
  0x8b   :  { %v983_v17 = vadd.f32 %v943_v53, %v871_v10  ;;  %v425_v2 = vadd.f32 %v385_v1, %v273_v33  ;;  %v833_v60 = vmul.f32 %v3574_v36, %v4539_v45  ;;  %v945_v49 = vmul.f32 %v3578_v63, %v4541_v46 }
  0x8c   :  { %3252 = vst [vmem:[#allocation7 + $0x80] sm:$0xff] %v1092_v41  ;;  %1148 = vadd.xlane.f32.xlu0 %v1092_v41  ;;  %v870_v54 = vadd.f32 %v830_v48, %v758_v42  ;;  %v3553_v28 = vunpack.c.l.bf16 %v4819_v37  ;;  %v3557_v21 = vunpack.c.l.bf16 %v4824_v5  ;;  %v3561_v7 = vunpack.c.l.bf16 %v4826_v9  ;;  %v4904_v41 = vld [vmem:[#allocation5 + $0xc] ss:$0 sm:$0xff]  ;;  %v4907_v42 = vld [vmem:[#allocation2 + $0x198] sm:$0xff]  }
  0x8d   :  { %v1095_v0 = vadd.f32 %v1055_v26, %v983_v17  ;;  %v537_v62 = vadd.f32 %v497_v32, %v425_v2  ;;  %v3565_v53 = vunpack.c.l.bf16 %v4829_v44  ;;  %v3569_v13 = vunpack.c.l.bf16 %v4831_v47  ;;  %v4913_v2 = vld [vmem:[#allocation5 + $0xd] ss:$0 sm:$0xff] }
  0x8e   :  { %v982_v16 = vadd.f32 %v942_v8, %v870_v54  ;;  %v3573_v22 = vunpack.c.l.bf16 %v4833_v6  ;;  %v3577_v59 = vunpack.c.l.bf16 %v4838_v15  ;;  %v3581_v37 = vunpack.c.l.bf16 %v4845_v3 }
  0x8f   :  { %3255 = vst [vmem:[#allocation7 + $0x98] sm:$0xff] %v1095_v0  ;;  %1154 = vadd.xlane.f32.xlu1 %v1095_v0  ;;  %v649_v48 = vadd.f32 %v609_v27, %v537_v62  ;;  %v272_v5 = vmul.f32 %v3553_v28, %v4524_v34  ;;  %v384_v26 = vmul.f32 %v3557_v21, %v4526_v35  ;;  %v4911_v27 = vld [vmem:[#allocation2 + $0x1a8] sm:$0xff]  }
  0x90   :  { %v1094_v43 = vadd.f32 %v1054_v55, %v982_v16  ;;  %v1057_v9 = vmul.f32 %v3582_v56, %v4546_v51  ;;  %v496_v44 = vmul.f32 %v3561_v7, %v4529_v38  ;;  %v608_v47 = vmul.f32 %v3565_v53, %v4531_v39 }
  0x91   :  { %v761_v8 = vadd.f32 %v721_v61, %v649_v48  ;;  %v424_v6 = vadd.f32 %v384_v26, %v272_v5  ;;  %v720_v15 = vmul.f32 %v3569_v13, %v4533_v40  ;;  %v832_v11 = vmul.f32 %v3573_v22, %v4539_v45  ;;  %v4929_v26 = vld [vmem:[#allocation5 + $0xf] ss:$0 sm:$0xff] }
  0x92   :  { %3254 = vst [vmem:[#allocation7 + $0x90] sm:$0xff] %v1094_v43  ;;  %1152 = vadd.xlane.f32.xlu0 %v1094_v43  ;;  %v944_v4 = vmul.f32 %v3577_v59, %v4541_v46  ;;  %v275_v34 = vmul.f32 %v3554_v52, %v4496_v14  ;;  %v387_v35 = vmul.f32 %v3558_v29, %v4501_v18  ;;  %v4883_v18 = vld [vmem:[#allocation5 + $0x8] ss:$0 sm:$0xff]  ;;  %v4886_v29 = vld [vmem:[#allocation5 + $0x9] ss:$0 sm:$0xff]  ;;  %v3598_v16 = vunpack.c.h.bf16 %v4907_v42 }
  0x93   :  { %v499_v50 = vmul.f32 %v3562_v12, %v4503_v19  ;;  %v873_v31 = vadd.f32 %v833_v60, %v761_v8  ;;  %v536_v38 = vadd.f32 %v496_v44, %v424_v6  ;;  %v1056_v39 = vmul.f32 %v3581_v37, %v4546_v51  ;;  %v4889_v51 = vld [vmem:[#allocation2 + $0x180] sm:$0xff]   ;;  %v4916_v60 = vld [vmem:[#allocation5 + $0xe] ss:$0 sm:$0xff] }
  0x94   :  { %v611_v40 = vmul.f32 %v3566_v58, %v4505_v20  ;;  %v427_v55 = vadd.f32 %v387_v35, %v275_v34  ;;  %v723_v45 = vmul.f32 %v3570_v57, %v4509_v23  ;;  %v835_v10 = vmul.f32 %v3574_v36, %v4511_v24  ;;  %v4894_v23 = vld [vmem:[#allocation5 + $0xa] ss:$0 sm:$0xff]  ;;  %v4940_v6 = vld [vmem:[#allocation5 + $0x1] ss:$0 sm:$0xff]  ;;  %v4951_v35 = vld [vmem:[#allocation5 + $0x3] ss:$0 sm:$0xff] }
  0x95   :  { %v947_v46 = vmul.f32 %v3578_v63, %v4513_v25  ;;  %v985_v14 = vadd.f32 %v945_v49, %v873_v31  ;;  %v648_v52 = vadd.f32 %v608_v47, %v536_v38  ;;  %v274_v19 = vmul.f32 %v4883_v18, %v3553_v28  ;;  %v4897_v25 = vld [vmem:[#allocation5 + $0xb] ss:$0 sm:$0xff]  ;;  %v4902_v63 = vld [vmem:[#allocation2 + $0x190] sm:$0xff]   ;;  %v4935_v47 = vld [vmem:[#allocation5] ss:$0 sm:$0xff] }
  0x96   :  { %v386_v12 = vmul.f32 %v4886_v29, %v3557_v21  ;;  %v539_v20 = vadd.f32 %v499_v50, %v427_v55  ;;  %v4892_v58 = vmul.f32 %v3582_v56, %v4519_v30  ;;  %v498_v24 = vmul.f32 %v4894_v23, %v3561_v7  ;;  %v4900_v36 = vld [vmem:[#allocation2 + $0x188] sm:$0xff]   ;;  %v4909_v56 = vld [vmem:[#allocation2 + $0x1a0] sm:$0xff]   ;;  %v4920_v28 = vld [vmem:[#allocation2 + $0x1b0] sm:$0xff]  }
  0x97   :  { %v610_v57 = vmul.f32 %v4897_v25, %v3565_v53  ;;  %v1097_v33 = vadd.f32 %v1057_v9, %v985_v14  ;;  %v760_v1 = vadd.f32 %v720_v15, %v648_v52  ;;  %v722_v30 = vmul.f32 %v4904_v41, %v3569_v13  ;;  %v4966_v14 = vld [vmem:[#allocation5 + $0x6] ss:$0 sm:$0xff] }
  0x98   :  { %v426_v32 = vadd.f32 %v386_v12, %v274_v19  ;;  %v651_v17 = vadd.f32 %v611_v40, %v539_v20  ;;  %v834_v61 = vmul.f32 %v4913_v2, %v3573_v22  ;;  %v946_v54 = vmul.f32 %v4916_v60, %v3577_v59  ;;  %v4927_v59 = vld [vmem:[#allocation2 + $0x1b8] sm:$0xff]   ;;  %v4956_v40 = vld [vmem:[#allocation5 + $0x4] ss:$0 sm:$0xff] }
  0x99   :  { %v3586_v49 = vunpack.c.h.bf16 %v4889_v51  ;;  %3257 = vst [vmem:[#allocation7 + $0xa8] sm:$0xff] %v1097_v33  ;;  %1158 = vadd.xlane.f32.xlu1 %v1097_v33  ;;  %v872_v21 = vadd.f32 %v832_v11, %v760_v1  ;;  %v3590_v62 = vunpack.c.h.bf16 %v4900_v36  ;;  %v3594_v7 = vunpack.c.h.bf16 %v4902_v63  ;;  %v4945_v11 = vld [vmem:[#allocation5 + $0x2] ss:$0 sm:$0xff] }
  0x9a   :  { %v538_v0 = vadd.f32 %v498_v24, %v426_v32  ;;  %v763_v53 = vadd.f32 %v723_v45, %v651_v17  ;;  %v3602_v13 = vunpack.c.h.bf16 %v4909_v56  ;;  %v3606_v22 = vunpack.c.h.bf16 %v4911_v27  ;;  %v4961_v45 = vld [vmem:[#allocation5 + $0x5] ss:$0 sm:$0xff] }
  0x9b   :  { %v984_v48 = vadd.f32 %v944_v4, %v872_v21  ;;  %v1058_v43 = vmul.f32 %v4929_v26, %v3581_v37  ;;  %v3610_v9 = vunpack.c.h.bf16 %v4920_v28  ;;  %v277_v8 = vmul.f32 %v4935_v47, %v3586_v49 }
  0x9c   :  { %v650_v5 = vadd.f32 %v610_v57, %v538_v0  ;;  %v875_v44 = vadd.f32 %v835_v10, %v763_v53  ;;  %v389_v15 = vmul.f32 %v4940_v6, %v3590_v62  ;;  %v501_v3 = vmul.f32 %v4945_v11, %v3594_v7  ;;  %v4980_v53 = vld [vmem:[#allocation5 + $0x7] ss:$0 sm:$0xff] }
  0x9d   :  { %v1096_v37 = vadd.f32 %v1056_v39, %v984_v48  ;;  %v3614_v34 = vunpack.c.h.bf16 %v4927_v59  ;;  %v613_v50 = vmul.f32 %v4951_v35, %v3598_v16  ;;  %v725_v55 = vmul.f32 %v4956_v40, %v3602_v13 }
  0x9e   :  { %v762_v4 = vadd.f32 %v722_v30, %v650_v5  ;;  %v987_v31 = vadd.f32 %v947_v46, %v875_v44  ;;  %v429_v38 = vadd.f32 %v389_v15, %v277_v8  ;;  %v837_v39 = vmul.f32 %v4961_v45, %v3606_v22 }
  0x9f   :  { %3256 = vst [vmem:[#allocation7 + $0xa0] sm:$0xff] %v1096_v37  ;;  %1156 = vadd.xlane.f32.xlu0 %v1096_v37  ;;  %v949_v46 = vmul.f32 %v4966_v14, %v3610_v9  ;;  %v3585_v52 = vunpack.c.l.bf16 %v4889_v51  ;;  %v3589_v19 = vunpack.c.l.bf16 %v4900_v36  ;;  %v3593_v24 = vunpack.c.l.bf16 %v4902_v63 }
  0xa0   :  { %v874_v10 = vadd.f32 %v834_v61, %v762_v4  ;;  %v1099_v12 = vadd.f32 %v4892_v58, %v987_v31  ;;  %v541_v20 = vadd.f32 %v501_v3, %v429_v38  ;;  %v3597_v57 = vunpack.c.l.bf16 %v4907_v42  ;;  %v5010_v42 = vld [vmem:[#allocation2 + $0x1c0] sm:$0xff]  }
  0xa1   :  { %v3601_v1 = vunpack.c.l.bf16 %v4909_v56  ;;  %v3605_v32 = vunpack.c.l.bf16 %v4911_v27  ;;  %v3609_v30 = vunpack.c.l.bf16 %v4920_v28  ;;  %v3613_v61 = vunpack.c.l.bf16 %v4927_v59  ;;  %v5015_v27 = vld [vmem:[#allocation2 + $0x1c8] sm:$0xff]  }
  0xa2   :  { %v986_v33 = vadd.f32 %v946_v54, %v874_v10  ;;  %3259 = vst [vmem:[#allocation7 + $0xb8] sm:$0xff] %v1099_v12  ;;  %1162 = vadd.xlane.f32.xlu1 %v1099_v12  ;;  %v653_v17 = vadd.f32 %v613_v50, %v541_v20  ;;  %v276_v21 = vmul.f32 %v4935_v47, %v3585_v52  ;;  %v5020_v20 = vld [vmem:[#allocation2 + $0x1d8] sm:$0xff]  }
  0xa3   :  { %v388_v58 = vmul.f32 %v4940_v6, %v3589_v19  ;;  %v1061_v54 = vmul.f32 %v4980_v53, %v3614_v34  ;;  %v500_v48 = vmul.f32 %v4945_v11, %v3593_v24  ;;  %v612_v5 = vmul.f32 %v4951_v35, %v3597_v57 }
  0xa4   :  { %v1098_v0 = vadd.f32 %v1058_v43, %v986_v33  ;;  %v765_v44 = vadd.f32 %v725_v55, %v653_v17  ;;  %v724_v8 = vmul.f32 %v4956_v40, %v3601_v1  ;;  %v836_v15 = vmul.f32 %v4961_v45, %v3605_v32  ;;  %v5024_v33 = vld [vmem:[#allocation2 + $0x1e8] sm:$0xff]  }
  0xa5   :  { %v428_v28 = vadd.f32 %v388_v58, %v276_v21  ;;  %v948_v59 = vmul.f32 %v4966_v14, %v3609_v30  ;;  %v279_v43 = vmul.f32 %v4883_v18, %v3586_v49  ;;  %v391_v3 = vmul.f32 %v4886_v29, %v3590_v62  ;;  %v5029_v21 = vld [vmem:[#allocation2 + $0x1f0] sm:$0xff]  }
  0xa6   :  { %3258 = vst [vmem:[#allocation7 + $0xb0] sm:$0xff] %v1098_v0  ;;  %1160 = vadd.xlane.f32.xlu0 %v1098_v0  ;;  %v503_v37 = vmul.f32 %v4894_v23, %v3594_v7  ;;  %v877_v4 = vadd.f32 %v837_v39, %v765_v44  ;;  %v1060_v31 = vmul.f32 %v4980_v53, %v3613_v61  ;;  %v3618_v17 = vunpack.c.h.bf16 %v5010_v42 }
  0xa7   :  { %v540_v50 = vadd.f32 %v500_v48, %v428_v28  ;;  %v615_v38 = vmul.f32 %v4897_v25, %v3598_v16  ;;  %v431_v55 = vadd.f32 %v391_v3, %v279_v43  ;;  %v727_v51 = vmul.f32 %v4904_v41, %v3602_v13 }
  0xa8   :  { %v839_v36 = vmul.f32 %v4913_v2, %v3606_v22  ;;  %v951_v63 = vmul.f32 %v4916_v60, %v3610_v9  ;;  %v989_v49 = vadd.f32 %v949_v46, %v877_v4  ;;  %v278_v7 = vmul.f32 %v4883_v18, %v3585_v52  ;;  %v5017_v22 = vld [vmem:[#allocation2 + $0x1d0] sm:$0xff]  }
  0xa9   :  { %v652_v62 = vadd.f32 %v612_v5, %v540_v50  ;;  %v390_v39 = vmul.f32 %v4886_v29, %v3589_v19  ;;  %v543_v16 = vadd.f32 %v503_v37, %v431_v55  ;;  %v1063_v10 = vmul.f32 %v4929_v26, %v3614_v34  ;;  %v5022_v19 = vld [vmem:[#allocation2 + $0x1e0] sm:$0xff]  }
  0xaa   :  { %v502_v56 = vmul.f32 %v4894_v23, %v3593_v24  ;;  %v614_v13 = vmul.f32 %v4897_v25, %v3597_v57  ;;  %v1101_v9 = vadd.f32 %v1061_v54, %v989_v49  ;;  %v726_v52 = vmul.f32 %v4904_v41, %v3601_v1 }
  0xab   :  { %v764_v46 = vadd.f32 %v724_v8, %v652_v62  ;;  %v430_v12 = vadd.f32 %v390_v39, %v278_v7  ;;  %v655_v34 = vadd.f32 %v615_v38, %v543_v16  ;;  %v838_v24 = vmul.f32 %v4913_v2, %v3605_v32 }
  0xac   :  { %v950_v57 = vmul.f32 %v4916_v60, %v3609_v30  ;;  %3261 = vst [vmem:[#allocation7 + $0xc8] sm:$0xff] %v1101_v9  ;;  %1166 = vadd.xlane.f32.xlu1 %v1101_v9  ;;  %v3622_v1 = vunpack.c.h.bf16 %v5015_v27  ;;  %v3626_v54 = vunpack.c.h.bf16 %v5017_v22  ;;  %v3630_v5 = vunpack.c.h.bf16 %v5020_v20  ;;  %v5036_v30 = vld [vmem:[#allocation2 + $0x1f8] sm:$0xff]  }
  0xad   :  { %v876_v58 = vadd.f32 %v836_v15, %v764_v46  ;;  %v542_v0 = vadd.f32 %v502_v56, %v430_v12  ;;  %v767_v48 = vadd.f32 %v727_v51, %v655_v34  ;;  %v3634_v44 = vunpack.c.h.bf16 %v5022_v19 }
  0xae   :  { %v3638_v32 = vunpack.c.h.bf16 %v5024_v33  ;;  %v1062_v43 = vmul.f32 %v4929_v26, %v3613_v61  ;;  %v3642_v15 = vunpack.c.h.bf16 %v5029_v21  ;;  %v281_v37 = vmul.f32 %v4935_v47, %v3618_v17 }
  0xaf   :  { %v988_v28 = vadd.f32 %v948_v59, %v876_v58  ;;  %v654_v8 = vadd.f32 %v614_v13, %v542_v0  ;;  %v879_v3 = vadd.f32 %v839_v36, %v767_v48  ;;  %v393_v4 = vmul.f32 %v4940_v6, %v3622_v1 }
  0xb0   :  { %v505_v50 = vmul.f32 %v4945_v11, %v3626_v54  ;;  %v3646_v51 = vunpack.c.h.bf16 %v5036_v30  ;;  %v617_v49 = vmul.f32 %v4951_v35, %v3630_v5  ;;  %v729_v7 = vmul.f32 %v4956_v40, %v3634_v44 }
  0xb1   :  { %v1100_v38 = vadd.f32 %v1060_v31, %v988_v28  ;;  %v766_v55 = vadd.f32 %v726_v52, %v654_v8  ;;  %v991_v62 = vadd.f32 %v951_v63, %v879_v3  ;;  %v433_v59 = vadd.f32 %v393_v4, %v281_v37 }
  0xb2   :  { %v841_v61 = vmul.f32 %v4961_v45, %v3638_v32  ;;  %v953_v39 = vmul.f32 %v4966_v14, %v3642_v15  ;;  %v3617_v16 = vunpack.c.l.bf16 %v5010_v42  ;;  %v3621_v31 = vunpack.c.l.bf16 %v5015_v27 }
  0xb3   :  { %3260 = vst [vmem:[#allocation7 + $0xc0] sm:$0xff] %v1100_v38  ;;  %1164 = vadd.xlane.f32.xlu0 %v1100_v38  ;;  %v878_v36 = vadd.f32 %v838_v24, %v766_v55  ;;  %v1103_v56 = vadd.f32 %v1063_v10, %v991_v62  ;;  %v545_v13 = vadd.f32 %v505_v50, %v433_v59  ;;  %v3625_v9 = vunpack.c.l.bf16 %v5017_v22 }
  0xb4   :  { %v3629_v63 = vunpack.c.l.bf16 %v5020_v20  ;;  %v3633_v12 = vunpack.c.l.bf16 %v5022_v19  ;;  %v3637_v52 = vunpack.c.l.bf16 %v5024_v33  ;;  %v3641_v34 = vunpack.c.l.bf16 %v5029_v21 }
  0xb5   :  { %v990_v46 = vadd.f32 %v950_v57, %v878_v36  ;;  %3263 = vst [vmem:[#allocation7 + $0xd8] sm:$0xff] %v1103_v56  ;;  %1170 = vadd.xlane.f32.xlu1 %v1103_v56  ;;  %v657_v24 = vadd.f32 %v617_v49, %v545_v13  ;;  %v3645_v42 = vunpack.c.l.bf16 %v5036_v30  ;;  %v280_v27 = vmul.f32 %v4935_v47, %v3617_v16  ;;  %v5084_v13 = vld [vmem:[#allocation2 + $0x218] sm:$0xff]  }
  0xb6   :  { %v392_v10 = vmul.f32 %v4940_v6, %v3621_v31  ;;  %v1065_v22 = vmul.f32 %v4980_v53, %v3646_v51  ;;  %v504_v20 = vmul.f32 %v4945_v11, %v3625_v9  ;;  %v616_v19 = vmul.f32 %v4951_v35, %v3629_v63 }
  0xb7   :  { %v1102_v58 = vadd.f32 %v1062_v43, %v990_v46  ;;  %v769_v57 = vadd.f32 %v729_v7, %v657_v24  ;;  %v728_v21 = vmul.f32 %v4956_v40, %v3633_v12  ;;  %v840_v0 = vmul.f32 %v4961_v45, %v3637_v52  ;;  %v5088_v46 = vld [vmem:[#allocation2 + $0x228] sm:$0xff]  }
  0xb8   :  { %v432_v33 = vadd.f32 %v392_v10, %v280_v27  ;;  %v952_v48 = vmul.f32 %v4966_v14, %v3641_v34  ;;  %v283_v30 = vmul.f32 %v4883_v18, %v3618_v17  ;;  %v395_v28 = vmul.f32 %v4886_v29, %v3622_v1  ;;  %v5093_v27 = vld [vmem:[#allocation2 + $0x230] sm:$0xff]  }
  0xb9   :  { %3262 = vst [vmem:[#allocation7 + $0xd0] sm:$0xff] %v1102_v58  ;;  %1168 = vadd.xlane.f32.xlu0 %v1102_v58  ;;  %v507_v8 = vmul.f32 %v4894_v23, %v3626_v54  ;;  %v881_v43 = vadd.f32 %v841_v61, %v769_v57  ;;  %v1064_v37 = vmul.f32 %v4980_v53, %v3645_v42  ;;  %v5074_v54 = vld [vmem:[#allocation2 + $0x200] sm:$0xff]  }
  0xba   :  { %v544_v3 = vadd.f32 %v504_v20, %v432_v33  ;;  %v619_v4 = vmul.f32 %v4897_v25, %v3630_v5  ;;  %v435_v50 = vadd.f32 %v395_v28, %v283_v30  ;;  %v731_v38 = vmul.f32 %v4904_v41, %v3634_v44  ;;  %v5079_v44 = vld [vmem:[#allocation2 + $0x208] sm:$0xff]  }
  0xbb   :  { %v843_v55 = vmul.f32 %v4913_v2, %v3638_v32  ;;  %v955_v49 = vmul.f32 %v4916_v60, %v3642_v15  ;;  %v993_v62 = vadd.f32 %v953_v39, %v881_v43  ;;  %v282_v17 = vmul.f32 %v4883_v18, %v3617_v16  ;;  %v5081_v32 = vld [vmem:[#allocation2 + $0x210] sm:$0xff]  }
  0xbc   :  { %v656_v59 = vadd.f32 %v616_v19, %v544_v3  ;;  %v394_v1 = vmul.f32 %v4886_v29, %v3621_v31  ;;  %v547_v7 = vadd.f32 %v507_v8, %v435_v50  ;;  %v1067_v61 = vmul.f32 %v4929_v26, %v3646_v51  ;;  %v5086_v31 = vld [vmem:[#allocation2 + $0x220] sm:$0xff]  }
  0xbd   :  { %v506_v5 = vmul.f32 %v4894_v23, %v3625_v9  ;;  %v618_v36 = vmul.f32 %v4897_v25, %v3629_v63  ;;  %v1105_v15 = vadd.f32 %v1065_v22, %v993_v62  ;;  %v730_v16 = vmul.f32 %v4904_v41, %v3633_v12 }
  0xbe   :  { %v768_v39 = vadd.f32 %v728_v21, %v656_v59  ;;  %v434_v56 = vadd.f32 %v394_v1, %v282_v17  ;;  %v659_v51 = vadd.f32 %v619_v4, %v547_v7  ;;  %v842_v9 = vmul.f32 %v4913_v2, %v3637_v52 }
  0xbf   :  { %v954_v63 = vmul.f32 %v4916_v60, %v3641_v34  ;;  %v3650_v24 = vunpack.c.h.bf16 %v5074_v54  ;;  %3265 = vst [vmem:[#allocation7 + $0xe8] sm:$0xff] %v1105_v15  ;;  %1174 = vadd.xlane.f32.xlu1 %v1105_v15  ;;  %v3654_v12 = vunpack.c.h.bf16 %v5079_v44  ;;  %v3658_v22 = vunpack.c.h.bf16 %v5081_v32  ;;  %v5100_v34 = vld [vmem:[#allocation2 + $0x238] sm:$0xff]  }
  0xc0   :  { %v880_v10 = vadd.f32 %v840_v0, %v768_v39  ;;  %v546_v58 = vadd.f32 %v506_v5, %v434_v56  ;;  %v771_v20 = vadd.f32 %v731_v38, %v659_v51  ;;  %v3662_v19 = vunpack.c.h.bf16 %v5084_v13 }
  0xc1   :  { %v3666_v57 = vunpack.c.h.bf16 %v5086_v31  ;;  %v3670_v52 = vunpack.c.h.bf16 %v5088_v46  ;;  %v1066_v30 = vmul.f32 %v4929_v26, %v3645_v42  ;;  %v3674_v0 = vunpack.c.h.bf16 %v5093_v27 }
  0xc2   :  { %v992_v33 = vadd.f32 %v952_v48, %v880_v10  ;;  %v658_v21 = vadd.f32 %v618_v36, %v546_v58  ;;  %v883_v28 = vadd.f32 %v843_v55, %v771_v20  ;;  %v285_v8 = vmul.f32 %v4935_v47, %v3650_v24 }
  0xc3   :  { %v397_v43 = vmul.f32 %v4940_v6, %v3654_v12  ;;  %v509_v3 = vmul.f32 %v4945_v11, %v3658_v22  ;;  %v3678_v38 = vunpack.c.h.bf16 %v5100_v34  ;;  %v621_v62 = vmul.f32 %v4951_v35, %v3662_v19 }
  0xc4   :  { %v1104_v4 = vadd.f32 %v1064_v37, %v992_v33  ;;  %v770_v50 = vadd.f32 %v730_v16, %v658_v21  ;;  %v995_v59 = vadd.f32 %v955_v49, %v883_v28  ;;  %v733_v17 = vmul.f32 %v4956_v40, %v3666_v57 }
  0xc5   :  { %v437_v48 = vadd.f32 %v397_v43, %v285_v8  ;;  %v845_v42 = vmul.f32 %v4961_v45, %v3670_v52  ;;  %v957_v1 = vmul.f32 %v4966_v14, %v3674_v0  ;;  %v3649_v7 = vunpack.c.l.bf16 %v5074_v54 }
  0xc6   :  { %3264 = vst [vmem:[#allocation7 + $0xe0] sm:$0xff] %v1104_v4  ;;  %1172 = vadd.xlane.f32.xlu0 %v1104_v4  ;;  %v882_v55 = vadd.f32 %v842_v9, %v770_v50  ;;  %v3653_v37 = vunpack.c.l.bf16 %v5079_v44  ;;  %v1107_v5 = vadd.f32 %v1067_v61, %v995_v59  ;;  %v3657_v15 = vunpack.c.l.bf16 %v5081_v32 }
  0xc7   :  { %v549_v36 = vadd.f32 %v509_v3, %v437_v48  ;;  %v3661_v49 = vunpack.c.l.bf16 %v5084_v13  ;;  %v3665_v56 = vunpack.c.l.bf16 %v5086_v31  ;;  %v3669_v16 = vunpack.c.l.bf16 %v5088_v46 }
  0xc8   :  { %v994_v39 = vadd.f32 %v954_v63, %v882_v55  ;;  %v3673_v51 = vunpack.c.l.bf16 %v5093_v27  ;;  %3267 = vst [vmem:[#allocation7 + $0xf8] sm:$0xff] %v1107_v5  ;;  %1178 = vadd.xlane.f32.xlu1 %v1107_v5  ;;  %v3677_v54 = vunpack.c.l.bf16 %v5100_v34  ;;  %v284_v44 = vmul.f32 %v4935_v47, %v3649_v7 }
  0xc9   :  { %v661_v9 = vadd.f32 %v621_v62, %v549_v36  ;;  %v396_v61 = vmul.f32 %v4940_v6, %v3653_v37  ;;  %v1069_v32 = vmul.f32 %v4980_v53, %v3678_v38  ;;  %v508_v13 = vmul.f32 %v4945_v11, %v3657_v15  ;;  %v5148_v36 = vld [vmem:[#allocation2 + $0x258] sm:$0xff]  }
  0xca   :  { %v1106_v10 = vadd.f32 %v1066_v30, %v994_v39  ;;  %v620_v31 = vmul.f32 %v4951_v35, %v3661_v49  ;;  %v732_v27 = vmul.f32 %v4956_v40, %v3665_v56  ;;  %v844_v58 = vmul.f32 %v4961_v45, %v3669_v16  ;;  %v5152_v39 = vld [vmem:[#allocation2 + $0x268] sm:$0xff]  }
  0xcb   :  { %v773_v63 = vadd.f32 %v733_v17, %v661_v9  ;;  %v436_v46 = vadd.f32 %v396_v61, %v284_v44  ;;  %v956_v20 = vmul.f32 %v4966_v14, %v3673_v51  ;;  %v287_v34 = vmul.f32 %v4883_v18, %v3650_v24  ;;  %v5157_v44 = vld [vmem:[#allocation2 + $0x270] sm:$0xff]  }
  0xcc   :  { %3266 = vst [vmem:[#allocation7 + $0xf0] sm:$0xff] %v1106_v10  ;;  %1176 = vadd.xlane.f32.xlu0 %v1106_v10  ;;  %v399_v33 = vmul.f32 %v4886_v29, %v3654_v12  ;;  %v511_v21 = vmul.f32 %v4894_v23, %v3658_v22  ;;  %v1068_v8 = vmul.f32 %v4980_v53, %v3677_v54  ;;  %v5138_v22 = vld [vmem:[#allocation2 + $0x240] sm:$0xff]  }
  0xcd   :  { %v885_v30 = vadd.f32 %v845_v42, %v773_v63  ;;  %v548_v28 = vadd.f32 %v508_v13, %v436_v46  ;;  %v623_v43 = vmul.f32 %v4897_v25, %v3662_v19  ;;  %v735_v4 = vmul.f32 %v4904_v41, %v3666_v57  ;;  %v5143_v57 = vld [vmem:[#allocation2 + $0x248] sm:$0xff]  }
  0xce   :  { %v439_v3 = vadd.f32 %v399_v33, %v287_v34  ;;  %v847_v50 = vmul.f32 %v4913_v2, %v3670_v52  ;;  %v959_v62 = vmul.f32 %v4916_v60, %v3674_v0  ;;  %v286_v24 = vmul.f32 %v4883_v18, %v3649_v7  ;;  %v5145_v52 = vld [vmem:[#allocation2 + $0x250] sm:$0xff]   ;;  %v5168_v33 = vpop.xlane.xlu1 %1120 }
  0xcf   :  { %v997_v59 = vadd.f32 %v957_v1, %v885_v30  ;;  %v660_v48 = vadd.f32 %v620_v31, %v548_v28  ;;  %v398_v12 = vmul.f32 %v4886_v29, %v3653_v37  ;;  %v1071_v42 = vmul.f32 %v4929_v26, %v3678_v38  ;;  %v5150_v37 = vld [vmem:[#allocation2 + $0x260] sm:$0xff]  }
  0xd0   :  { %v551_v17 = vadd.f32 %v511_v21, %v439_v3  ;;  %v510_v19 = vmul.f32 %v4894_v23, %v3657_v15  ;;  %v622_v55 = vmul.f32 %v4897_v25, %v3661_v49  ;;  %v734_v7 = vmul.f32 %v4904_v41, %v3665_v56  ;;  %v5175_v3 = vpop.xlane.xlu0 %1116 }
  0xd1   :  { %v1109_v0 = vadd.f32 %v1069_v32, %v997_v59  ;;  %v772_v1 = vadd.f32 %v732_v27, %v660_v48  ;;  %v438_v5 = vadd.f32 %v398_v12, %v286_v24  ;;  %v846_v15 = vmul.f32 %v4913_v2, %v3669_v16 }
  0xd2   :  { %v663_v38 = vadd.f32 %v623_v43, %v551_v17  ;;  %v958_v49 = vmul.f32 %v4916_v60, %v3673_v51  ;;  %v3682_v9 = vunpack.c.h.bf16 %v5138_v22  ;;  %v3686_v56 = vunpack.c.h.bf16 %v5143_v57  ;;  %v5164_v51 = vld [vmem:[#allocation2 + $0x278] sm:$0xff]  }
  0xd3   :  { %3269 = vst [vmem:[#allocation7 + $0x108] sm:$0xff] %v1109_v0  ;;  %1182 = vadd.xlane.f32.xlu1 %v1109_v0  ;;  %v884_v61 = vadd.f32 %v844_v58, %v772_v1  ;;  %v550_v10 = vadd.f32 %v510_v19, %v438_v5  ;;  %v3690_v32 = vunpack.c.h.bf16 %v5145_v52  ;;  %v3694_v31 = vunpack.c.h.bf16 %v5148_v36 }
  0xd4   :  { %v775_v13 = vadd.f32 %v735_v4, %v663_v38  ;;  %v3698_v63 = vunpack.c.h.bf16 %v5150_v37  ;;  %v3702_v16 = vunpack.c.h.bf16 %v5152_v39  ;;  %v1070_v34 = vmul.f32 %v4929_v26, %v3677_v54 }
  0xd5   :  { %v996_v46 = vadd.f32 %v956_v20, %v884_v61  ;;  %v662_v27 = vadd.f32 %v622_v55, %v550_v10  ;;  %v3706_v58 = vunpack.c.h.bf16 %v5157_v44  ;;  %v289_v30 = vmul.f32 %v4935_v47, %v3682_v9 }
  0xd6   :  { %v887_v21 = vadd.f32 %v847_v50, %v775_v13  ;;  %v401_v28 = vmul.f32 %v4940_v6, %v3686_v56  ;;  %v513_v43 = vmul.f32 %v4945_v11, %v3690_v32  ;;  %v3710_v59 = vunpack.c.h.bf16 %v5164_v51 }
  0xd7   :  { %v1108_v4 = vadd.f32 %v1068_v8, %v996_v46  ;;  %v774_v20 = vadd.f32 %v734_v7, %v662_v27  ;;  %v625_v54 = vmul.f32 %v4951_v35, %v3694_v31  ;;  %v737_v50 = vmul.f32 %v4956_v40, %v3698_v63 }
  0xd8   :  { %v999_v48 = vadd.f32 %v959_v62, %v887_v21  ;;  %v441_v24 = vadd.f32 %v401_v28, %v289_v30  ;;  %v849_v12 = vmul.f32 %v4961_v45, %v3702_v16  ;;  %v961_v19 = vmul.f32 %v4966_v14, %v3706_v58 }
  0xd9   :  { %3268 = vst [vmem:[#allocation7 + $0x100] sm:$0xff] %v1108_v4  ;;  %1180 = vadd.xlane.f32.xlu0 %v1108_v4  ;;  %v886_v17 = vadd.f32 %v846_v15, %v774_v20  ;;  %v3681_v55 = vunpack.c.l.bf16 %v5138_v22  ;;  %v3685_v8 = vunpack.c.l.bf16 %v5143_v57  ;;  %v3689_v5 = vunpack.c.l.bf16 %v5145_v52  ;;  %v1123_v15 = vpop.xlane.xlu1 %1122  ;;  %v1119_v52 = vpop.xlane.xlu0 %1118 }
  0xda   :  { %v1111_v0 = vadd.f32 %v1071_v42, %v999_v48  ;;  %v553_v1 = vadd.f32 %v513_v43, %v441_v24  ;;  %v3693_v62 = vunpack.c.l.bf16 %v5148_v36  ;;  %v3697_v38 = vunpack.c.l.bf16 %v5150_v37 }
  0xdb   :  { %v998_v7 = vadd.f32 %v958_v49, %v886_v17  ;;  %v3701_v61 = vunpack.c.l.bf16 %v5152_v39  ;;  %v3705_v10 = vunpack.c.l.bf16 %v5157_v44  ;;  %v3709_v46 = vunpack.c.l.bf16 %v5164_v51 }
  0xdc   :  { %3271 = vst [vmem:[#allocation7 + $0x118] sm:$0xff] %v1111_v0  ;;  %1186 = vadd.xlane.f32.xlu1 %v1111_v0  ;;  %v665_v13 = vadd.f32 %v625_v54, %v553_v1  ;;  %v288_v42 = vmul.f32 %v4935_v47, %v3681_v55  ;;  %v400_v57 = vmul.f32 %v4940_v6, %v3685_v8  ;;  %v5228_v0 = vmul.f32 0.0078125, %v1119_v52 }
  0xdd   :  { %v1110_v27 = vadd.f32 %v1070_v34, %v998_v7  ;;  %v1073_v36 = vmul.f32 %v4980_v53, %v3710_v59  ;;  %v512_v37 = vmul.f32 %v4945_v11, %v3689_v5  ;;  %v624_v39 = vmul.f32 %v4951_v35, %v3693_v62 }
  0xde   :  { %v777_v49 = vadd.f32 %v737_v50, %v665_v13  ;;  %v440_v44 = vadd.f32 %v400_v57, %v288_v42  ;;  %v736_v21 = vmul.f32 %v4956_v40, %v3697_v38  ;;  %v848_v30 = vmul.f32 %v4961_v45, %v3701_v61 }
  0xdf   :  { %3270 = vst [vmem:[#allocation7 + $0x110] sm:$0xff] %v1110_v27  ;;  %1184 = vadd.xlane.f32.xlu0 %v1110_v27  ;;  %v960_v47 = vmul.f32 %v4966_v14, %v3705_v10  ;;  %v291_v6 = vmul.f32 %v4883_v18, %v3682_v9  ;;  %v403_v34 = vmul.f32 %v4886_v29, %v3686_v56  ;;  %v1127_v9 = vpop.xlane.xlu1 %1126  ;;  %v1125_v48 = vpop.xlane.xlu0 %1124 }
  0xe0   :  { %v515_v11 = vmul.f32 %v4894_v23, %v3690_v32  ;;  %v889_v28 = vadd.f32 %v849_v12, %v777_v49  ;;  %v552_v35 = vadd.f32 %v512_v37, %v440_v44  ;;  %v1072_v40 = vmul.f32 %v4980_v53, %v3709_v46 }
  0xe1   :  { %v627_v45 = vmul.f32 %v4897_v25, %v3694_v31  ;;  %v443_v43 = vadd.f32 %v403_v34, %v291_v6  ;;  %v739_v4 = vmul.f32 %v4904_v41, %v3698_v63  ;;  %v851_v14 = vmul.f32 %v4913_v2, %v3702_v16 }
  0xe2   :  { %v963_v22 = vmul.f32 %v4916_v60, %v3706_v58  ;;  %v1001_v20 = vadd.f32 %v961_v19, %v889_v28  ;;  %v664_v56 = vadd.f32 %v624_v39, %v552_v35  ;;  %v290_v32 = vmul.f32 %v4883_v18, %v3681_v55 }
  0xe3   :  { %v402_v54 = vmul.f32 %v4886_v29, %v3685_v8  ;;  %v555_v24 = vadd.f32 %v515_v11, %v443_v43  ;;  %v1075_v53 = vmul.f32 %v4929_v26, %v3710_v59  ;;  %v514_v31 = vmul.f32 %v4894_v23, %v3689_v5 }
  0xe4   :  { %v626_v50 = vmul.f32 %v4897_v25, %v3693_v62  ;;  %v1113_v63 = vadd.f32 %v1073_v36, %v1001_v20  ;;  %v776_v12 = vadd.f32 %v736_v21, %v664_v56  ;;  %v738_v58 = vmul.f32 %v4904_v41, %v3697_v38 }
  0xe5   :  { %v442_v16 = vadd.f32 %v402_v54, %v290_v32  ;;  %v667_v17 = vadd.f32 %v627_v45, %v555_v24  ;;  %v850_v19 = vmul.f32 %v4913_v2, %v3701_v61  ;;  %v962_v18 = vmul.f32 %v4916_v60, %v3705_v10  ;;  %v1131_v60 = vpop.xlane.xlu1 %1130  ;;  %v1129_v62 = vpop.xlane.xlu0 %1128 }
  0xe6   :  { %v5219_v29 = vmul.f32 0.0078125, %v5168_v33  ;;  %3273 = vst [vmem:[#allocation7 + $0x128] sm:$0xff] %v1113_v63  ;;  %1190 = vadd.xlane.f32.xlu1 %v1113_v63  ;;  %v888_v59 = vadd.f32 %v848_v30, %v776_v12  ;;  %v5222_v23 = vmul.f32 0.0078125, %v5175_v3  ;;  %v5224_v25 = vmul.f32 0.0078125, %v1123_v15 }
  0xe7   :  { %v554_v55 = vadd.f32 %v514_v31, %v442_v16  ;;  %v779_v8 = vadd.f32 %v739_v4, %v667_v17  ;;  %v5230_v2 = vmul.f32 0.0078125, %v1127_v9  ;;  %v1237_v38 = vmul.f32 %v5228_v0, %v5228_v0 }
  0xe8   :  { %v1238_v41 = vmul.f32 %v5219_v29, %v5219_v29  ;;  %v1000_v33 = vadd.f32 %v960_v47, %v888_v59  ;;  %v1236_v5 = vmul.f32 %v5222_v23, %v5222_v23  ;;  %v1239_v3 = vmul.f32 %v5224_v25, %v5224_v25 }
  0xe9   :  { %v666_v1 = vadd.f32 %v626_v50, %v554_v55  ;;  %v891_v7 = vadd.f32 %v851_v14, %v779_v8  ;;  %v1241_v61 = vmul.f32 %v5230_v2, %v5230_v2  ;;  %v5240_v10 = vmul.f32 0.0078125, %v1125_v48 }
  0xea   :  { %v1112_v15 = vadd.f32 %v1072_v40, %v1000_v33  ;;  %v1283_v42 = vadd.f32 %v1239_v3, %v1238_v41  ;;  %v5242_v57 = vmul.f32 0.0078125, %v1131_v60  ;;  %v1276_v27 = vadd.f32 %v1237_v38, %v1236_v5 }
  0xeb   :  { %v778_v13 = vadd.f32 %v738_v58, %v666_v1  ;;  %v1003_v52 = vadd.f32 %v963_v22, %v891_v7  ;;  %v1240_v36 = vmul.f32 %v5240_v10, %v5240_v10  ;;  %v5246_v37 = vmul.f32 0.0078125, %v1129_v62 }
  0xec   :  { %3272 = vst [vmem:[#allocation7 + $0x120] sm:$0xff] %v1112_v15  ;;  %1188 = vadd.xlane.f32.xlu0 %v1112_v15  ;;  %v1074_v49 = vmul.f32 %v4929_v26, %v3709_v46  ;;  %v1284_v44 = vrot.slane %v1283_v42, 4  ;;  %v1243_v21 = vmul.f32 %v5242_v57, %v5242_v57  ;;  %v1277_v47 = vrot.slane %v1276_v27, 4  ;;  %v1135_v51 = vpop.xlane.xlu1 %1134 }
  0xed   :  { %v890_v39 = vadd.f32 %v850_v19, %v778_v13  ;;  %v1115_v30 = vadd.f32 %v1075_v53, %v1003_v52  ;;  %v1290_v6 = vadd.f32 %v1241_v61, %v1240_v36  ;;  %v1242_v34 = vmul.f32 %v5246_v37, %v5246_v37 }
  0xee   :  { %v1285_v28 = vadd.f32 %v1284_v44, %v1283_v42  ;;  %v1278_v35 = vadd.f32 %v1277_v47, %v1276_v27  ;;  %v5255_v9 = vmul.f32 0.0078125, %v1135_v51 }
  0xef   :  { %v1002_v11 = vadd.f32 %v962_v18, %v890_v39  ;;  %3275 = vst [vmem:[#allocation7 + $0x138] sm:$0xff] %v1115_v30  ;;  %1194 = vadd.xlane.f32.xlu1 %v1115_v30  ;;  %v1291_v40 = vrot.slane %v1290_v6, 4  ;;  %v1297_v45 = vadd.f32 %v1243_v21, %v1242_v34 }
  0xf0   :  { %v1286_v26 = vrot.slane %v1285_v28, 2  ;;  %v1279_v46 = vrot.slane %v1278_v35, 2  ;;  %v1245_v12 = vmul.f32 %v5255_v9, %v5255_v9 }
  0xf1   :  { %v1114_v43 = vadd.f32 %v1074_v49, %v1002_v11  ;;  %v1292_v4 = vadd.f32 %v1291_v40, %v1290_v6  ;;  %v1298_v14 = vrot.slane %v1297_v45, 4 }
  0xf2   :  { %v1287_v22 = vadd.f32 %v1286_v26, %v1285_v28  ;;  %v1280_v20 = vadd.f32 %v1279_v46, %v1278_v35  ;;  %v1133_v48 = vpop.xlane.xlu0 %1132 }
  0xf3   :  { %3274 = vst [vmem:[#allocation7 + $0x130] sm:$0xff] %v1114_v43  ;;  %1192 = vadd.xlane.f32.xlu0 %v1114_v43  ;;  %v1293_v56 = vrot.slane %v1292_v4, 2  ;;  %v1299_v32 = vadd.f32 %v1298_v14, %v1297_v45  ;;  %v5257_v50 = vmul.f32 0.0078125, %v1133_v48 }
  0xf4   :  { %v1288_v54 = vrot.slane %v1287_v22, 1  ;;  %v1281_v24 = vrot.slane %v1280_v20, 1 }
  0xf5   :  { %v1294_v53 = vadd.f32 %v1293_v56, %v1292_v4  ;;  %v1300_v31 = vrot.slane %v1299_v32, 2  ;;  %v1244_v19 = vmul.f32 %v5257_v50, %v5257_v50  ;;  %v1139_v18 = vpop.xlane.xlu1 %1138 }
  0xf6   :  { %v1289_v63 = vadd.f32 %v1288_v54, %v1287_v22  ;;  %v1282_v16 = vadd.f32 %v1281_v24, %v1280_v20  ;;  %v5263_v55 = vmul.f32 0.0078125, %v1139_v18  ;;  %v4219_v18 = vld [vmem:[#allocation7 + $0x8] sm:$0xff] }
  0xf7   :  { %v1295_v58 = vrot.slane %v1294_v53, 1  ;;  %v1301_v17 = vadd.f32 %v1300_v31, %v1299_v32  ;;  %v1304_v33 = vadd.f32 %v1245_v12, %v1244_v19 }
  0xf8   :  { %v1417_v59 = vadd.f32 1.0, %v1289_v63  ;;  %v1416_v8 = vadd.f32 1.0, %v1282_v16  ;;  %v1247_v1 = vmul.f32 %v5263_v55, %v5263_v55 }
  0xf9   :  { %v1296_v41 = vadd.f32 %v1295_v58, %v1294_v53  ;;  %v1302_v60 = vrot.slane %v1301_v17, 1  ;;  %v1137_v5 = vpop.xlane.xlu0 %1136  ;;  %v1305_v38 = vrot.slane %v1304_v33, 4 }
  0xfa   :  { %3800 = vrcp.f32 %v1417_v59  ;;  %v5267_v7 = vmul.f32 0.0078125, %v1137_v5 }
  0xfb   :  { %3802 = vrcp.f32 %v1416_v8  ;;  %v1418_v3 = vadd.f32 1.0, %v1296_v41  ;;  %v1303_v62 = vadd.f32 %v1302_v60, %v1301_v17  ;;  %v1306_v13 = vadd.f32 %v1305_v38, %v1304_v33  ;;  %v4218_v17 = vld [vmem:[#allocation7] sm:$0xff] }
  0xfc   :  { %3804 = vrsqrt.f32 %v1289_v63  ;;  %v1246_v15 = vmul.f32 %v5267_v7, %v5267_v7 }
  0xfd   :  { %3806 = vrcp.f32 %v1418_v3  ;;  %v1419_v61 = vadd.f32 1.0, %v1303_v62  ;;  %v1307_v52 = vrot.slane %v1306_v13, 2 }
  0xfe   :  { %3808 = vrsqrt.f32 %v1282_v16  ;;  %v1311_v42 = vadd.f32 %v1247_v1, %v1246_v15  ;;  %v4221_v15 = vld [vmem:[#allocation7 + $0x28] sm:$0xff] }
  0xff   :  { %3810 = vrcp.f32 %v1419_v61  ;;  %v1308_v36 = vadd.f32 %v1307_v52, %v1306_v13  ;;  %v1143_v39 = vpop.xlane.xlu1 %1142  ;;  %v4220_v61 = vld [vmem:[#allocation7 + $0x20] sm:$0xff] }
 0x100   :  { %3812 = vrsqrt.f32 %v1296_v41  ;;  %v1312_v27 = vrot.slane %v1311_v42, 4  ;;  %v5271_v34 = vmul.f32 0.0078125, %v1143_v39 }
 0x101   :  { %3814 = vrsqrt.f32 %v1303_v62  ;;  %v1309_v21 = vrot.slane %v1308_v36, 1 }
 0x102   :  { %v1313_v49 = vadd.f32 %v1312_v27, %v1311_v42  ;;  %v1249_v24 = vmul.f32 %v5271_v34, %v5271_v34 }
 0x103   :  { %v5273_v35 = vadd.f32 %v1309_v21, %v1308_v36 }
 0x104   :  { %v3801_v44 = vpop.eup %3800  ;;  %v1314_v6 = vrot.slane %v1313_v49, 2 }
 0x105   :  { %v3803_v30 = vpop.eup %3802  ;;  %v1457_v47 = vmul.f32 %v3801_v44, %v1289_v63  ;;  %v1420_v20 = vadd.f32 1.0, %v5273_v35  ;;  %v4222_v44 = vld [vmem:[#allocation7 + $0x30] sm:$0xff] }
 0x106   :  { %v3805_v11 = vpop.eup %3804  ;;  %v1456_v28 = vmul.f32 %v3803_v30, %v1282_v16  ;;  %v1315_v43 = vadd.f32 %v1314_v6, %v1313_v49  ;;  %v1141_v26 = vpop.xlane.xlu0 %1140  ;;  %v4223_v30 = vld [vmem:[#allocation7 + $0x38] sm:$0xff] }
 0x107   :  { %v3807_v40 = vpop.eup %3806  ;;  %v1478_v45 = vmul.f32 %v1457_v47, %v5219_v29  ;;  %v1479_v51 = vmul.f32 %v1457_v47, %v5224_v25  ;;  %3816 = vrcp.f32 %v1420_v20  ;;  %v5288_v42 = vmul.f32 0.0078125, %v1141_v26 }
 0x108   :  { %v3809_v46 = vpop.eup %3808  ;;  %v1476_v4 = vmul.f32 %v1456_v28, %v5222_v23  ;;  %v1477_v14 = vmul.f32 %v1456_v28, %v5228_v0  ;;  %v1458_v22 = vmul.f32 %v3807_v40, %v1296_v41  ;;  %v1316_v48 = vrot.slane %v1315_v43, 1  ;;  %v4216_v23 = vld [vmem:[#allocation7 + $0x10] sm:$0xff]  ;;  %v4217_v0 = vld [vmem:[#allocation7 + $0x18] sm:$0xff] }
 0x109   :  { %v3811_v56 = vpop.eup %3810  ;;  %v1538_v32 = vmul.f32 %v3805_v11, %v1478_v45  ;;  %v1539_v54 = vmul.f32 %v3805_v11, %v1479_v51  ;;  %3818 = vrsqrt.f32 %v5273_v35 }
 0x10a   :  { %v1536_v29 = vmul.f32 %v3809_v46, %v1476_v4  ;;  %v1537_v53 = vmul.f32 %v3809_v46, %v1477_v14  ;;  %v1480_v25 = vmul.f32 %v1458_v22, %v5240_v10  ;;  %v1481_v31 = vmul.f32 %v1458_v22, %v5230_v2  ;;  %v3813_v63 = vpop.eup %3812  ;;  %v1147_v2 = vpop.xlane.xlu1 %1146 }
 0x10b   :  { %v1578_v12 = vmul.f32 %v4216_v23, %v1538_v32  ;;  %v1579_v16 = vmul.f32 %v4217_v0, %v1539_v54  ;;  %v1459_v58 = vmul.f32 %v3811_v56, %v1303_v62  ;;  %v5286_v1 = vadd.f32 %v1316_v48, %v1315_v43  ;;  %v3815_v3 = vpop.eup %3814 }
 0x10c   :  { %v1576_v19 = vmul.f32 %v4218_v17, %v1536_v29  ;;  %v1577_v59 = vmul.f32 %v4219_v18, %v1537_v53  ;;  %v1540_v8 = vmul.f32 %v3813_v63, %v1480_v25  ;;  %v1541_v41 = vmul.f32 %v3813_v63, %v1481_v31  ;;  %v1145_v5 = vpop.xlane.xlu0 %1144 }
 0x10d   :  { %v1623_v60 = vadd.f32 %v1579_v16, %v1578_v12  ;;  %v1482_v33 = vmul.f32 %v1459_v58, %v5246_v37  ;;  %v1483_v10 = vmul.f32 %v1459_v58, %v5242_v57  ;;  %v1421_v37 = vadd.f32 1.0, %v5286_v1 }
 0x10e   :  { %v1616_v38 = vadd.f32 %v1577_v59, %v1576_v19  ;;  %v1580_v62 = vmul.f32 %v4220_v61, %v1540_v8  ;;  %v1581_v13 = vmul.f32 %v4221_v15, %v1541_v41  ;;  %v1248_v57 = vmul.f32 %v5288_v42, %v5288_v42  ;;  %v4225_v15 = vld [vmem:[#allocation7 + $0x48] sm:$0xff] }
 0x10f   :  { %v1542_v52 = vmul.f32 %v3815_v3, %v1482_v33  ;;  %v1543_v27 = vmul.f32 %v3815_v3, %v1483_v10  ;;  %v5294_v39 = vmul.f32 0.0078125, %v1147_v2  ;;  %v5296_v49 = vmul.f32 0.0078125, %v1145_v5 }
 0x110   :  { %v1630_v36 = vadd.f32 %v1581_v13, %v1580_v62  ;;  %3820 = vrcp.f32 %v1421_v37  ;;  %v1624_v6 = vrot.slane %v1623_v60, 4  ;;  %v1318_v11 = vadd.f32 %v1249_v24, %v1248_v57 }
 0x111   :  { %v1582_v21 = vmul.f32 %v4222_v44, %v1542_v52  ;;  %v1583_v47 = vmul.f32 %v4223_v30, %v1543_v27  ;;  %v1251_v28 = vmul.f32 %v5294_v39, %v5294_v39  ;;  %v1250_v40 = vmul.f32 %v5296_v49, %v5296_v49  ;;  %v3817_v20 = vpop.eup %3816 }
 0x112   :  { %v1617_v45 = vrot.slane %v1616_v38, 4  ;;  %v1625_v43 = vadd.f32 %v1624_v6, %v1623_v60  ;;  %v1631_v26 = vrot.slane %v1630_v36, 4  ;;  %3822 = vrsqrt.f32 %v5286_v1 }
 0x113   :  { %v1637_v51 = vadd.f32 %v1583_v47, %v1582_v21  ;;  %v1319_v46 = vrot.slane %v1318_v11, 4  ;;  %v1325_v4 = vadd.f32 %v1251_v28, %v1250_v40  ;;  %v1151_v14 = vpop.xlane.xlu1 %1150  ;;  %v1460_v24 = vmul.f32 %v3817_v20, %v5273_v35  ;;  %v3819_v19 = vpop.eup %3818  ;;  %v4226_v20 = vld [vmem:[#allocation7 + $0x50] sm:$0xff] }
 0x114   :  { %v1618_v22 = vadd.f32 %v1617_v45, %v1616_v38  ;;  %v5303_v56 = vmul.f32 0.0078125, %v1151_v14  ;;  %v1626_v32 = vrot.slane %v1625_v43, 2  ;;  %v1632_v54 = vadd.f32 %v1631_v26, %v1630_v36 }
 0x115   :  { %v1638_v48 = vrot.slane %v1637_v51, 4  ;;  %v1320_v29 = vadd.f32 %v1319_v46, %v1318_v11  ;;  %v1326_v53 = vrot.slane %v1325_v4, 4  ;;  %v1484_v0 = vmul.f32 %v1460_v24, %v5257_v50 }
 0x116   :  { %v1619_v25 = vrot.slane %v1618_v22, 2  ;;  %v1253_v31 = vmul.f32 %v5303_v56, %v5303_v56  ;;  %v1627_v63 = vadd.f32 %v1626_v32, %v1625_v43  ;;  %v1633_v23 = vrot.slane %v1632_v54, 2 }
 0x117   :  { %v1639_v12 = vadd.f32 %v1638_v48, %v1637_v51  ;;  %v1485_v16 = vmul.f32 %v1460_v24, %v5255_v9  ;;  %v1321_v58 = vrot.slane %v1320_v29, 2  ;;  %v1327_v17 = vadd.f32 %v1326_v53, %v1325_v4  ;;  %v4224_v9 = vld [vmem:[#allocation7 + $0x40] sm:$0xff] }
 0x118   :  { %v1628_v18 = vrot.slane %v1627_v63, 1  ;;  %v1620_v59 = vadd.f32 %v1619_v25, %v1618_v22  ;;  %v1634_v8 = vadd.f32 %v1633_v23, %v1632_v54  ;;  %v1544_v41 = vmul.f32 %v3819_v19, %v1484_v0  ;;  %v4227_v54 = vld [vmem:[#allocation7 + $0x58] sm:$0xff] }
 0x119   :  { %v1640_v35 = vrot.slane %v1639_v12, 2  ;;  %v1545_v60 = vmul.f32 %v3819_v19, %v1485_v16  ;;  %v1322_v33 = vadd.f32 %v1321_v58, %v1320_v29  ;;  %v1328_v10 = vrot.slane %v1327_v17, 2  ;;  %v1149_v2 = vpop.xlane.xlu0 %1148 }
 0x11a   :  { %v3821_v5 = vpop.eup %3820  ;;  %v5310_v3 = vmul.f32 0.0078125, %v1149_v2  ;;  %v5312_v38 = vadd.f32 %v1628_v18, %v1627_v63  ;;  %v1621_v50 = vrot.slane %v1620_v59, 1  ;;  %v1635_v61 = vrot.slane %v1634_v8, 1 }
 0x11b   :  { %v1584_v62 = vmul.f32 %v4224_v9, %v1544_v41  ;;  %v1585_v13 = vmul.f32 %v4225_v15, %v1545_v60  ;;  %v1461_v52 = vmul.f32 %v3821_v5, %v5286_v1  ;;  %v1323_v27 = vrot.slane %v1322_v33, 1 }
 0x11c   :  { %v1329_v37 = vadd.f32 %v1328_v10, %v1327_v17  ;;  %v1252_v36 = vmul.f32 %v5310_v3, %v5310_v3  ;;  %v1155_v57 = vpop.xlane.xlu1 %1154  ;;  %1758 = vmax.xlane.f32.xlu1 %v5312_v38  ;;  %v5318_v44 = vadd.f32 %v1621_v50, %v1620_v59  ;;  %v3823_v21 = vpop.eup %3822  ;;  %v5322_v11 = vadd.f32 %v1635_v61, %v1634_v8 }
 0x11d   :  { %v1486_v30 = vmul.f32 %v1461_v52, %v5267_v7  ;;  %v1487_v47 = vmul.f32 %v1461_v52, %v5263_v55  ;;  %v1324_v6 = vadd.f32 %v1323_v27, %v1322_v33  ;;  %v5324_v40 = vmul.f32 0.0078125, %v1155_v57 }
 0x11e   :  { %v1330_v28 = vrot.slane %v1329_v37, 1  ;;  %v1332_v1 = vadd.f32 %v1253_v31, %v1252_v36  ;;  %1756 = vmax.xlane.f32.xlu0 %v5318_v44  ;;  %v1641_v45 = vadd.f32 %v1640_v35, %v1639_v12  ;;  %v1644_v51 = vadd.f32 %v1585_v13, %v1584_v62 }
 0x11f   :  { %v1546_v43 = vmul.f32 %v3823_v21, %v1486_v30  ;;  %v1547_v26 = vmul.f32 %v3823_v21, %v1487_v47  ;;  %v1422_v46 = vadd.f32 1.0, %v1324_v6  ;;  %v1153_v4 = vpop.xlane.xlu0 %1152  ;;  %v1255_v55 = vmul.f32 %v5324_v40, %v5324_v40 }
 0x120   :  { %v1331_v14 = vadd.f32 %v1330_v28, %v1329_v37  ;;  %v1333_v22 = vrot.slane %v1332_v1, 4  ;;  %v5329_v7 = vmul.f32 0.0078125, %v1153_v4  ;;  %v1642_v24 = vrot.slane %v1641_v45, 1 }
 0x121   :  { %v1586_v32 = vmul.f32 %v4226_v20, %v1546_v43  ;;  %v1587_v48 = vmul.f32 %v4227_v54, %v1547_v26  ;;  %3824 = vrcp.f32 %v1422_v46  ;;  %v1645_v23 = vrot.slane %v1644_v51, 4  ;;  %v4228_v20 = vld [vmem:[#allocation7 + $0x60] sm:$0xff]  ;;  %v4229_v54 = vld [vmem:[#allocation7 + $0x68] sm:$0xff] }
 0x122   :  { %v1423_v29 = vadd.f32 1.0, %v1331_v14  ;;  %v1334_v53 = vadd.f32 %v1333_v22, %v1332_v1  ;;  %v1254_v25 = vmul.f32 %v5329_v7, %v5329_v7  ;;  %1760 = vmax.xlane.f32.xlu0 %v5322_v11  ;;  %v5334_v63 = vadd.f32 %v1642_v24, %v1641_v45 }
 0x123   :  { %v1651_v31 = vadd.f32 %v1587_v48, %v1586_v32  ;;  %v1646_v16 = vadd.f32 %v1645_v23, %v1644_v51 }
 0x124   :  { %3826 = vrcp.f32 %v1423_v29  ;;  %v1335_v12 = vrot.slane %v1334_v53, 2  ;;  %v1339_v0 = vadd.f32 %v1255_v55, %v1254_v25  ;;  %1762 = vmax.xlane.f32.xlu1 %v5334_v63 }
 0x125   :  { %3828 = vrsqrt.f32 %v1324_v6  ;;  %v1652_v58 = vrot.slane %v1651_v31, 4  ;;  %v1647_v59 = vrot.slane %v1646_v16, 2 }
 0x126   :  { %v1336_v17 = vadd.f32 %v1335_v12, %v1334_v53  ;;  %v1340_v19 = vrot.slane %v1339_v0, 4  ;;  %v1159_v18 = vpop.xlane.xlu1 %1158  ;;  %3830 = vrsqrt.f32 %v1331_v14  ;;  %v4230_v12 = vld [vmem:[#allocation7 + $0x70] sm:$0xff] }
 0x127   :  { %v1653_v8 = vadd.f32 %v1652_v58, %v1651_v31  ;;  %v5337_v60 = vmul.f32 0.0078125, %v1159_v18  ;;  %v1648_v33 = vadd.f32 %v1647_v59, %v1646_v16  ;;  %v4231_v16 = vld [vmem:[#allocation7 + $0x78] sm:$0xff] }
 0x128   :  { %v1337_v35 = vrot.slane %v1336_v17, 1  ;;  %v1341_v41 = vadd.f32 %v1340_v19, %v1339_v0 }
 0x129   :  { %v1654_v10 = vrot.slane %v1653_v8, 2  ;;  %v1649_v61 = vrot.slane %v1648_v33, 1  ;;  %v1257_v27 = vmul.f32 %v5337_v60, %v5337_v60 }
 0x12a   :  { %v1338_v2 = vadd.f32 %v1337_v35, %v1336_v17  ;;  %v1342_v5 = vrot.slane %v1341_v41, 2 }
 0x12b   :  { %v3825_v50 = vpop.eup %3824  ;;  %v1655_v9 = vadd.f32 %v1654_v10, %v1653_v8  ;;  %v5343_v36 = vadd.f32 %v1649_v61, %v1648_v33 }
 0x12c   :  { %v1462_v62 = vmul.f32 %v3825_v50, %v1324_v6  ;;  %v1424_v15 = vadd.f32 1.0, %v1338_v2  ;;  %v1343_v13 = vadd.f32 %v1342_v5, %v1341_v41  ;;  %v1157_v52 = vpop.xlane.xlu0 %1156 }
 0x12d   :  { %v5341_v37 = vmul.f32 0.0078125, %v1157_v52  ;;  %6643 = vst [vmem:[#allocation14_spill] sm:$0xff] %v5343_v36  ;;  %v1656_v57 = vrot.slane %v1655_v9, 1  ;;  %1764 = vmax.xlane.f32.xlu0 %v5343_v36 }
 0x12e   :  { %v3827_v21 = vpop.eup %3826  ;;  %v1488_v30 = vmul.f32 %v1462_v62, %v5288_v42  ;;  %v1489_v47 = vmul.f32 %v1462_v62, %v5271_v34  ;;  %3832 = vrcp.f32 %v1424_v15  ;;  %v1344_v28 = vrot.slane %v1343_v13, 1 }
 0x12f   :  { %v3829_v1 = vpop.eup %3828  ;;  %v1463_v6 = vmul.f32 %v3827_v21, %v1331_v14  ;;  %v1256_v45 = vmul.f32 %v5341_v37, %v5341_v37  ;;  %v1163_v51 = vpop.xlane.xlu1 %1162  ;;  %v5350_v43 = vadd.f32 %v1656_v57, %v1655_v9  ;;  %3834 = vrsqrt.f32 %v1338_v2 }
 0x130   :  { %v1548_v26 = vmul.f32 %v3829_v1, %v1488_v30  ;;  %v1549_v46 = vmul.f32 %v3829_v1, %v1489_v47  ;;  %v1345_v4 = vadd.f32 %v1344_v28, %v1343_v13  ;;  %v5352_v22 = vmul.f32 0.0078125, %v1163_v51  ;;  %v3831_v14 = vpop.eup %3830 }
 0x131   :  { %6644 = vst [vmem:[#allocation15_spill] sm:$0xff] %v5350_v43  ;;  %v1490_v42 = vmul.f32 %v1463_v6, %v5296_v49  ;;  %v1491_v34 = vmul.f32 %v1463_v6, %v5294_v39  ;;  %v1346_v55 = vadd.f32 %v1257_v27, %v1256_v45  ;;  %1766 = vmax.xlane.f32.xlu1 %v5350_v43 }
 0x132   :  { %v1588_v32 = vmul.f32 %v4228_v20, %v1548_v26  ;;  %v1589_v48 = vmul.f32 %v4229_v54, %v1549_v46  ;;  %v1425_v24 = vadd.f32 1.0, %v1345_v4  ;;  %v1259_v49 = vmul.f32 %v5352_v22, %v5352_v22  ;;  %v4232_v46 = vld [vmem:[#allocation7 + $0x80] sm:$0xff] }
 0x133   :  { %v1161_v29 = vpop.xlane.xlu0 %1160  ;;  %v1550_v53 = vmul.f32 %v3831_v14, %v1490_v42  ;;  %v1551_v25 = vmul.f32 %v3831_v14, %v1491_v34  ;;  %v1347_v31 = vrot.slane %v1346_v55, 4  ;;  %v4233_v34 = vld [vmem:[#allocation7 + $0x88] sm:$0xff] }
 0x134   :  { %v1658_v23 = vadd.f32 %v1589_v48, %v1588_v32  ;;  %3836 = vrcp.f32 %v1425_v24  ;;  %v5359_v39 = vmul.f32 0.0078125, %v1161_v29 }
 0x135   :  { %v1590_v0 = vmul.f32 %v4230_v12, %v1550_v53  ;;  %v1591_v58 = vmul.f32 %v4231_v16, %v1551_v25  ;;  %v1348_v17 = vadd.f32 %v1347_v31, %v1346_v55  ;;  %3838 = vrsqrt.f32 %v1345_v4 }
 0x136   :  { %v1258_v19 = vmul.f32 %v5359_v39, %v5359_v39  ;;  %v1659_v18 = vrot.slane %v1658_v23, 4 }
 0x137   :  { %v1665_v59 = vadd.f32 %v1591_v58, %v1590_v0  ;;  %v1349_v8 = vrot.slane %v1348_v17, 2 }
 0x138   :  { %v3833_v35 = vpop.eup %3832  ;;  %v1353_v41 = vadd.f32 %v1259_v49, %v1258_v19  ;;  %v1660_v33 = vadd.f32 %v1659_v18, %v1658_v23  ;;  %v5380_v18 = vld [vmem:[#allocation7 + $0x90] sm:$0xff] }
 0x139   :  { %v1464_v10 = vmul.f32 %v3833_v35, %v1338_v2  ;;  %v1350_v5 = vadd.f32 %v1349_v8, %v1348_v17  ;;  %v1167_v50 = vpop.xlane.xlu1 %1166  ;;  %v1666_v61 = vrot.slane %v1665_v59, 4  ;;  %v3835_v57 = vpop.eup %3834 }
 0x13a   :  { %v1354_v9 = vrot.slane %v1353_v41, 4  ;;  %v1661_v62 = vrot.slane %v1660_v33, 2  ;;  %v5365_v30 = vmul.f32 0.0078125, %v1167_v50 }
 0x13b   :  { %v1492_v15 = vmul.f32 %v1464_v10, %v5310_v3  ;;  %v1493_v13 = vmul.f32 %v1464_v10, %v5303_v56  ;;  %v1351_v52 = vrot.slane %v1350_v5, 1  ;;  %v1667_v27 = vadd.f32 %v1666_v61, %v1665_v59  ;;  %v5383_v59 = vld [vmem:[#allocation7 + $0x98] sm:$0xff] }
 0x13c   :  { %v1355_v21 = vadd.f32 %v1354_v9, %v1353_v41  ;;  %v1662_v47 = vadd.f32 %v1661_v62, %v1660_v33  ;;  %v1261_v32 = vmul.f32 %v5365_v30, %v5365_v30 }
 0x13d   :  { %v1552_v28 = vmul.f32 %v3835_v57, %v1492_v15  ;;  %v1553_v1 = vmul.f32 %v3835_v57, %v1493_v13  ;;  %v1352_v6 = vadd.f32 %v1351_v52, %v1350_v5  ;;  %v1668_v26 = vrot.slane %v1667_v27, 2 }
 0x13e   :  { %v3837_v2 = vpop.eup %3836  ;;  %v1356_v45 = vrot.slane %v1355_v21, 2  ;;  %v1663_v51 = vrot.slane %v1662_v47, 1 }
 0x13f   :  { %v1592_v42 = vmul.f32 %v4232_v46, %v1552_v28  ;;  %v1593_v3 = vmul.f32 %v4233_v34, %v1553_v1  ;;  %v1465_v55 = vmul.f32 %v3837_v2, %v1345_v4  ;;  %v1426_v56 = vadd.f32 1.0, %v1352_v6  ;;  %v3839_v25 = vpop.eup %3838 }
 0x140   :  { %v1165_v14 = vpop.xlane.xlu0 %1164  ;;  %v1357_v20 = vadd.f32 %v1356_v45, %v1355_v21  ;;  %v5371_v48 = vadd.f32 %v1663_v51, %v1662_v47  ;;  %v1669_v49 = vadd.f32 %v1668_v26, %v1667_v27 }
 0x141   :  { %v5369_v54 = vmul.f32 0.0078125, %v1165_v14  ;;  %v1672_v24 = vadd.f32 %v1593_v3, %v1592_v42  ;;  %v1494_v29 = vmul.f32 %v1465_v55, %v5329_v7  ;;  %v1495_v53 = vmul.f32 %v1465_v55, %v5324_v40 }
 0x142   :  { %6645 = vst [vmem:[#allocation16_spill] sm:$0xff] %v5371_v48  ;;  %3840 = vrcp.f32 %v1426_v56  ;;  %v1358_v31 = vrot.slane %v1357_v20, 1  ;;  %v1171_v23 = vpop.xlane.xlu1 %1170  ;;  %1768 = vmax.xlane.f32.xlu0 %v5371_v48  ;;  %v1670_v7 = vrot.slane %v1669_v49, 1 }
 0x143   :  { %v1260_v4 = vmul.f32 %v5369_v54, %v5369_v54  ;;  %v1554_v12 = vmul.f32 %v3839_v25, %v1494_v29  ;;  %v1555_v0 = vmul.f32 %v3839_v25, %v1495_v53  ;;  %v5378_v16 = vmul.f32 0.0078125, %v1171_v23 }
 0x144   :  { %v1673_v58 = vrot.slane %v1672_v24, 4  ;;  %v1359_v17 = vadd.f32 %v1358_v31, %v1357_v20  ;;  %3842 = vrsqrt.f32 %v1352_v6  ;;  %v5390_v9 = vadd.f32 %v1670_v7, %v1669_v49  ;;  %v5405_v49 = vld [vmem:[#allocation7 + $0xa8] sm:$0xff] }
 0x145   :  { %v1360_v19 = vadd.f32 %v1261_v32, %v1260_v4  ;;  %v1594_v40 = vmul.f32 %v5380_v18, %v1554_v12  ;;  %v1595_v8 = vmul.f32 %v5383_v59, %v1555_v0  ;;  %v1263_v5 = vmul.f32 %v5378_v16, %v5378_v16  ;;  %v5402_v4 = vld [vmem:[#allocation7 + $0xa0] sm:$0xff] }
 0x146   :  { %v1169_v35 = vpop.xlane.xlu0 %1168  ;;  %v1674_v41 = vadd.f32 %v1673_v58, %v1672_v24  ;;  %v1427_v33 = vadd.f32 1.0, %v1359_v17  ;;  %6646 = vst [vmem:[#allocation17_spill] sm:$0xff] %v5390_v9  ;;  %1770 = vmax.xlane.f32.xlu1 %v5390_v9 }
 0x147   :  { %v1361_v10 = vrot.slane %v1360_v19, 4  ;;  %v5388_v50 = vmul.f32 0.0078125, %v1169_v35  ;;  %v1679_v61 = vadd.f32 %v1595_v8, %v1594_v40 }
 0x148   :  { %v1675_v62 = vrot.slane %v1674_v41, 2  ;;  %3844 = vrcp.f32 %v1427_v33 }
 0x149   :  { %v1362_v15 = vadd.f32 %v1361_v10, %v1360_v19  ;;  %v1262_v13 = vmul.f32 %v5388_v50, %v5388_v50  ;;  %v1680_v27 = vrot.slane %v1679_v61, 4  ;;  %3846 = vrsqrt.f32 %v1359_v17 }
 0x14a   :  { %v1676_v52 = vadd.f32 %v1675_v62, %v1674_v41 }
 0x14b   :  { %v1363_v57 = vrot.slane %v1362_v15, 2  ;;  %v1367_v21 = vadd.f32 %v1263_v5, %v1262_v13  ;;  %v1681_v1 = vadd.f32 %v1680_v27, %v1679_v61 }
 0x14c   :  { %v3841_v47 = vpop.eup %3840  ;;  %v1677_v28 = vrot.slane %v1676_v52, 1  ;;  %v1175_v26 = vpop.xlane.xlu1 %1174 }
 0x14d   :  { %v1466_v2 = vmul.f32 %v3841_v47, %v1352_v6  ;;  %v1364_v45 = vadd.f32 %v1363_v57, %v1362_v15  ;;  %v1368_v51 = vrot.slane %v1367_v21, 4  ;;  %v5395_v46 = vmul.f32 0.0078125, %v1175_v26  ;;  %v5424_v47 = vld [vmem:[#allocation7 + $0xb8] sm:$0xff] }
 0x14e   :  { %v5397_v42 = vadd.f32 %v1677_v28, %v1676_v52  ;;  %v1682_v34 = vrot.slane %v1681_v1, 2  ;;  %v3843_v20 = vpop.eup %3842 }
 0x14f   :  { %v1496_v3 = vmul.f32 %v1466_v2, %v5341_v37  ;;  %v1497_v55 = vmul.f32 %v1466_v2, %v5337_v60  ;;  %v1365_v56 = vrot.slane %v1364_v45, 1  ;;  %v1369_v14 = vadd.f32 %v1368_v51, %v1367_v21  ;;  %v5421_v21 = vld [vmem:[#allocation7 + $0xb0] sm:$0xff] }
 0x150   :  { %6647 = vst [vmem:[#allocation18_spill] sm:$0xff] %v5397_v42  ;;  %1772 = vmax.xlane.f32.xlu0 %v5397_v42  ;;  %v1683_v32 = vadd.f32 %v1682_v34, %v1681_v1  ;;  %v1265_v12 = vmul.f32 %v5395_v46, %v5395_v46 }
 0x151   :  { %v1556_v6 = vmul.f32 %v3843_v20, %v1496_v3  ;;  %v1557_v24 = vmul.f32 %v3843_v20, %v1497_v55  ;;  %v1366_v29 = vadd.f32 %v1365_v56, %v1364_v45  ;;  %v1370_v53 = vrot.slane %v1369_v14, 2 }
 0x152   :  { %v1684_v25 = vrot.slane %v1683_v32, 1  ;;  %v3845_v31 = vpop.eup %3844 }
 0x153   :  { %v1596_v23 = vmul.f32 %v5402_v4, %v1556_v6  ;;  %v1597_v60 = vmul.f32 %v5405_v49, %v1557_v24  ;;  %v1428_v37 = vadd.f32 1.0, %v1366_v29  ;;  %v1173_v0 = vpop.xlane.xlu0 %1172  ;;  %v1467_v58 = vmul.f32 %v3845_v31, %v1359_v17  ;;  %v3847_v61 = vpop.eup %3846 }
 0x154   :  { %v1371_v19 = vadd.f32 %v1370_v53, %v1369_v14  ;;  %v5410_v7 = vmul.f32 0.0078125, %v1173_v0  ;;  %v5412_v40 = vadd.f32 %v1684_v25, %v1683_v32 }
 0x155   :  { %v1686_v8 = vadd.f32 %v1597_v60, %v1596_v23  ;;  %3848 = vrcp.f32 %v1428_v37  ;;  %v1498_v35 = vmul.f32 %v1467_v58, %v5359_v39  ;;  %v1499_v41 = vmul.f32 %v1467_v58, %v5352_v22  ;;  %v1179_v5 = vpop.xlane.xlu1 %1178 }
 0x156   :  { %6648 = vst [vmem:[#allocation19_spill] sm:$0xff] %v5412_v40  ;;  %v1372_v33 = vrot.slane %v1371_v19, 1  ;;  %v1264_v10 = vmul.f32 %v5410_v7, %v5410_v7  ;;  %1774 = vmax.xlane.f32.xlu1 %v5412_v40  ;;  %v5419_v17 = vmul.f32 0.0078125, %v1179_v5  ;;  %3850 = vrsqrt.f32 %v1366_v29 }
 0x157   :  { %v1687_v62 = vrot.slane %v1686_v8, 4  ;;  %v1558_v15 = vmul.f32 %v3847_v61, %v1498_v35  ;;  %v1559_v13 = vmul.f32 %v3847_v61, %v1499_v41 }
 0x158   :  { %v1373_v52 = vadd.f32 %v1372_v33, %v1371_v19  ;;  %v1374_v27 = vadd.f32 %v1265_v12, %v1264_v10  ;;  %v1267_v45 = vmul.f32 %v5419_v17, %v5419_v17 }
 0x159   :  { %v1177_v57 = vpop.xlane.xlu0 %1176  ;;  %v1688_v39 = vadd.f32 %v1687_v62, %v1686_v8  ;;  %v1598_v22 = vmul.f32 %v5421_v21, %v1558_v15  ;;  %v1599_v28 = vmul.f32 %v5424_v47, %v1559_v13  ;;  %v5440_v15 = vld [vmem:[#allocation7 + $0xc0] sm:$0xff]  ;;  %v5443_v13 = vld [vmem:[#allocation7 + $0xc8] sm:$0xff] }
 0x15a   :  { %v1429_v1 = vadd.f32 1.0, %v1373_v52  ;;  %v1375_v2 = vrot.slane %v1374_v27, 4  ;;  %v5429_v51 = vmul.f32 0.0078125, %v1177_v57 }
 0x15b   :  { %v1689_v26 = vrot.slane %v1688_v39, 2  ;;  %v1693_v34 = vadd.f32 %v1599_v28, %v1598_v22 }
 0x15c   :  { %3852 = vrcp.f32 %v1429_v1  ;;  %v1376_v3 = vadd.f32 %v1375_v2, %v1374_v27  ;;  %v1266_v55 = vmul.f32 %v5429_v51, %v5429_v51 }
 0x15d   :  { %v1690_v56 = vadd.f32 %v1689_v26, %v1688_v39  ;;  %v1694_v14 = vrot.slane %v1693_v34, 4  ;;  %3854 = vrsqrt.f32 %v1373_v52 }
 0x15e   :  { %v1377_v32 = vrot.slane %v1376_v3, 2  ;;  %v1381_v6 = vadd.f32 %v1267_v45, %v1266_v55 }
 0x15f   :  { %v3849_v20 = vpop.eup %3848  ;;  %v1691_v24 = vrot.slane %v1690_v56, 1  ;;  %v1695_v25 = vadd.f32 %v1694_v14, %v1693_v34 }
 0x160   :  { %v1468_v53 = vmul.f32 %v3849_v20, %v1366_v29  ;;  %v1378_v31 = vadd.f32 %v1377_v32, %v1376_v3  ;;  %v1382_v23 = vrot.slane %v1381_v6, 4  ;;  %v1183_v60 = vpop.xlane.xlu1 %1182  ;;  %v3851_v19 = vpop.eup %3850 }
 0x161   :  { %v5433_v37 = vadd.f32 %v1691_v24, %v1690_v56  ;;  %v1696_v58 = vrot.slane %v1695_v25, 2  ;;  %v5438_v29 = vmul.f32 0.0078125, %v1183_v60  ;;  %v5462_v60 = vld [vmem:[#allocation7 + $0xd8] sm:$0xff] }
 0x162   :  { %v1500_v12 = vmul.f32 %v1468_v53, %v5369_v54  ;;  %v1501_v0 = vmul.f32 %v1468_v53, %v5365_v30  ;;  %v1379_v8 = vrot.slane %v1378_v31, 1  ;;  %v1383_v35 = vadd.f32 %v1382_v23, %v1381_v6  ;;  %v5459_v23 = vld [vmem:[#allocation7 + $0xd0] sm:$0xff] }
 0x163   :  { %6649 = vst [vmem:[#allocation20_spill] sm:$0xff] %v5433_v37  ;;  %1776 = vmax.xlane.f32.xlu0 %v5433_v37  ;;  %v1697_v10 = vadd.f32 %v1696_v58, %v1695_v25  ;;  %v1269_v2 = vmul.f32 %v5438_v29, %v5438_v29 }
 0x164   :  { %v1560_v41 = vmul.f32 %v3851_v19, %v1500_v12  ;;  %v1561_v33 = vmul.f32 %v3851_v19, %v1501_v0  ;;  %v1380_v5 = vadd.f32 %v1379_v8, %v1378_v31  ;;  %v1384_v61 = vrot.slane %v1383_v35, 2 }
 0x165   :  { %v1698_v57 = vrot.slane %v1697_v10, 1 }
 0x166   :  { %v3853_v62 = vpop.eup %3852  ;;  %v1600_v54 = vmul.f32 %v5440_v15, %v1560_v41  ;;  %v1601_v30 = vmul.f32 %v5443_v13, %v1561_v33  ;;  %v1181_v27 = vpop.xlane.xlu0 %1180  ;;  %v1430_v22 = vadd.f32 1.0, %v1380_v5  ;;  %v1385_v28 = vadd.f32 %v1384_v61, %v1383_v35 }
 0x167   :  { %v1469_v39 = vmul.f32 %v3853_v62, %v1373_v52  ;;  %v5448_v45 = vmul.f32 0.0078125, %v1181_v27  ;;  %v5450_v26 = vadd.f32 %v1698_v57, %v1697_v10  ;;  %v3855_v14 = vpop.eup %3854 }
 0x168   :  { %v1700_v1 = vadd.f32 %v1601_v30, %v1600_v54  ;;  %3856 = vrcp.f32 %v1430_v22  ;;  %v1386_v55 = vrot.slane %v1385_v28, 1 }
 0x169   :  { %6650 = vst [vmem:[#allocation21_spill] sm:$0xff] %v5450_v26  ;;  %v1502_v34 = vmul.f32 %v1469_v39, %v5388_v50  ;;  %v1503_v3 = vmul.f32 %v1469_v39, %v5378_v16  ;;  %v1187_v56 = vpop.xlane.xlu1 %1186  ;;  %v1268_v52 = vmul.f32 %v5448_v45, %v5448_v45  ;;  %1778 = vmax.xlane.f32.xlu1 %v5450_v26  ;;  %3858 = vrsqrt.f32 %v1380_v5 }
 0x16a   :  { %v5456_v20 = vmul.f32 0.0078125, %v1187_v56  ;;  %v1701_v32 = vrot.slane %v1700_v1, 4  ;;  %v1387_v53 = vadd.f32 %v1386_v55, %v1385_v28 }
 0x16b   :  { %v1562_v6 = vmul.f32 %v3855_v14, %v1502_v34  ;;  %v1563_v24 = vmul.f32 %v3855_v14, %v1503_v3  ;;  %v1388_v25 = vadd.f32 %v1269_v2, %v1268_v52 }
 0x16c   :  { %v1185_v31 = vpop.xlane.xlu0 %1184  ;;  %v1702_v50 = vadd.f32 %v1701_v32, %v1700_v1  ;;  %v1431_v0 = vadd.f32 1.0, %v1387_v53  ;;  %v1271_v19 = vmul.f32 %v5456_v20, %v5456_v20 }
 0x16d   :  { %v1602_v16 = vmul.f32 %v5459_v23, %v1562_v6  ;;  %v1603_v12 = vmul.f32 %v5462_v60, %v1563_v24  ;;  %v1389_v58 = vrot.slane %v1388_v25, 4  ;;  %v5467_v8 = vmul.f32 0.0078125, %v1185_v31 }
 0x16e   :  { %v1703_v35 = vrot.slane %v1702_v50, 2  ;;  %3860 = vrcp.f32 %v1431_v0 }
 0x16f   :  { %v1707_v41 = vadd.f32 %v1603_v12, %v1602_v16  ;;  %v1390_v33 = vadd.f32 %v1389_v58, %v1388_v25  ;;  %v1270_v10 = vmul.f32 %v5467_v8, %v5467_v8  ;;  %3862 = vrsqrt.f32 %v1387_v53  ;;  %v5478_v58 = vld [vmem:[#allocation7 + $0xe0] sm:$0xff] }
 0x170   :  { %v1704_v61 = vadd.f32 %v1703_v35, %v1702_v50 }
 0x171   :  { %v1708_v62 = vrot.slane %v1707_v41, 4  ;;  %v1391_v54 = vrot.slane %v1390_v33, 2  ;;  %v1395_v30 = vadd.f32 %v1271_v19, %v1270_v10 }
 0x172   :  { %v1705_v27 = vrot.slane %v1704_v61, 1  ;;  %v3857_v57 = vpop.eup %3856 }
 0x173   :  { %v1709_v39 = vadd.f32 %v1708_v62, %v1707_v41  ;;  %v1470_v22 = vmul.f32 %v3857_v57, %v1380_v5  ;;  %v1392_v28 = vadd.f32 %v1391_v54, %v1390_v33  ;;  %v1396_v1 = vrot.slane %v1395_v30, 4  ;;  %v1191_v2 = vpop.xlane.xlu1 %1190  ;;  %v3859_v32 = vpop.eup %3858 }
 0x174   :  { %v5471_v34 = vadd.f32 %v1705_v27, %v1704_v61  ;;  %v5475_v6 = vmul.f32 0.0078125, %v1191_v2 }
 0x175   :  { %v1710_v3 = vrot.slane %v1709_v39, 2  ;;  %v1504_v55 = vmul.f32 %v1470_v22, %v5410_v7  ;;  %v1505_v56 = vmul.f32 %v1470_v22, %v5395_v46  ;;  %v1393_v14 = vrot.slane %v1392_v28, 1  ;;  %v5481_v46 = vld [vmem:[#allocation7 + $0xe8] sm:$0xff] }
 0x176   :  { %6651 = vst [vmem:[#allocation22_spill] sm:$0xff] %v5471_v34  ;;  %v1397_v52 = vadd.f32 %v1396_v1, %v1395_v30  ;;  %1780 = vmax.xlane.f32.xlu0 %v5471_v34  ;;  %v1273_v10 = vmul.f32 %v5475_v6, %v5475_v6 }
 0x177   :  { %v1711_v24 = vadd.f32 %v1710_v3, %v1709_v39  ;;  %v1564_v25 = vmul.f32 %v3859_v32, %v1504_v55  ;;  %v1565_v5 = vmul.f32 %v3859_v32, %v1505_v56  ;;  %v1394_v31 = vadd.f32 %v1393_v14, %v1392_v28  ;;  %v5499_v14 = vld [vmem:[#allocation7 + $0xf0] sm:$0xff]  ;;  %v5502_v32 = vld [vmem:[#allocation7 + $0xf8] sm:$0xff] }
 0x178   :  { %v1398_v50 = vrot.slane %v1397_v52, 2  ;;  %v3861_v16 = vpop.eup %3860 }
 0x179   :  { %v1189_v12 = vpop.xlane.xlu0 %1188  ;;  %v1712_v0 = vrot.slane %v1711_v24, 1  ;;  %v1604_v7 = vmul.f32 %v5478_v58, %v1564_v25  ;;  %v1605_v19 = vmul.f32 %v5481_v46, %v1565_v5  ;;  %v1471_v35 = vmul.f32 %v3861_v16, %v1387_v53  ;;  %v3863_v39 = vpop.eup %3862 }
 0x17a   :  { %v1432_v41 = vadd.f32 1.0, %v1394_v31  ;;  %v1399_v33 = vadd.f32 %v1398_v50, %v1397_v52  ;;  %v5486_v61 = vmul.f32 0.0078125, %v1189_v12 }
 0x17b   :  { %v5488_v62 = vadd.f32 %v1712_v0, %v1711_v24  ;;  %v1714_v54 = vadd.f32 %v1605_v19, %v1604_v7  ;;  %v1506_v30 = vmul.f32 %v1471_v35, %v5429_v51  ;;  %v1507_v27 = vmul.f32 %v1471_v35, %v5419_v17 }
 0x17c   :  { %3864 = vrcp.f32 %v1432_v41  ;;  %v1195_v57 = vpop.xlane.xlu1 %1194  ;;  %v1400_v22 = vrot.slane %v1399_v33, 1  ;;  %v1272_v53 = vmul.f32 %v5486_v61, %v5486_v61 }
 0x17d   :  { %6652 = vst [vmem:[#allocation23_spill] sm:$0xff] %v5488_v62  ;;  %v5494_v28 = vmul.f32 0.0078125, %v1195_v57  ;;  %1782 = vmax.xlane.f32.xlu1 %v5488_v62  ;;  %v1566_v1 = vmul.f32 %v3863_v39, %v1506_v30  ;;  %v1567_v2 = vmul.f32 %v3863_v39, %v1507_v27  ;;  %v1715_v3 = vrot.slane %v1714_v54, 4 }
 0x17e   :  { %3866 = vrsqrt.f32 %v1394_v31  ;;  %v1401_v55 = vadd.f32 %v1400_v22, %v1399_v33  ;;  %v1402_v56 = vadd.f32 %v1273_v10, %v1272_v53 }
 0x17f   :  { %v1275_v17 = vmul.f32 %v5494_v28, %v5494_v28  ;;  %v1606_v52 = vmul.f32 %v5499_v14, %v1566_v1  ;;  %v1607_v24 = vmul.f32 %v5502_v32, %v1567_v2  ;;  %v1716_v5 = vadd.f32 %v1715_v3, %v1714_v54 }
 0x180   :  { %v1193_v51 = vpop.xlane.xlu0 %1192  ;;  %v1433_v50 = vadd.f32 1.0, %v1401_v55  ;;  %v1403_v16 = vrot.slane %v1402_v56, 4 }
 0x181   :  { %v5505_v25 = vmul.f32 0.0078125, %v1193_v51  ;;  %v1721_v12 = vadd.f32 %v1607_v24, %v1606_v52  ;;  %v1717_v7 = vrot.slane %v1716_v5, 2 }
 0x182   :  { %3868 = vrcp.f32 %v1433_v50  ;;  %v1404_v19 = vadd.f32 %v1403_v16, %v1402_v56 }
 0x183   :  { %v1274_v0 = vmul.f32 %v5505_v25, %v5505_v25  ;;  %v1718_v41 = vadd.f32 %v1717_v7, %v1716_v5  ;;  %v1722_v33 = vrot.slane %v1721_v12, 4  ;;  %3870 = vrsqrt.f32 %v1401_v55  ;;  %v5514_v7 = vld [vmem:[#allocation7 + $0x100] sm:$0xff] }
 0x184   :  { %v1405_v10 = vrot.slane %v1404_v19, 2 }
 0x185   :  { %v1409_v35 = vadd.f32 %v1275_v17, %v1274_v0  ;;  %v1719_v57 = vrot.slane %v1718_v41, 1  ;;  %v1723_v39 = vadd.f32 %v1722_v33, %v1721_v12 }
 0x186   :  { %v3865_v30 = vpop.eup %3864  ;;  %v1406_v54 = vadd.f32 %v1405_v10, %v1404_v19 }
 0x187   :  { %v1410_v27 = vrot.slane %v1409_v35, 4  ;;  %v1472_v22 = vmul.f32 %v3865_v30, %v1394_v31  ;;  %v5509_v1 = vadd.f32 %v1719_v57, %v1718_v41  ;;  %v1724_v2 = vrot.slane %v1723_v39, 2 }
 0x188   :  { %v3867_v3 = vpop.eup %3866  ;;  %v1407_v17 = vrot.slane %v1406_v54, 1 }
 0x189   :  { %v1411_v53 = vadd.f32 %v1410_v27, %v1409_v35  ;;  %6653 = vst [vmem:[#allocation24_spill] sm:$0xff] %v5509_v1  ;;  %v1508_v51 = vmul.f32 %v1472_v22, %v5448_v45  ;;  %v1509_v56 = vmul.f32 %v1472_v22, %v5438_v29  ;;  %1784 = vmax.xlane.f32.xlu0 %v5509_v1  ;;  %v5517_v35 = vld [vmem:[#allocation7 + $0x108] sm:$0xff] }
 0x18a   :  { %v1725_v24 = vadd.f32 %v1724_v2, %v1723_v39  ;;  %v1408_v16 = vadd.f32 %v1407_v17, %v1406_v54  ;;  %v5528_v17 = vld [vmem:[#allocation7 + $0x118] sm:$0xff] }
 0x18b   :  { %v1412_v52 = vrot.slane %v1411_v53, 2  ;;  %v1568_v5 = vmul.f32 %v3867_v3, %v1508_v51  ;;  %v1569_v50 = vmul.f32 %v3867_v3, %v1509_v56 }
 0x18c   :  { %v1726_v12 = vrot.slane %v1725_v24, 1  ;;  %v3869_v0 = vpop.eup %3868  ;;  %v1434_v29 = vadd.f32 1.0, %v1408_v16 }
 0x18d   :  { %v1413_v31 = vadd.f32 %v1412_v52, %v1411_v53  ;;  %v1608_v19 = vmul.f32 %v5514_v7, %v1568_v5  ;;  %v1609_v45 = vmul.f32 %v5517_v35, %v1569_v50  ;;  %v1473_v41 = vmul.f32 %v3869_v0, %v1401_v55  ;;  %v3871_v22 = vpop.eup %3870  ;;  %v5525_v55 = vld [vmem:[#allocation7 + $0x110] sm:$0xff] }
 0x18e   :  { %v5520_v10 = vadd.f32 %v1726_v12, %v1725_v24  ;;  %3872 = vrcp.f32 %v1434_v29 }
 0x18f   :  { %v1414_v33 = vrot.slane %v1413_v31, 1  ;;  %v1728_v30 = vadd.f32 %v1609_v45, %v1608_v19  ;;  %v1510_v27 = vmul.f32 %v1473_v41, %v5467_v8  ;;  %v1511_v57 = vmul.f32 %v1473_v41, %v5456_v20 }
 0x190   :  { %6654 = vst [vmem:[#allocation25_spill] sm:$0xff] %v5520_v10  ;;  %1786 = vmax.xlane.f32.xlu1 %v5520_v10  ;;  %3874 = vrsqrt.f32 %v1408_v16 }
 0x191   :  { %v1415_v39 = vadd.f32 %v1414_v33, %v1413_v31  ;;  %v1729_v54 = vrot.slane %v1728_v30, 4  ;;  %v1570_v53 = vmul.f32 %v3871_v22, %v1510_v27  ;;  %v1571_v2 = vmul.f32 %v3871_v22, %v1511_v57 }
 0x193   :  { %v1435_v3 = vadd.f32 1.0, %v1415_v39  ;;  %v1730_v51 = vadd.f32 %v1729_v54, %v1728_v30  ;;  %v1610_v56 = vmul.f32 %v5525_v55, %v1570_v53  ;;  %v1611_v8 = vmul.f32 %v5528_v17, %v1571_v2  ;;  %v5536_v53 = vld [vmem:[#allocation7 + $0x120] sm:$0xff]  ;;  %v5539_v2 = vld [vmem:[#allocation7 + $0x128] sm:$0xff] }
 0x195   :  { %3876 = vrcp.f32 %v1435_v3  ;;  %v1731_v20 = vrot.slane %v1730_v51, 2  ;;  %v1735_v52 = vadd.f32 %v1611_v8, %v1610_v56 }
 0x196   :  { %3878 = vrsqrt.f32 %v1415_v39 }
 0x197   :  { %v1732_v24 = vadd.f32 %v1731_v20, %v1730_v51  ;;  %v1736_v5 = vrot.slane %v1735_v52, 4 }
 0x198   :  { %v3873_v50 = vpop.eup %3872 }
 0x199   :  { %v1733_v31 = vrot.slane %v1732_v24, 1  ;;  %v1474_v12 = vmul.f32 %v3873_v50, %v1408_v16  ;;  %v1737_v0 = vadd.f32 %v1736_v5, %v1735_v52  ;;  %v5547_v5 = vld [vmem:[#allocation7 + $0x130] sm:$0xff] }
 0x19a   :  { %v3875_v33 = vpop.eup %3874 }
 0x19b   :  { %v5531_v19 = vadd.f32 %v1733_v31, %v1732_v24  ;;  %v1512_v45 = vmul.f32 %v1474_v12, %v5486_v61  ;;  %v1513_v29 = vmul.f32 %v1474_v12, %v5475_v6  ;;  %v1738_v41 = vrot.slane %v1737_v0, 2  ;;  %v5550_v31 = vld [vmem:[#allocation7 + $0x138] sm:$0xff] }
 0x19d   :  { %6655 = vst [vmem:[#allocation26_spill] sm:$0xff] %v5531_v19  ;;  %1788 = vmax.xlane.f32.xlu0 %v5531_v19  ;;  %v1572_v27 = vmul.f32 %v3875_v33, %v1512_v45  ;;  %v1573_v57 = vmul.f32 %v3875_v33, %v1513_v29  ;;  %v1739_v22 = vadd.f32 %v1738_v41, %v1737_v0 }
 0x19f   :  { %v3877_v30 = vpop.eup %3876  ;;  %v1612_v16 = vmul.f32 %v5536_v53, %v1572_v27  ;;  %v1613_v3 = vmul.f32 %v5539_v2, %v1573_v57  ;;  %v1740_v61 = vrot.slane %v1739_v22, 1 }
 0x1a0   :  { %v1475_v54 = vmul.f32 %v3877_v30, %v1415_v39  ;;  %v3879_v56 = vpop.eup %3878 }
 0x1a1   :  { %v1742_v8 = vadd.f32 %v1613_v3, %v1612_v16  ;;  %v5544_v20 = vadd.f32 %v1740_v61, %v1739_v22 }
 0x1a2   :  { %v1514_v6 = vmul.f32 %v1475_v54, %v5505_v25  ;;  %v1515_v51 = vmul.f32 %v1475_v54, %v5494_v28 }
 0x1a3   :  { %6656 = vst [vmem:[#allocation27_spill] sm:$0xff] %v5544_v20  ;;  %1790 = vmax.xlane.f32.xlu1 %v5544_v20  ;;  %v1743_v39 = vrot.slane %v1742_v8, 4 }
 0x1a4   :  { %v1574_v52 = vmul.f32 %v3879_v56, %v1514_v6  ;;  %v1575_v24 = vmul.f32 %v3879_v56, %v1515_v51 }
 0x1a5   :  { %v1744_v25 = vadd.f32 %v1743_v39, %v1742_v8 }
 0x1a6   :  { %v1614_v50 = vmul.f32 %v5547_v5, %v1574_v52  ;;  %v1615_v12 = vmul.f32 %v5550_v31, %v1575_v24 }
 0x1a7   :  { %v1745_v28 = vrot.slane %v1744_v25, 2 }
 0x1a8   :  { %v1749_v0 = vadd.f32 %v1615_v12, %v1614_v50 }
 0x1a9   :  { %v1746_v29 = vadd.f32 %v1745_v28, %v1744_v25  ;;  %v1759_v41 = vpop.xlane.xlu1 %1758 }
 0x1aa   :  { %v1750_v45 = vrot.slane %v1749_v0, 4  ;;  %v1797_v30 = vsub.f32 %v5312_v38, %v1759_v41 }
 0x1ab   :  { %v1747_v27 = vrot.slane %v1746_v29, 1  ;;  %v1757_v57 = vpop.xlane.xlu0 %1756 }
 0x1ac   :  { %v1751_v33 = vadd.f32 %v1750_v45, %v1749_v0  ;;  %v1818_v54 = vmul.f32 1.442695, %v1797_v30  ;;  %v1796_v16 = vsub.f32 %v5318_v44, %v1757_v57 }
 0x1ad   :  { %v5555_v3 = vadd.f32 %v1747_v27, %v1746_v29 }
 0x1ae   :  { %v1752_v22 = vrot.slane %v1751_v33, 2  ;;  %3880 = vpow2.f32 %v1818_v54  ;;  %v1816_v6 = vmul.f32 1.442695, %v1796_v16 }
 0x1af   :  { %6657 = vst [vmem:[#allocation28_spill] sm:$0xff] %v5555_v3  ;;  %1792 = vmax.xlane.f32.xlu0 %v5555_v3  ;;  %v1761_v51 = vpop.xlane.xlu0 %1760 }
 0x1b0   :  { %v1753_v61 = vadd.f32 %v1752_v22, %v1751_v33  ;;  %3882 = vpow2.f32 %v1816_v6  ;;  %v1798_v8 = vsub.f32 %v5322_v11, %v1761_v51 }
 0x1b1   :  { %v1763_v39 = vpop.xlane.xlu1 %1762 }
 0x1b2   :  { %v1754_v56 = vrot.slane %v1753_v61, 1  ;;  %v1820_v24 = vmul.f32 1.442695, %v1798_v8  ;;  %v1799_v50 = vsub.f32 %v5334_v63, %v1763_v39 }
 0x1b4   :  { %v5559_v52 = vadd.f32 %v1754_v56, %v1753_v61  ;;  %3884 = vpow2.f32 %v1820_v24  ;;  %v1822_v12 = vmul.f32 1.442695, %v1799_v50 }
 0x1b6   :  { %6658 = vst [vmem:[#allocation29_spill] sm:$0xff] %v5559_v52  ;;  %1794 = vmax.xlane.f32.xlu1 %v5559_v52  ;;  %3886 = vpow2.f32 %v1822_v12 }
 0x1b8   :  { %v5563_v25 = vpop.eup %3880 }
 0x1ba   :  { %1858 = vadd.xlane.f32.xlu1 %v5563_v25  ;;  %v5566_v0 = vpop.eup %3882  ;;  %v1765_v28 = vpop.xlane.xlu0 %1764 }
 0x1bb   :  { %1856 = vadd.xlane.f32.xlu0 %v5566_v0  ;;  %v1800_v45 = vsub.f32 %v5343_v36, %v1765_v28 }
 0x1bd   :  { %v1824_v33 = vmul.f32 1.442695, %v1800_v45 }
 0x1be   :  { %v5570_v29 = vpop.eup %3884  ;;  %v1767_v41 = vpop.xlane.xlu1 %1766 }
 0x1bf   :  { %v1801_v30 = vsub.f32 %v5350_v43, %v1767_v41  ;;  %1860 = vadd.xlane.f32.xlu0 %v5570_v29  ;;  %3888 = vpow2.f32 %v1824_v33 }
 0x1c0   :  { %v5574_v27 = vpop.eup %3886 }
 0x1c1   :  { %v1826_v57 = vmul.f32 1.442695, %v1801_v30  ;;  %1862 = vadd.xlane.f32.xlu1 %v5574_v27 }
 0x1c3   :  { %3890 = vpow2.f32 %v1826_v57 }
 0x1c9   :  { %v5577_v22 = vpop.eup %3888 }
 0x1ca   :  { %1864 = vadd.xlane.f32.xlu0 %v5577_v22 }
 0x1cd   :  { %v5580_v54 = vpop.eup %3890 }
 0x1ce   :  { %1866 = vadd.xlane.f32.xlu1 %v5580_v54 }
 0x1cf   :  { %v1769_v16 = vpop.xlane.xlu0 %1768 }
 0x1d0   :  { %v1802_v61 = vsub.f32 %v5371_v48, %v1769_v16  ;;  %v5668_v48 = vld [vmem:[#allocation7 + $0x48] sm:$0xff] }
 0x1d2   :  { %v1828_v6 = vmul.f32 1.442695, %v1802_v61 }
 0x1d3   :  { %v1771_v51 = vpop.xlane.xlu1 %1770 }
 0x1d4   :  { %3892 = vpow2.f32 %v1828_v6  ;;  %v1803_v56 = vsub.f32 %v5390_v9, %v1771_v51 }
 0x1d6   :  { %v1830_v8 = vmul.f32 1.442695, %v1803_v56 }
 0x1d8   :  { %3894 = vpow2.f32 %v1830_v8 }
 0x1dd   :  { %v1773_v24 = vpop.xlane.xlu0 %1772 }
 0x1de   :  { %v1804_v39 = vsub.f32 %v5397_v42, %v1773_v24  ;;  %v5586_v50 = vpop.eup %3892 }
 0x1df   :  { %1868 = vadd.xlane.f32.xlu0 %v5586_v50 }
 0x1e0   :  { %v1832_v12 = vmul.f32 1.442695, %v1804_v39 }
 0x1e2   :  { %3896 = vpow2.f32 %v1832_v12  ;;  %v5590_v41 = vpop.eup %3894 }
 0x1e3   :  { %v1775_v28 = vpop.xlane.xlu1 %1774  ;;  %1870 = vadd.xlane.f32.xlu1 %v5590_v41 }
 0x1e4   :  { %v1805_v45 = vsub.f32 %v5412_v40, %v1775_v28 }
 0x1e6   :  { %v1834_v33 = vmul.f32 1.442695, %v1805_v45 }
 0x1e8   :  { %3898 = vpow2.f32 %v1834_v33 }
 0x1ec   :  { %v5593_v30 = vpop.eup %3896 }
 0x1ed   :  { %1872 = vadd.xlane.f32.xlu0 %v5593_v30 }
 0x1f0   :  { %v1777_v57 = vpop.xlane.xlu0 %1776 }
 0x1f1   :  { %v1806_v16 = vsub.f32 %v5433_v37, %v1777_v57 }
 0x1f2   :  { %v5597_v61 = vpop.eup %3898 }
 0x1f3   :  { %v1836_v6 = vmul.f32 1.442695, %v1806_v16  ;;  %1874 = vadd.xlane.f32.xlu1 %v5597_v61 }
 0x1f5   :  { %3900 = vpow2.f32 %v1836_v6 }
 0x1f6   :  { %v1779_v51 = vpop.xlane.xlu1 %1778 }
 0x1f7   :  { %v1807_v56 = vsub.f32 %v5450_v26, %v1779_v51 }
 0x1f9   :  { %v1838_v8 = vmul.f32 1.442695, %v1807_v56 }
 0x1fb   :  { %3902 = vpow2.f32 %v1838_v8 }
 0x1ff   :  { %v5601_v24 = vpop.eup %3900 }
 0x200   :  { %1876 = vadd.xlane.f32.xlu0 %v5601_v24 }
 0x203   :  { %v1781_v39 = vpop.xlane.xlu0 %1780 }
 0x204   :  { %v1808_v12 = vsub.f32 %v5471_v34, %v1781_v39 }
 0x205   :  { %v5605_v28 = vpop.eup %3902 }
 0x206   :  { %v1840_v45 = vmul.f32 1.442695, %v1808_v12  ;;  %1878 = vadd.xlane.f32.xlu1 %v5605_v28 }
 0x208   :  { %3904 = vpow2.f32 %v1840_v45 }
 0x20a   :  { %v1783_v33 = vpop.xlane.xlu1 %1782 }
 0x20b   :  { %v1809_v57 = vsub.f32 %v5488_v62, %v1783_v33 }
 0x20d   :  { %v1842_v16 = vmul.f32 1.442695, %v1809_v57 }
 0x20f   :  { %3906 = vpow2.f32 %v1842_v16 }
 0x212   :  { %v5609_v6 = vpop.eup %3904 }
 0x213   :  { %1880 = vadd.xlane.f32.xlu0 %v5609_v6 }
 0x216   :  { %v1785_v51 = vpop.xlane.xlu0 %1784 }
 0x217   :  { %v1810_v56 = vsub.f32 %v5509_v1, %v1785_v51 }
 0x219   :  { %v5613_v8 = vpop.eup %3906  ;;  %v1844_v39 = vmul.f32 1.442695, %v1810_v56 }
 0x21a   :  { %1882 = vadd.xlane.f32.xlu1 %v5613_v8 }
 0x21b   :  { %3908 = vpow2.f32 %v1844_v39 }
 0x21d   :  { %v1787_v12 = vpop.xlane.xlu1 %1786 }
 0x21e   :  { %v1811_v45 = vsub.f32 %v5520_v10, %v1787_v12 }
 0x220   :  { %v1846_v34 = vmul.f32 1.442695, %v1811_v45 }
 0x222   :  { %3910 = vpow2.f32 %v1846_v34 }
 0x225   :  { %v5617_v33 = vpop.eup %3908 }
 0x226   :  { %1884 = vadd.xlane.f32.xlu0 %v5617_v33 }
 0x22a   :  { %v1789_v57 = vpop.xlane.xlu0 %1788 }
 0x22b   :  { %v1812_v16 = vsub.f32 %v5531_v19, %v1789_v57 }
 0x22c   :  { %v5621_v62 = vpop.eup %3910 }
 0x22d   :  { %v1848_v51 = vmul.f32 1.442695, %v1812_v16  ;;  %1886 = vadd.xlane.f32.xlu1 %v5621_v62 }
 0x22f   :  { %3912 = vpow2.f32 %v1848_v51 }
 0x230   :  { %v1791_v56 = vpop.xlane.xlu1 %1790 }
 0x231   :  { %v1813_v39 = vsub.f32 %v5544_v20, %v1791_v56 }
 0x233   :  { %v1850_v1 = vmul.f32 1.442695, %v1813_v39 }
 0x235   :  { %3914 = vpow2.f32 %v1850_v1 }
 0x239   :  { %v5625_v12 = vpop.eup %3912 }
 0x23a   :  { %1888 = vadd.xlane.f32.xlu0 %v5625_v12 }
 0x23c   :  { %v1793_v34 = vpop.xlane.xlu0 %1792 }
 0x23d   :  { %v1814_v45 = vsub.f32 %v5555_v3, %v1793_v34 }
 0x23f   :  { %v5629_v10 = vpop.eup %3914  ;;  %v1852_v57 = vmul.f32 1.442695, %v1814_v45 }
 0x240   :  { %1890 = vadd.xlane.f32.xlu1 %v5629_v10 }
 0x241   :  { %3916 = vpow2.f32 %v1852_v57 }
 0x243   :  { %v1795_v16 = vpop.xlane.xlu1 %1794 }
 0x244   :  { %v1815_v51 = vsub.f32 %v5559_v52, %v1795_v16 }
 0x246   :  { %v1854_v19 = vmul.f32 1.442695, %v1815_v51  ;;  %v5640_v51 = vld [vmem:[#allocation7 + $0x8] sm:$0xff] }
 0x247   :  { %v1859_v56 = vpop.xlane.xlu1 %1858 }
 0x248   :  { %3918 = vpow2.f32 %v1854_v19  ;;  %v1857_v1 = vpop.xlane.xlu0 %1856 }
 0x249   :  { %3920 = vrcp.f32 %v1859_v56 }
 0x24a   :  { %3922 = vrcp.f32 %v1857_v1  ;;  %v5643_v1 = vld [vmem:[#allocation7] sm:$0xff] }
 0x24b   :  { %v5633_v39 = vpop.eup %3916 }
 0x24c   :  { %1892 = vadd.xlane.f32.xlu0 %v5633_v39  ;;  %v1861_v34 = vpop.xlane.xlu0 %1860 }
 0x24d   :  { %3924 = vrcp.f32 %v1861_v34 }
 0x24e   :  { %v1863_v3 = vpop.xlane.xlu1 %1862 }
 0x24f   :  { %3926 = vrcp.f32 %v1863_v3  ;;  %v5647_v3 = vld [vmem:[#allocation7 + $0x18] sm:$0xff] }
 0x252   :  { %v5636_v45 = vpop.eup %3918 }
 0x253   :  { %1894 = vadd.xlane.f32.xlu1 %v5636_v45  ;;  %v3921_v57 = vpop.eup %3920 }
 0x254   :  { %v3923_v16 = vpop.eup %3922  ;;  %v1917_v34 = vmul.f32 %v3921_v57, %v5563_v25  ;;  %v5654_v25 = vld [vmem:[#allocation7 + $0x28] sm:$0xff] }
 0x255   :  { %v1916_v19 = vmul.f32 %v3923_v16, %v5566_v0  ;;  %v5650_v0 = vld [vmem:[#allocation7 + $0x10] sm:$0xff] }
 0x256   :  { %v1939_v37 = vmul.f32 %v5647_v3, %v1917_v34  ;;  %v1938_v16 = vmul.f32 %v5650_v0, %v1917_v34 }
 0x257   :  { %v1937_v56 = vmul.f32 %v5640_v51, %v1916_v19  ;;  %v1936_v52 = vmul.f32 %v5643_v1, %v1916_v19  ;;  %v3925_v20 = vpop.eup %3924  ;;  %v1865_v26 = vpop.xlane.xlu0 %1864 }
 0x258   :  { %3928 = vrcp.f32 %v1865_v26  ;;  %v1918_v40 = vmul.f32 %v3925_v20, %v5570_v29  ;;  %v5657_v26 = vld [vmem:[#allocation7 + $0x20] sm:$0xff]  ;;  %v5664_v29 = vld [vmem:[#allocation7 + $0x30] sm:$0xff] }
 0x259   :  { %1978 = vadd.xlane.f32.xlu1 %v1937_v56  ;;  %1976 = vadd.xlane.f32.xlu0 %v1936_v52  ;;  %v3927_v42 = vpop.eup %3926  ;;  %v5661_v56 = vld [vmem:[#allocation7 + $0x38] sm:$0xff] }
 0x25a   :  { %v1941_v52 = vmul.f32 %v5654_v25, %v1918_v40  ;;  %v1940_v57 = vmul.f32 %v5657_v26, %v1918_v40  ;;  %v1919_v19 = vmul.f32 %v3927_v42, %v5574_v27  ;;  %v5671_v40 = vld [vmem:[#allocation7 + $0x40] sm:$0xff] }
 0x25b   :  { %v1867_v9 = vpop.xlane.xlu1 %1866 }
 0x25c   :  { %3930 = vrcp.f32 %v1867_v9  ;;  %v1943_v20 = vmul.f32 %v5661_v56, %v1919_v19  ;;  %v1942_v9 = vmul.f32 %v5664_v29, %v1919_v19 }
 0x25d   :  { %1982 = vadd.xlane.f32.xlu1 %v1939_v37  ;;  %1980 = vadd.xlane.f32.xlu0 %v1938_v16 }
 0x261   :  { %1986 = vadd.xlane.f32.xlu1 %v1941_v52  ;;  %1984 = vadd.xlane.f32.xlu0 %v1940_v57  ;;  %v5675_v57 = vld [vmem:[#allocation7 + $0x58] sm:$0xff] }
 0x262   :  { %v3929_v37 = vpop.eup %3928 }
 0x263   :  { %v1920_v34 = vmul.f32 %v3929_v37, %v5577_v22 }
 0x265   :  { %1990 = vadd.xlane.f32.xlu1 %v1943_v20  ;;  %1988 = vadd.xlane.f32.xlu0 %v1942_v9  ;;  %v1945_v42 = vmul.f32 %v5668_v48, %v1920_v34  ;;  %v1944_v27 = vmul.f32 %v5671_v40, %v1920_v34  ;;  %v5678_v20 = vld [vmem:[#allocation7 + $0x50] sm:$0xff] }
 0x266   :  { %v3931_v16 = vpop.eup %3930 }
 0x267   :  { %v1921_v52 = vmul.f32 %v3931_v16, %v5580_v54  ;;  %v5682_v16 = vld [vmem:[#allocation7 + $0x68] sm:$0xff] }
 0x268   :  { %6659 = vst [vmem:[#allocation30_spill] sm:$0xff] %v5682_v16 }
 0x269   :  { %1994 = vadd.xlane.f32.xlu1 %v1945_v42  ;;  %1992 = vadd.xlane.f32.xlu0 %v1944_v27  ;;  %v1947_v19 = vmul.f32 %v5675_v57, %v1921_v52  ;;  %v1946_v22 = vmul.f32 %v5678_v20, %v1921_v52  ;;  %v5685_v27 = vld [vmem:[#allocation7 + $0x60] sm:$0xff] }
 0x26c   :  { %v1869_v9 = vpop.xlane.xlu0 %1868 }
 0x26d   :  { %3932 = vrcp.f32 %v1869_v9  ;;  %1998 = vadd.xlane.f32.xlu1 %v1947_v19  ;;  %1996 = vadd.xlane.f32.xlu0 %v1946_v22  ;;  %v5689_v9 = vld [vmem:[#allocation7 + $0x78] sm:$0xff] }
 0x26e   :  { %6660 = vst [vmem:[#allocation31_spill] sm:$0xff] %v5689_v9 }
 0x270   :  { %v1871_v37 = vpop.xlane.xlu1 %1870 }
 0x271   :  { %3934 = vrcp.f32 %v1871_v37 }
 0x277   :  { %v3933_v43 = vpop.eup %3932 }
 0x278   :  { %v1922_v34 = vmul.f32 %v3933_v43, %v5586_v50  ;;  %v5692_v50 = vld [vmem:[#allocation7 + $0x70] sm:$0xff] }
 0x27a   :  { %v1873_v54 = vpop.xlane.xlu0 %1872  ;;  %v1949_v42 = vmul.f32 %v5682_v16, %v1922_v34  ;;  %v1948_v36 = vmul.f32 %v5685_v27, %v1922_v34  ;;  %v5699_v16 = vld [vmem:[#allocation7 + $0x80] sm:$0xff] }
 0x27b   :  { %3936 = vrcp.f32 %v1873_v54  ;;  %v3935_v52 = vpop.eup %3934 }
 0x27c   :  { %2002 = vadd.xlane.f32.xlu1 %v1949_v42  ;;  %2000 = vadd.xlane.f32.xlu0 %v1948_v36  ;;  %v1923_v22 = vmul.f32 %v3935_v52, %v5590_v41  ;;  %v5696_v42 = vld [vmem:[#allocation7 + $0x88] sm:$0xff] }
 0x27e   :  { %v1951_v43 = vmul.f32 %v5689_v9, %v1923_v22  ;;  %v1950_v37 = vmul.f32 %v5692_v50, %v1923_v22 }
 0x280   :  { %v1875_v19 = vpop.xlane.xlu1 %1874  ;;  %2006 = vadd.xlane.f32.xlu1 %v1951_v43  ;;  %2004 = vadd.xlane.f32.xlu0 %v1950_v37 }
 0x281   :  { %3938 = vrcp.f32 %v1875_v19 }
 0x285   :  { %v3937_v54 = vpop.eup %3936 }
 0x286   :  { %v1924_v34 = vmul.f32 %v3937_v54, %v5593_v30 }
 0x288   :  { %v1953_v36 = vmul.f32 %v5696_v42, %v1924_v34  ;;  %v1952_v41 = vmul.f32 %v5699_v16, %v1924_v34 }
 0x28a   :  { %2010 = vadd.xlane.f32.xlu1 %v1953_v36  ;;  %2008 = vadd.xlane.f32.xlu0 %v1952_v41 }
 0x28b   :  { %v3939_v52 = vpop.eup %3938 }
 0x28c   :  { %v1925_v19 = vmul.f32 %v3939_v52, %v5597_v61 }
 0x28d   :  { %v1877_v9 = vpop.xlane.xlu0 %1876 }
 0x28e   :  { %3940 = vrcp.f32 %v1877_v9  ;;  %v1955_v22 = vmul.f32 %v5383_v59, %v1925_v19  ;;  %v1954_v43 = vmul.f32 %v5380_v18, %v1925_v19 }
 0x290   :  { %2014 = vadd.xlane.f32.xlu1 %v1955_v22  ;;  %2012 = vadd.xlane.f32.xlu0 %v1954_v43 }
 0x293   :  { %v1879_v30 = vpop.xlane.xlu1 %1878 }
 0x294   :  { %3942 = vrcp.f32 %v1879_v30 }
 0x298   :  { %v3941_v37 = vpop.eup %3940 }
 0x299   :  { %v1926_v54 = vmul.f32 %v3941_v37, %v5601_v24 }
 0x29b   :  { %v1957_v34 = vmul.f32 %v5405_v49, %v1926_v54  ;;  %v1956_v36 = vmul.f32 %v5402_v4, %v1926_v54 }
 0x29d   :  { %2018 = vadd.xlane.f32.xlu1 %v1957_v34  ;;  %2016 = vadd.xlane.f32.xlu0 %v1956_v36 }
 0x29e   :  { %v3943_v61 = vpop.eup %3942 }
 0x29f   :  { %v1927_v9 = vmul.f32 %v3943_v61, %v5605_v28 }
 0x2a0   :  { %v1881_v41 = vpop.xlane.xlu0 %1880 }
 0x2a1   :  { %3944 = vrcp.f32 %v1881_v41  ;;  %v1959_v18 = vmul.f32 %v5424_v47, %v1927_v9  ;;  %v1958_v59 = vmul.f32 %v5421_v21, %v1927_v9 }
 0x2a3   :  { %2022 = vadd.xlane.f32.xlu1 %v1959_v18  ;;  %2020 = vadd.xlane.f32.xlu0 %v1958_v59 }
 0x2a7   :  { %v1883_v52 = vpop.xlane.xlu1 %1882 }
 0x2a8   :  { %3946 = vrcp.f32 %v1883_v52 }
 0x2ab   :  { %v3945_v24 = vpop.eup %3944 }
 0x2ac   :  { %v1928_v49 = vmul.f32 %v3945_v24, %v5609_v6 }
 0x2ae   :  { %v1961_v4 = vmul.f32 %v5443_v13, %v1928_v49  ;;  %v1960_v19 = vmul.f32 %v5440_v15, %v1928_v49 }
 0x2b0   :  { %2026 = vadd.xlane.f32.xlu1 %v1961_v4  ;;  %2024 = vadd.xlane.f32.xlu0 %v1960_v19 }
 0x2b2   :  { %v3947_v28 = vpop.eup %3946 }
 0x2b3   :  { %v1929_v22 = vmul.f32 %v3947_v28, %v5613_v8  ;;  %v1885_v43 = vpop.xlane.xlu0 %1884 }
 0x2b4   :  { %3948 = vrcp.f32 %v1885_v43 }
 0x2b5   :  { %v1963_v21 = vmul.f32 %v5462_v60, %v1929_v22  ;;  %v1962_v47 = vmul.f32 %v5459_v23, %v1929_v22 }
 0x2b7   :  { %2030 = vadd.xlane.f32.xlu1 %v1963_v21  ;;  %2028 = vadd.xlane.f32.xlu0 %v1962_v47 }
 0x2ba   :  { %v1887_v30 = vpop.xlane.xlu1 %1886 }
 0x2bb   :  { %3950 = vrcp.f32 %v1887_v30 }
 0x2be   :  { %v3949_v6 = vpop.eup %3948 }
 0x2bf   :  { %v1930_v13 = vmul.f32 %v3949_v6, %v5617_v33 }
 0x2c1   :  { %v1965_v15 = vmul.f32 %v5481_v46, %v1930_v13  ;;  %v1964_v37 = vmul.f32 %v5478_v58, %v1930_v13 }
 0x2c3   :  { %2034 = vadd.xlane.f32.xlu1 %v1965_v15  ;;  %2032 = vadd.xlane.f32.xlu0 %v1964_v37 }
 0x2c5   :  { %v3951_v8 = vpop.eup %3950 }
 0x2c6   :  { %v1931_v54 = vmul.f32 %v3951_v8, %v5621_v62 }
 0x2c7   :  { %v1889_v34 = vpop.xlane.xlu0 %1888 }
 0x2c8   :  { %3952 = vrcp.f32 %v1889_v34  ;;  %v1967_v23 = vmul.f32 %v5502_v32, %v1931_v54  ;;  %v1966_v60 = vmul.f32 %v5499_v14, %v1931_v54 }
 0x2ca   :  { %2038 = vadd.xlane.f32.xlu1 %v1967_v23  ;;  %2036 = vadd.xlane.f32.xlu0 %v1966_v60 }
 0x2cd   :  { %v1891_v36 = vpop.xlane.xlu1 %1890 }
 0x2ce   :  { %3954 = vrcp.f32 %v1891_v36 }
 0x2d2   :  { %v3953_v33 = vpop.eup %3952 }
 0x2d3   :  { %v1932_v46 = vmul.f32 %v3953_v33, %v5625_v12 }
 0x2d5   :  { %v1969_v58 = vmul.f32 %v5517_v35, %v1932_v46  ;;  %v1968_v61 = vmul.f32 %v5514_v7, %v1932_v46 }
 0x2d7   :  { %2042 = vadd.xlane.f32.xlu1 %v1969_v58  ;;  %2040 = vadd.xlane.f32.xlu0 %v1968_v61 }
 0x2d8   :  { %v3955_v62 = vpop.eup %3954 }
 0x2d9   :  { %v1893_v9 = vpop.xlane.xlu0 %1892  ;;  %v1933_v41 = vmul.f32 %v3955_v62, %v5629_v10 }
 0x2da   :  { %3956 = vrcp.f32 %v1893_v9 }
 0x2db   :  { %v1971_v14 = vmul.f32 %v5528_v17, %v1933_v41  ;;  %v1970_v32 = vmul.f32 %v5525_v55, %v1933_v41 }
 0x2dd   :  { %2046 = vadd.xlane.f32.xlu1 %v1971_v14  ;;  %2044 = vadd.xlane.f32.xlu0 %v1970_v32 }
 0x2e0   :  { %v1895_v18 = vpop.xlane.xlu1 %1894 }
 0x2e1   :  { %3958 = vrcp.f32 %v1895_v18 }
 0x2e4   :  { %v3957_v12 = vpop.eup %3956 }
 0x2e5   :  { %v1934_v35 = vmul.f32 %v3957_v12, %v5633_v39 }
 0x2e6   :  { %v5730_v59 = vpop.xlane.xlu1 %1978  ;;  %v5732_v7 = vpop.xlane.xlu0 %1976 }
 0x2e7   :  { %v2057_v52 = vmul.f32 %v5730_v59, %v5730_v59  ;;  %v2056_v10 = vmul.f32 %v5732_v7, %v5732_v7  ;;  %v1973_v17 = vmul.f32 %v5539_v2, %v1934_v35  ;;  %v1972_v55 = vmul.f32 %v5536_v53, %v1934_v35 }
 0x2e9   :  { %v2096_v24 = vadd.f32 %v2057_v52, %v2056_v10  ;;  %2050 = vadd.xlane.f32.xlu1 %v1973_v17  ;;  %2048 = vadd.xlane.f32.xlu0 %v1972_v55 }
 0x2ea   :  { %v5740_v4 = vpop.xlane.xlu1 %1982  ;;  %v5742_v39 = vpop.xlane.xlu0 %1980 }
 0x2eb   :  { %v3959_v49 = vpop.eup %3958  ;;  %v2097_v28 = vrot.slane %v2096_v24, 4  ;;  %v2059_v22 = vmul.f32 %v5740_v4, %v5740_v4  ;;  %v2058_v43 = vmul.f32 %v5742_v39, %v5742_v39 }
 0x2ec   :  { %v1935_v19 = vmul.f32 %v3959_v49, %v5636_v45 }
 0x2ed   :  { %v2098_v21 = vadd.f32 %v2097_v28, %v2096_v24  ;;  %v2103_v47 = vadd.f32 %v2059_v22, %v2058_v43 }
 0x2ee   :  { %v1975_v2 = vmul.f32 %v5550_v31, %v1935_v19  ;;  %v1974_v53 = vmul.f32 %v5547_v5, %v1935_v19  ;;  %v5751_v30 = vpop.xlane.xlu1 %1986  ;;  %v5753_v6 = vpop.xlane.xlu0 %1984 }
 0x2ef   :  { %v2099_v45 = vrot.slane %v2098_v21, 2  ;;  %v2104_v13 = vrot.slane %v2103_v47, 4  ;;  %v2061_v15 = vmul.f32 %v5751_v30, %v5751_v30  ;;  %v2060_v37 = vmul.f32 %v5753_v6, %v5753_v6 }
 0x2f0   :  { %2054 = vadd.xlane.f32.xlu1 %v1975_v2  ;;  %2052 = vadd.xlane.f32.xlu0 %v1974_v53 }
 0x2f1   :  { %v2100_v8 = vadd.f32 %v2099_v45, %v2098_v21  ;;  %v2105_v31 = vadd.f32 %v2104_v13, %v2103_v47  ;;  %v2110_v54 = vadd.f32 %v2061_v15, %v2060_v37 }
 0x2f2   :  { %v5759_v5 = vpop.xlane.xlu1 %1990  ;;  %v5761_v34 = vpop.xlane.xlu0 %1988 }
 0x2f3   :  { %v2101_v23 = vrot.slane %v2100_v8, 1  ;;  %v2106_v60 = vrot.slane %v2105_v31, 2  ;;  %v2111_v36 = vrot.slane %v2110_v54, 4  ;;  %v2063_v33 = vmul.f32 %v5759_v5, %v5759_v5 }
 0x2f4   :  { %v2062_v46 = vmul.f32 %v5761_v34, %v5761_v34 }
 0x2f5   :  { %v2102_v58 = vadd.f32 %v2101_v23, %v2100_v8  ;;  %v2107_v61 = vadd.f32 %v2106_v60, %v2105_v31  ;;  %v2112_v62 = vadd.f32 %v2111_v36, %v2110_v54 }
 0x2f6   :  { %v2117_v9 = vadd.f32 %v2063_v33, %v2062_v46  ;;  %v5767_v18 = vpop.xlane.xlu1 %1994  ;;  %v5769_v12 = vpop.xlane.xlu0 %1992 }
 0x2f7   :  { %v2236_v41 = vadd.f32 1.0, %v2102_v58  ;;  %v2108_v14 = vrot.slane %v2107_v61, 1  ;;  %v2113_v32 = vrot.slane %v2112_v62, 2  ;;  %v2065_v52 = vmul.f32 %v5767_v18, %v5767_v18 }
 0x2f8   :  { %v2118_v35 = vrot.slane %v2117_v9, 4  ;;  %v2064_v10 = vmul.f32 %v5769_v12, %v5769_v12 }
 0x2f9   :  { %3960 = vrcp.f32 %v2236_v41  ;;  %v2109_v17 = vadd.f32 %v2108_v14, %v2107_v61  ;;  %v2114_v55 = vadd.f32 %v2113_v32, %v2112_v62 }
 0x2fa   :  { %v2119_v24 = vadd.f32 %v2118_v35, %v2117_v9  ;;  %v2124_v49 = vadd.f32 %v2065_v52, %v2064_v10  ;;  %3962 = vrsqrt.f32 %v2102_v58  ;;  %v5775_v22 = vpop.xlane.xlu1 %1998  ;;  %v5777_v43 = vpop.xlane.xlu0 %1996 }
 0x2fb   :  { %v2237_v19 = vadd.f32 1.0, %v2109_v17  ;;  %v2115_v28 = vrot.slane %v2114_v55, 1  ;;  %v2067_v21 = vmul.f32 %v5775_v22, %v5775_v22  ;;  %v2066_v47 = vmul.f32 %v5777_v43, %v5777_v43 }
 0x2fc   :  { %v2120_v2 = vrot.slane %v2119_v24, 2  ;;  %v2125_v53 = vrot.slane %v2124_v49, 4 }
 0x2fd   :  { %3964 = vrcp.f32 %v2237_v19  ;;  %v2116_v45 = vadd.f32 %v2115_v28, %v2114_v55  ;;  %v2131_v37 = vadd.f32 %v2067_v21, %v2066_v47 }
 0x2fe   :  { %v2121_v13 = vadd.f32 %v2120_v2, %v2119_v24  ;;  %v2126_v15 = vadd.f32 %v2125_v53, %v2124_v49  ;;  %3966 = vrsqrt.f32 %v2109_v17 }
 0x2ff   :  { %v2238_v8 = vadd.f32 1.0, %v2116_v45  ;;  %v2132_v23 = vrot.slane %v2131_v37, 4 }
 0x300   :  { %v2122_v31 = vrot.slane %v2121_v13, 1  ;;  %v2127_v54 = vrot.slane %v2126_v15, 2 }
 0x301   :  { %3968 = vrcp.f32 %v2238_v8  ;;  %v2133_v33 = vadd.f32 %v2132_v23, %v2131_v37 }
 0x302   :  { %v2123_v60 = vadd.f32 %v2122_v31, %v2121_v13  ;;  %v2128_v36 = vadd.f32 %v2127_v54, %v2126_v15  ;;  %3970 = vrsqrt.f32 %v2116_v45 }
 0x303   :  { %v3961_v46 = vpop.eup %3960  ;;  %v2134_v14 = vrot.slane %v2133_v33, 2 }
 0x304   :  { %v2276_v61 = vmul.f32 %v3961_v46, %v2102_v58  ;;  %v2239_v62 = vadd.f32 1.0, %v2123_v60  ;;  %v2129_v9 = vrot.slane %v2128_v36, 1  ;;  %v3963_v41 = vpop.eup %3962 }
 0x305   :  { %v2135_v55 = vadd.f32 %v2134_v14, %v2133_v33 }
 0x306   :  { %v2296_v32 = vmul.f32 %v2276_v61, %v5732_v7  ;;  %v2297_v35 = vmul.f32 %v2276_v61, %v5730_v59  ;;  %3972 = vrcp.f32 %v2239_v62  ;;  %v5785_v52 = vadd.f32 %v2129_v9, %v2128_v36 }
 0x307   :  { %v3965_v10 = vpop.eup %3964  ;;  %3974 = vrsqrt.f32 %v2123_v60  ;;  %v2136_v58 = vrot.slane %v2135_v55, 1 }
 0x308   :  { %v2356_v24 = vmul.f32 %v3963_v41, %v2296_v32  ;;  %v2357_v49 = vmul.f32 %v3963_v41, %v2297_v35  ;;  %v2277_v19 = vmul.f32 %v3965_v10, %v2109_v17  ;;  %v2240_v28 = vadd.f32 1.0, %v5785_v52  ;;  %v3967_v2 = vpop.eup %3966 }
 0x309   :  { %v5792_v47 = vpop.xlane.xlu1 %2002  ;;  %v5794_v13 = vpop.xlane.xlu0 %2000  ;;  %v5796_v17 = vadd.f32 %v2136_v58, %v2135_v55 }
 0x30a   :  { %v2396_v53 = vmul.f32 %v5643_v1, %v2356_v24  ;;  %v2397_v21 = vmul.f32 %v5640_v51, %v2357_v49  ;;  %v2298_v7 = vmul.f32 %v2277_v19, %v5742_v39  ;;  %v2299_v59 = vmul.f32 %v2277_v19, %v5740_v4 }
 0x30b   :  { %v3969_v15 = vpop.eup %3968  ;;  %3976 = vrcp.f32 %v2240_v28  ;;  %v2069_v37 = vmul.f32 %v5792_v47, %v5792_v47  ;;  %v2068_v1 = vmul.f32 %v5794_v13, %v5794_v13  ;;  %v2241_v4 = vadd.f32 1.0, %v5796_v17 }
 0x30c   :  { %v2436_v8 = vadd.f32 %v2397_v21, %v2396_v53  ;;  %v2358_v51 = vmul.f32 %v3967_v2, %v2298_v7  ;;  %v2359_v31 = vmul.f32 %v3967_v2, %v2299_v59  ;;  %v2278_v39 = vmul.f32 %v3969_v15, %v2116_v45  ;;  %v3971_v61 = vpop.eup %3970 }
 0x30d   :  { %3978 = vrsqrt.f32 %v5785_v52  ;;  %v2138_v54 = vadd.f32 %v2069_v37, %v2068_v1  ;;  %v5809_v24 = vpop.xlane.xlu1 %2006 }
 0x30e   :  { %v2437_v23 = vrot.slane %v2436_v8, 4  ;;  %v2398_v36 = vmul.f32 %v5650_v0, %v2358_v51  ;;  %v2399_v33 = vmul.f32 %v5647_v3, %v2359_v31  ;;  %v2300_v46 = vmul.f32 %v2278_v39, %v5753_v6  ;;  %v5811_v0 = vpop.xlane.xlu0 %2004 }
 0x30f   :  { %v2301_v62 = vmul.f32 %v2278_v39, %v5751_v30  ;;  %3980 = vrcp.f32 %v2241_v4  ;;  %v2139_v9 = vrot.slane %v2138_v54, 4  ;;  %v2071_v30 = vmul.f32 %v5809_v24, %v5809_v24 }
 0x310   :  { %v3973_v41 = vpop.eup %3972  ;;  %v2443_v14 = vadd.f32 %v2399_v33, %v2398_v36  ;;  %v2360_v45 = vmul.f32 %v3971_v61, %v2300_v46  ;;  %v2438_v32 = vadd.f32 %v2437_v23, %v2436_v8  ;;  %3982 = vrsqrt.f32 %v5796_v17 }
 0x311   :  { %v2361_v35 = vmul.f32 %v3971_v61, %v2301_v62  ;;  %v2279_v10 = vmul.f32 %v3973_v41, %v2123_v60  ;;  %v2140_v55 = vadd.f32 %v2139_v9, %v2138_v54  ;;  %v2070_v49 = vmul.f32 %v5811_v0, %v5811_v0  ;;  %v3975_v19 = vpop.eup %3974 }
 0x312   :  { %v2444_v3 = vrot.slane %v2443_v14, 4  ;;  %v2400_v6 = vmul.f32 %v5657_v26, %v2360_v45  ;;  %v2439_v21 = vrot.slane %v2438_v32, 2 }
 0x313   :  { %v2401_v28 = vmul.f32 %v5654_v25, %v2361_v35  ;;  %v2302_v60 = vmul.f32 %v2279_v10, %v5761_v34  ;;  %v2303_v58 = vmul.f32 %v2279_v10, %v5759_v5  ;;  %v2141_v2 = vrot.slane %v2140_v55, 2 }
 0x314   :  { %v2145_v53 = vadd.f32 %v2071_v30, %v2070_v49  ;;  %v2445_v7 = vadd.f32 %v2444_v3, %v2443_v14  ;;  %v2440_v31 = vadd.f32 %v2439_v21, %v2438_v32 }
 0x315   :  { %v3977_v59 = vpop.eup %3976  ;;  %v2450_v15 = vadd.f32 %v2401_v28, %v2400_v6  ;;  %v2362_v26 = vmul.f32 %v3975_v19, %v2302_v60  ;;  %v2363_v37 = vmul.f32 %v3975_v19, %v2303_v58  ;;  %v2142_v1 = vadd.f32 %v2141_v2, %v2140_v55 }
 0x316   :  { %v2280_v8 = vmul.f32 %v3977_v59, %v5785_v52  ;;  %v2146_v51 = vrot.slane %v2145_v53, 4  ;;  %v2446_v39 = vrot.slane %v2445_v7, 2 }
 0x317   :  { %v3979_v4 = vpop.eup %3978  ;;  %v2451_v25 = vrot.slane %v2450_v15, 4  ;;  %v2402_v34 = vmul.f32 %v5664_v29, %v2362_v26  ;;  %v2403_v5 = vmul.f32 %v5661_v56, %v2363_v37  ;;  %v2143_v54 = vrot.slane %v2142_v1, 1  ;;  %v5824_v23 = vpop.xlane.xlu1 %2010 }
 0x318   :  { %v5826_v36 = vpop.xlane.xlu0 %2008  ;;  %v2304_v33 = vmul.f32 %v2280_v8, %v5769_v12  ;;  %v2305_v46 = vmul.f32 %v2280_v8, %v5767_v18  ;;  %v2147_v61 = vadd.f32 %v2146_v51, %v2145_v53  ;;  %v2073_v52 = vmul.f32 %v5824_v23, %v5824_v23 }
 0x319   :  { %v3981_v62 = vpop.eup %3980  ;;  %v2457_v9 = vadd.f32 %v2403_v5, %v2402_v34  ;;  %v5832_v41 = vadd.f32 %v2143_v54, %v2142_v1  ;;  %v2072_v56 = vmul.f32 %v5826_v36, %v5826_v36  ;;  %v2441_v29 = vrot.slane %v2440_v31, 1 }
 0x31a   :  { %v2364_v14 = vmul.f32 %v3979_v4, %v2304_v33  ;;  %v2365_v45 = vmul.f32 %v3979_v4, %v2305_v46  ;;  %v2281_v32 = vmul.f32 %v3981_v62, %v5796_v17  ;;  %v2148_v35 = vrot.slane %v2147_v61, 2  ;;  %v3983_v12 = vpop.eup %3982 }
 0x31b   :  { %v2458_v10 = vrot.slane %v2457_v9, 4  ;;  %v2242_v18 = vadd.f32 1.0, %v5832_v41  ;;  %3984 = vrsqrt.f32 %v5832_v41  ;;  %v2152_v55 = vadd.f32 %v2073_v52, %v2072_v56 }
 0x31c   :  { %v2404_v3 = vmul.f32 %v5671_v40, %v2364_v14  ;;  %v2405_v6 = vmul.f32 %v5668_v48, %v2365_v45  ;;  %v2306_v30 = vmul.f32 %v2281_v32, %v5777_v43  ;;  %v2307_v49 = vmul.f32 %v2281_v32, %v5775_v22 }
 0x31d   :  { %3986 = vrcp.f32 %v2242_v18  ;;  %v2149_v19 = vadd.f32 %v2148_v35, %v2147_v61  ;;  %v2153_v28 = vrot.slane %v2152_v55, 4  ;;  %v5843_v17 = vpop.xlane.xlu1 %2014  ;;  %v5845_v60 = vpop.xlane.xlu0 %2012  ;;  %v2442_v58 = vadd.f32 %v2441_v29, %v2440_v31 }
 0x31e   :  { %v2464_v2 = vadd.f32 %v2405_v6, %v2404_v3  ;;  %v2366_v53 = vmul.f32 %v3983_v12, %v2306_v30  ;;  %v2367_v21 = vmul.f32 %v3983_v12, %v2307_v49  ;;  %v2075_v40 = vmul.f32 %v5843_v17, %v5843_v17 }
 0x31f   :  { %v2150_v59 = vrot.slane %v2149_v19, 1  ;;  %v2154_v48 = vadd.f32 %v2153_v28, %v2152_v55  ;;  %v2074_v43 = vmul.f32 %v5845_v60, %v5845_v60  ;;  %v5852_v22 = vadd.f32 %v2442_v58, %v5318_v44  ;;  %3317 = vst [vmem:[#allocation8] sm:$0x1] %v2442_v58 }
 0x320   :  { %v2465_v26 = vrot.slane %v2464_v2, 4  ;;  %v2406_v37 = vmul.f32 %v5678_v20, %v2366_v53  ;;  %v2407_v1 = vmul.f32 %v5675_v57, %v2367_v21  ;;  %v2447_v8 = vadd.f32 %v2446_v39, %v2445_v7 }
 0x321   :  { %v5856_v51 = vadd.f32 %v2150_v59, %v2149_v19  ;;  %v2155_v31 = vrot.slane %v2154_v48, 2  ;;  %v2159_v4 = vadd.f32 %v2075_v40, %v2074_v43  ;;  %2596 = vmax.xlane.f32.xlu0 %v5852_v22  ;;  %v2452_v34 = vadd.f32 %v2451_v25, %v2450_v15 }
 0x322   :  { %v2471_v5 = vadd.f32 %v2407_v1, %v2406_v37  ;;  %v2448_v54 = vrot.slane %v2447_v8, 1  ;;  %v2459_v33 = vadd.f32 %v2458_v10, %v2457_v9  ;;  %v2466_v46 = vadd.f32 %v2465_v26, %v2464_v2 }
 0x323   :  { %v2243_v44 = vadd.f32 1.0, %v5856_v51  ;;  %v2156_v61 = vadd.f32 %v2155_v31, %v2154_v48  ;;  %v2160_v52 = vrot.slane %v2159_v4, 4  ;;  %v2453_v56 = vrot.slane %v2452_v34, 2 }
 0x324   :  { %v2472_v62 = vrot.slane %v2471_v5, 4  ;;  %v2449_v20 = vadd.f32 %v2448_v54, %v2447_v8  ;;  %v2460_v57 = vrot.slane %v2459_v33, 2  ;;  %v2467_v14 = vrot.slane %v2466_v46, 2 }
 0x325   :  { %v3985_v7 = vpop.eup %3984  ;;  %3988 = vrcp.f32 %v2243_v44  ;;  %v2157_v39 = vrot.slane %v2156_v61, 1  ;;  %v2161_v29 = vadd.f32 %v2160_v52, %v2159_v4  ;;  %v2454_v15 = vadd.f32 %v2453_v56, %v2452_v34  ;;  %v6661_v4 = vld [vmem:[#allocation30_spill] sm:$0xff] }
 0x326   :  { %v5861_v45 = vadd.f32 %v2449_v20, %v5312_v38  ;;  %3318 = vst [vmem:[#allocation8 + $0x1] sm:$0x1] %v2449_v20  ;;  %v2461_v25 = vadd.f32 %v2460_v57, %v2459_v33  ;;  %v2473_v9 = vadd.f32 %v2472_v62, %v2471_v5  ;;  %v2468_v10 = vadd.f32 %v2467_v14, %v2466_v46 }
 0x327   :  { %v3987_v32 = vpop.eup %3986  ;;  %v5863_v35 = vadd.f32 %v2157_v39, %v2156_v61  ;;  %v2162_v12 = vrot.slane %v2161_v29, 2  ;;  %3990 = vrsqrt.f32 %v5856_v51  ;;  %v2455_v55 = vrot.slane %v2454_v15, 1 }
 0x328   :  { %v2282_v18 = vmul.f32 %v3987_v32, %v5832_v41  ;;  %2598 = vmax.xlane.f32.xlu1 %v5861_v45  ;;  %v2462_v3 = vrot.slane %v2461_v25, 1  ;;  %v2469_v30 = vrot.slane %v2468_v10, 1  ;;  %v2474_v49 = vrot.slane %v2473_v9, 2 }
 0x329   :  { %v2244_v38 = vadd.f32 1.0, %v5863_v35  ;;  %v2163_v6 = vadd.f32 %v2162_v12, %v2161_v29  ;;  %v2456_v41 = vadd.f32 %v2455_v55, %v2454_v15  ;;  %v6664_v55 = vld [vmem:[#allocation31_spill] sm:$0xff] }
 0x32a   :  { %v2308_v19 = vmul.f32 %v2282_v18, %v5794_v13  ;;  %v2309_v28 = vmul.f32 %v2282_v18, %v5792_v47  ;;  %v5871_v58 = vpop.xlane.xlu1 %2018  ;;  %v5873_v2 = vpop.xlane.xlu0 %2016  ;;  %v2463_v53 = vadd.f32 %v2462_v3, %v2461_v25  ;;  %v2470_v1 = vadd.f32 %v2469_v30, %v2468_v10 }
 0x32b   :  { %3992 = vrcp.f32 %v2244_v38  ;;  %v2164_v21 = vrot.slane %v2163_v6, 1  ;;  %v2077_v40 = vmul.f32 %v5871_v58, %v5871_v58  ;;  %v2076_v59 = vmul.f32 %v5873_v2, %v5873_v2  ;;  %3319 = vst [vmem:[#allocation8 + $0x2] sm:$0x1] %v2456_v41 }
 0x32c   :  { %v2368_v48 = vmul.f32 %v3985_v7, %v2308_v19  ;;  %v2369_v43 = vmul.f32 %v3985_v7, %v2309_v28  ;;  %v5880_v13 = vadd.f32 %v2456_v41, %v5322_v11  ;;  %v5883_v47 = vadd.f32 %v2463_v53, %v5334_v63  ;;  %3320 = vst [vmem:[#allocation8 + $0x3] sm:$0x1] %v2463_v53  ;;  %v6662_v63 = vld [vmem:[#allocation14_spill] sm:$0xff] }
 0x32d   :  { %v2165_v26 = vadd.f32 %v2164_v21, %v2163_v6  ;;  %v2166_v37 = vadd.f32 %v2077_v40, %v2076_v59  ;;  %v2475_v8 = vadd.f32 %v2474_v49, %v2473_v9  ;;  %3994 = vrsqrt.f32 %v5863_v35  ;;  %3321 = vst [vmem:[#allocation8 + $0x4] sm:$0x1] %v2470_v1 }
 0x32e   :  { %v2408_v31 = vmul.f32 %v5685_v27, %v2368_v48  ;;  %v2409_v34 = vmul.f32 %v6661_v4, %v2369_v43  ;;  %2600 = vmax.xlane.f32.xlu0 %v5880_v13  ;;  %2602 = vmax.xlane.f32.xlu1 %v5883_v47  ;;  %v5891_v33 = vadd.f32 %v2470_v1, %v6662_v63 }
 0x32f   :  { %v3989_v5 = vpop.eup %3988  ;;  %v2245_v11 = vadd.f32 1.0, %v2165_v26  ;;  %v2167_v54 = vrot.slane %v2166_v37, 4  ;;  %v2476_v61 = vrot.slane %v2475_v8, 1 }
 0x330   :  { %v2478_v46 = vadd.f32 %v2409_v34, %v2408_v31  ;;  %v2283_v44 = vmul.f32 %v3989_v5, %v5856_v51  ;;  %v5894_v52 = vpop.xlane.xlu1 %2022  ;;  %v5896_v62 = vpop.xlane.xlu0 %2020 }
 0x331   :  { %3996 = vrcp.f32 %v2245_v11  ;;  %v2168_v27 = vadd.f32 %v2167_v54, %v2166_v37  ;;  %v3991_v20 = vpop.eup %3990  ;;  %v2079_v39 = vmul.f32 %v5894_v52, %v5894_v52  ;;  %v2078_v51 = vmul.f32 %v5896_v62, %v5896_v62 }
 0x332   :  { %v2479_v56 = vrot.slane %v2478_v46, 4  ;;  %v2310_v57 = vmul.f32 %v2283_v44, %v5811_v0  ;;  %v2311_v7 = vmul.f32 %v2283_v44, %v5809_v24  ;;  %2604 = vmax.xlane.f32.xlu0 %v5891_v33  ;;  %v2477_v14 = vadd.f32 %v2476_v61, %v2475_v8  ;;  %v6663_v0 = vld [vmem:[#allocation15_spill] sm:$0xff]  ;;  %v6665_v61 = vld [vmem:[#allocation16_spill] sm:$0xff] }
 0x333   :  { %v2169_v29 = vrot.slane %v2168_v27, 2  ;;  %3998 = vrsqrt.f32 %v2165_v26  ;;  %v2173_v10 = vadd.f32 %v2079_v39, %v2078_v51  ;;  %v4274_v51 = vld [vmem:[#allocation7 + $0x90] sm:$0xff] }
 0x334   :  { %v2370_v15 = vmul.f32 %v3991_v20, %v2310_v57  ;;  %v2371_v25 = vmul.f32 %v3991_v20, %v2311_v7  ;;  %v2480_v9 = vadd.f32 %v2479_v56, %v2478_v46  ;;  %v5906_v18 = vadd.f32 %v2477_v14, %v6663_v0  ;;  %3322 = vst [vmem:[#allocation8 + $0x5] sm:$0x1] %v2477_v14 }
 0x335   :  { %v3993_v32 = vpop.eup %3992  ;;  %v2170_v12 = vadd.f32 %v2169_v29, %v2168_v27  ;;  %v2174_v49 = vrot.slane %v2173_v10, 4 }
 0x336   :  { %v2410_v24 = vmul.f32 %v5692_v50, %v2370_v15  ;;  %v2411_v3 = vmul.f32 %v6664_v55, %v2371_v25  ;;  %v2284_v38 = vmul.f32 %v3993_v32, %v5863_v35  ;;  %v2481_v6 = vrot.slane %v2480_v9, 2  ;;  %2606 = vmax.xlane.f32.xlu1 %v5906_v18  ;;  %v4275_v15 = vld [vmem:[#allocation7 + $0x98] sm:$0xff] }
 0x337   :  { %v2171_v30 = vrot.slane %v2170_v12, 1  ;;  %v3995_v21 = vpop.eup %3994  ;;  %v2175_v59 = vadd.f32 %v2174_v49, %v2173_v10 }
 0x338   :  { %v2485_v19 = vadd.f32 %v2411_v3, %v2410_v24  ;;  %v2312_v28 = vmul.f32 %v2284_v38, %v5826_v36  ;;  %v2313_v41 = vmul.f32 %v2284_v38, %v5824_v23  ;;  %v2482_v53 = vadd.f32 %v2481_v6, %v2480_v9 }
 0x339   :  { %v2172_v40 = vadd.f32 %v2171_v30, %v2170_v12  ;;  %v2176_v8 = vrot.slane %v2175_v59, 2 }
 0x33a   :  { %v2486_v48 = vrot.slane %v2485_v19, 4  ;;  %v2372_v50 = vmul.f32 %v3995_v21, %v2312_v28  ;;  %v2373_v43 = vmul.f32 %v3995_v21, %v2313_v41  ;;  %v2483_v37 = vrot.slane %v2482_v53, 1 }
 0x33b   :  { %v3997_v1 = vpop.eup %3996  ;;  %v2246_v35 = vadd.f32 1.0, %v2172_v40  ;;  %v2177_v36 = vadd.f32 %v2176_v8, %v2175_v59 }
 0x33c   :  { %v2412_v31 = vmul.f32 %v5699_v16, %v2372_v50  ;;  %v2413_v4 = vmul.f32 %v5696_v42, %v2373_v43  ;;  %v2285_v34 = vmul.f32 %v3997_v1, %v2165_v26  ;;  %v2484_v5 = vadd.f32 %v2483_v37, %v2482_v53 }
 0x33d   :  { %4000 = vrcp.f32 %v2246_v35  ;;  %v2487_v23 = vadd.f32 %v2486_v48, %v2485_v19  ;;  %v5918_v46 = vpop.xlane.xlu1 %2026  ;;  %v5920_v44 = vpop.xlane.xlu0 %2024  ;;  %v2178_v42 = vrot.slane %v2177_v36, 1  ;;  %v6666_v48 = vld [vmem:[#allocation17_spill] sm:$0xff] }
 0x33e   :  { %v2492_v11 = vadd.f32 %v2413_v4, %v2412_v31  ;;  %v2314_v54 = vmul.f32 %v2285_v34, %v5845_v60  ;;  %v2315_v63 = vmul.f32 %v2285_v34, %v5843_v17  ;;  %v5923_v27 = vadd.f32 %v2484_v5, %v6665_v61  ;;  %3323 = vst [vmem:[#allocation8 + $0x6] sm:$0x1] %v2484_v5  ;;  %v3999_v16 = vpop.eup %3998 }
 0x33f   :  { %v2081_v26 = vmul.f32 %v5918_v46, %v5918_v46  ;;  %v2080_v20 = vmul.f32 %v5920_v44, %v5920_v44  ;;  %v2488_v56 = vrot.slane %v2487_v23, 2  ;;  %4002 = vrsqrt.f32 %v2172_v40 }
 0x340   :  { %v2493_v60 = vrot.slane %v2492_v11, 4  ;;  %v2374_v57 = vmul.f32 %v3999_v16, %v2314_v54  ;;  %v2375_v17 = vmul.f32 %v3999_v16, %v2315_v63  ;;  %2608 = vmax.xlane.f32.xlu0 %v5923_v27  ;;  %v2179_v7 = vadd.f32 %v2178_v42, %v2177_v36  ;;  %v6667_v54 = vld [vmem:[#allocation18_spill] sm:$0xff] }
 0x341   :  { %v2180_v39 = vadd.f32 %v2081_v26, %v2080_v20  ;;  %v2489_v29 = vadd.f32 %v2488_v56, %v2487_v23  ;;  %v5947_v26 = vld [vmem:[#allocation7 + $0xa0] sm:$0xff] }
 0x342   :  { %v2414_v14 = vmul.f32 %v4274_v51, %v2374_v57  ;;  %v2415_v25 = vmul.f32 %v4275_v15, %v2375_v17  ;;  %v2494_v9 = vadd.f32 %v2493_v60, %v2492_v11  ;;  %v2247_v32 = vadd.f32 1.0, %v2179_v7 }
 0x343   :  { %v2181_v12 = vrot.slane %v2180_v39, 4  ;;  %v2490_v10 = vrot.slane %v2489_v29, 1 }
 0x344   :  { %v2499_v0 = vadd.f32 %v2415_v25, %v2414_v14  ;;  %v5930_v24 = vpop.xlane.xlu1 %2030  ;;  %v5932_v55 = vpop.xlane.xlu0 %2028  ;;  %v2495_v3 = vrot.slane %v2494_v9, 2  ;;  %4004 = vrcp.f32 %v2247_v32 }
 0x345   :  { %v2182_v38 = vadd.f32 %v2181_v12, %v2180_v39  ;;  %v2083_v6 = vmul.f32 %v5930_v24, %v5930_v24  ;;  %v2082_v30 = vmul.f32 %v5932_v55, %v5932_v55  ;;  %v2491_v19 = vadd.f32 %v2490_v10, %v2489_v29 }
 0x346   :  { %v2500_v49 = vrot.slane %v2499_v0, 4  ;;  %v2496_v28 = vadd.f32 %v2495_v3, %v2494_v9  ;;  %4006 = vrsqrt.f32 %v2179_v7 }
 0x347   :  { %v4001_v41 = vpop.eup %4000  ;;  %v2183_v53 = vrot.slane %v2182_v38, 2  ;;  %v2187_v21 = vadd.f32 %v2083_v6, %v2082_v30  ;;  %v5939_v50 = vadd.f32 %v2491_v19, %v6666_v48  ;;  %3324 = vst [vmem:[#allocation8 + $0x7] sm:$0x1] %v2491_v19 }
 0x348   :  { %v2286_v59 = vmul.f32 %v4001_v41, %v2172_v40  ;;  %v2497_v43 = vrot.slane %v2496_v28, 1  ;;  %v2501_v37 = vadd.f32 %v2500_v49, %v2499_v0 }
 0x349   :  { %v2184_v1 = vadd.f32 %v2183_v53, %v2182_v38  ;;  %v2188_v35 = vrot.slane %v2187_v21, 4  ;;  %2610 = vmax.xlane.f32.xlu1 %v5939_v50  ;;  %v4003_v5 = vpop.eup %4002  ;;  %v6668_v38 = vld [vmem:[#allocation19_spill] sm:$0xff] }
 0x34a   :  { %v2316_v8 = vmul.f32 %v2286_v59, %v5873_v2  ;;  %v2317_v31 = vmul.f32 %v2286_v59, %v5871_v58  ;;  %v2498_v4 = vadd.f32 %v2497_v43, %v2496_v28  ;;  %v2502_v34 = vrot.slane %v2501_v37, 2  ;;  %v5950_v2 = vld [vmem:[#allocation7 + $0xa8] sm:$0xff]  ;;  %v5971_v53 = vld [vmem:[#allocation7 + $0xb8] sm:$0xff] }
 0x34b   :  { %v2185_v36 = vrot.slane %v2184_v1, 1  ;;  %v2189_v40 = vadd.f32 %v2188_v35, %v2187_v21 }
 0x34c   :  { %v2376_v23 = vmul.f32 %v4003_v5, %v2316_v8  ;;  %v2377_v11 = vmul.f32 %v4003_v5, %v2317_v31  ;;  %v5945_v63 = vadd.f32 %v2498_v4, %v6667_v54  ;;  %3325 = vst [vmem:[#allocation8 + $0x8] sm:$0x1] %v2498_v4  ;;  %v2503_v61 = vadd.f32 %v2502_v34, %v2501_v37 }
 0x34d   :  { %v2186_v16 = vadd.f32 %v2185_v36, %v2184_v1  ;;  %v2190_v42 = vrot.slane %v2189_v40, 2 }
 0x34e   :  { %v2416_v58 = vmul.f32 %v5947_v26, %v2376_v23  ;;  %v2417_v20 = vmul.f32 %v5950_v2, %v2377_v11  ;;  %2612 = vmax.xlane.f32.xlu0 %v5945_v63  ;;  %v2504_v56 = vrot.slane %v2503_v61, 1  ;;  %v4005_v60 = vpop.eup %4004 }
 0x34f   :  { %v2248_v57 = vadd.f32 1.0, %v2186_v16  ;;  %v2191_v17 = vadd.f32 %v2190_v42, %v2189_v40  ;;  %v2287_v29 = vmul.f32 %v4005_v60, %v2179_v7 }
 0x350   :  { %v2506_v39 = vadd.f32 %v2417_v20, %v2416_v58  ;;  %v2505_v51 = vadd.f32 %v2504_v56, %v2503_v61  ;;  %v5954_v15 = vpop.xlane.xlu1 %2034  ;;  %v5956_v25 = vpop.xlane.xlu0 %2032 }
 0x351   :  { %4008 = vrcp.f32 %v2248_v57  ;;  %v2192_v14 = vrot.slane %v2191_v17, 1  ;;  %v2318_v32 = vmul.f32 %v2287_v29, %v5896_v62  ;;  %v2319_v12 = vmul.f32 %v2287_v29, %v5894_v52  ;;  %v4007_v0 = vpop.eup %4006  ;;  %v5968_v52 = vld [vmem:[#allocation7 + $0xb0] sm:$0xff]  ;;  %v6669_v57 = vld [vmem:[#allocation20_spill] sm:$0xff] }
 0x352   :  { %v2507_v9 = vrot.slane %v2506_v39, 4  ;;  %v2085_v10 = vmul.f32 %v5954_v15, %v5954_v15  ;;  %3326 = vst [vmem:[#allocation8 + $0x9] sm:$0x1] %v2505_v51  ;;  %v2084_v7 = vmul.f32 %v5956_v25, %v5956_v25  ;;  %v5965_v6 = vadd.f32 %v2505_v51, %v6668_v38 }
 0x353   :  { %v2193_v3 = vadd.f32 %v2192_v14, %v2191_v17  ;;  %v2378_v30 = vmul.f32 %v4007_v0, %v2318_v32  ;;  %v2379_v49 = vmul.f32 %v4007_v0, %v2319_v12  ;;  %4010 = vrsqrt.f32 %v2186_v16  ;;  %v5988_v0 = vld [vmem:[#allocation7 + $0xc0] sm:$0xff] }
 0x354   :  { %v2508_v19 = vadd.f32 %v2507_v9, %v2506_v39  ;;  %v2194_v62 = vadd.f32 %v2085_v10, %v2084_v7  ;;  %2614 = vmax.xlane.f32.xlu1 %v5965_v6 }
 0x355   :  { %v2249_v28 = vadd.f32 1.0, %v2193_v3  ;;  %v2418_v41 = vmul.f32 %v5968_v52, %v2378_v30  ;;  %v2419_v21 = vmul.f32 %v5971_v53, %v2379_v49 }
 0x356   :  { %v2509_v59 = vrot.slane %v2508_v19, 2  ;;  %v2195_v48 = vrot.slane %v2194_v62, 4 }
 0x357   :  { %4012 = vrcp.f32 %v2249_v28  ;;  %v5974_v43 = vpop.xlane.xlu1 %2038  ;;  %v5976_v37 = vpop.xlane.xlu0 %2036  ;;  %v2513_v1 = vadd.f32 %v2419_v21, %v2418_v41 }
 0x358   :  { %v2087_v35 = vmul.f32 %v5974_v43, %v5974_v43  ;;  %v2086_v8 = vmul.f32 %v5976_v37, %v5976_v37  ;;  %v2510_v31 = vadd.f32 %v2509_v59, %v2508_v19  ;;  %v2196_v4 = vadd.f32 %v2195_v48, %v2194_v62 }
 0x359   :  { %v2514_v34 = vrot.slane %v2513_v1, 4  ;;  %4014 = vrsqrt.f32 %v2193_v3 }
 0x35a   :  { %v2201_v5 = vadd.f32 %v2087_v35, %v2086_v8  ;;  %v2511_v36 = vrot.slane %v2510_v31, 1  ;;  %v2197_v23 = vrot.slane %v2196_v4, 2 }
 0x35b   :  { %v4009_v40 = vpop.eup %4008  ;;  %v2515_v11 = vadd.f32 %v2514_v34, %v2513_v1 }
 0x35c   :  { %v2288_v54 = vmul.f32 %v4009_v40, %v2186_v16  ;;  %v2202_v61 = vrot.slane %v2201_v5, 4  ;;  %v2512_v42 = vadd.f32 %v2511_v36, %v2510_v31  ;;  %v2198_v58 = vadd.f32 %v2197_v23, %v2196_v4  ;;  %v6007_v23 = vld [vmem:[#allocation7 + $0xd0] sm:$0xff] }
 0x35d   :  { %v4011_v39 = vpop.eup %4010  ;;  %v2516_v51 = vrot.slane %v2515_v11, 2 }
 0x35e   :  { %v2320_v20 = vmul.f32 %v2288_v54, %v5920_v44  ;;  %v2321_v56 = vmul.f32 %v2288_v54, %v5918_v46  ;;  %v2203_v60 = vadd.f32 %v2202_v61, %v2201_v5  ;;  %v5985_v17 = vadd.f32 %v2512_v42, %v6669_v57  ;;  %3327 = vst [vmem:[#allocation8 + $0xa] sm:$0x1] %v2512_v42  ;;  %v5991_v44 = vld [vmem:[#allocation7 + $0xc8] sm:$0xff]  ;;  %v6010_v54 = vld [vmem:[#allocation7 + $0xd8] sm:$0xff] }
 0x35f   :  { %v2199_v29 = vrot.slane %v2198_v58, 1  ;;  %v2517_v10 = vadd.f32 %v2516_v51, %v2515_v11 }
 0x360   :  { %v2380_v14 = vmul.f32 %v4011_v39, %v2320_v20  ;;  %v2381_v9 = vmul.f32 %v4011_v39, %v2321_v56  ;;  %v2204_v32 = vrot.slane %v2203_v60, 2  ;;  %2616 = vmax.xlane.f32.xlu0 %v5985_v17 }
 0x361   :  { %v4013_v16 = vpop.eup %4012  ;;  %v2200_v12 = vadd.f32 %v2199_v29, %v2198_v58  ;;  %v2518_v19 = vrot.slane %v2517_v10, 1 }
 0x362   :  { %v2420_v46 = vmul.f32 %v5988_v0, %v2380_v14  ;;  %v2421_v7 = vmul.f32 %v5991_v44, %v2381_v9  ;;  %v2289_v38 = vmul.f32 %v4013_v16, %v2193_v3  ;;  %v2205_v30 = vadd.f32 %v2204_v32, %v2203_v60 }
 0x363   :  { %v2250_v49 = vadd.f32 1.0, %v2200_v12  ;;  %v4015_v1 = vpop.eup %4014  ;;  %v2519_v8 = vadd.f32 %v2518_v19, %v2517_v10 }
 0x364   :  { %v2520_v28 = vadd.f32 %v2421_v7, %v2420_v46  ;;  %v2322_v62 = vmul.f32 %v2289_v38, %v5932_v55  ;;  %v2323_v41 = vmul.f32 %v2289_v38, %v5930_v24  ;;  %v2206_v21 = vrot.slane %v2205_v30, 1  ;;  %v5996_v59 = vpop.xlane.xlu1 %2042  ;;  %v5998_v48 = vpop.xlane.xlu0 %2040  ;;  %v6670_v24 = vld [vmem:[#allocation21_spill] sm:$0xff] }
 0x365   :  { %4016 = vrcp.f32 %v2250_v49  ;;  %v2089_v35 = vmul.f32 %v5996_v59, %v5996_v59  ;;  %v2088_v3 = vmul.f32 %v5998_v48, %v5998_v48  ;;  %v6005_v36 = vadd.f32 %v2519_v8, %v6670_v24  ;;  %3328 = vst [vmem:[#allocation8 + $0xb] sm:$0x1] %v2519_v8 }
 0x366   :  { %v2521_v31 = vrot.slane %v2520_v28, 4  ;;  %v2382_v4 = vmul.f32 %v4015_v1, %v2322_v62  ;;  %v2383_v34 = vmul.f32 %v4015_v1, %v2323_v41  ;;  %v2207_v55 = vadd.f32 %v2206_v21, %v2205_v30 }
 0x367   :  { %v2208_v5 = vadd.f32 %v2089_v35, %v2088_v3  ;;  %4018 = vrsqrt.f32 %v2200_v12  ;;  %2618 = vmax.xlane.f32.xlu1 %v6005_v36  ;;  %v6671_v35 = vld [vmem:[#allocation22_spill] sm:$0xff] }
 0x368   :  { %v2522_v40 = vadd.f32 %v2521_v31, %v2520_v28  ;;  %v2422_v11 = vmul.f32 %v6007_v23, %v2382_v4  ;;  %v2423_v61 = vmul.f32 %v6010_v54, %v2383_v34  ;;  %v2251_v42 = vadd.f32 1.0, %v2207_v55 }
 0x369   :  { %v2209_v58 = vrot.slane %v2208_v5, 4 }
 0x36a   :  { %v2527_v20 = vadd.f32 %v2423_v61, %v2422_v11  ;;  %4020 = vrcp.f32 %v2251_v42  ;;  %v2523_v56 = vrot.slane %v2522_v40, 2  ;;  %v6014_v57 = vpop.xlane.xlu1 %2046  ;;  %v6016_v39 = vpop.xlane.xlu0 %2044  ;;  %v6031_v42 = vld [vmem:[#allocation7 + $0xe8] sm:$0xff] }
 0x36b   :  { %v2210_v60 = vadd.f32 %v2209_v58, %v2208_v5  ;;  %v2091_v51 = vmul.f32 %v6014_v57, %v6014_v57  ;;  %v2090_v14 = vmul.f32 %v6016_v39, %v6016_v39  ;;  %4022 = vrsqrt.f32 %v2207_v55 }
 0x36c   :  { %v2528_v29 = vrot.slane %v2527_v20, 4  ;;  %v2524_v9 = vadd.f32 %v2523_v56, %v2522_v40 }
 0x36d   :  { %v2211_v32 = vrot.slane %v2210_v60, 2  ;;  %v2215_v10 = vadd.f32 %v2091_v51, %v2090_v14 }
 0x36e   :  { %v2529_v16 = vadd.f32 %v2528_v29, %v2527_v20  ;;  %v2525_v46 = vrot.slane %v2524_v9, 1 }
 0x36f   :  { %v4017_v7 = vpop.eup %4016  ;;  %v2212_v38 = vadd.f32 %v2211_v32, %v2210_v60  ;;  %v2216_v49 = vrot.slane %v2215_v10, 4 }
 0x370   :  { %v2290_v30 = vmul.f32 %v4017_v7, %v2200_v12  ;;  %v2526_v19 = vadd.f32 %v2525_v46, %v2524_v9  ;;  %v2530_v28 = vrot.slane %v2529_v16, 2 }
 0x371   :  { %v2213_v62 = vrot.slane %v2212_v38, 1  ;;  %v2217_v1 = vadd.f32 %v2216_v49, %v2215_v10  ;;  %v4019_v8 = vpop.eup %4018 }
 0x372   :  { %v2324_v41 = vmul.f32 %v2290_v30, %v5956_v25  ;;  %v2325_v21 = vmul.f32 %v2290_v30, %v5954_v15  ;;  %v6025_v3 = vadd.f32 %v2526_v19, %v6671_v35  ;;  %3329 = vst [vmem:[#allocation8 + $0xc] sm:$0x1] %v2526_v19  ;;  %v2531_v4 = vadd.f32 %v2530_v28, %v2529_v16  ;;  %v6028_v25 = vld [vmem:[#allocation7 + $0xe0] sm:$0xff]  ;;  %v6047_v19 = vld [vmem:[#allocation7 + $0xf0] sm:$0xff] }
 0x373   :  { %v2214_v31 = vadd.f32 %v2213_v62, %v2212_v38  ;;  %v2218_v12 = vrot.slane %v2217_v1, 2  ;;  %v6050_v62 = vld [vmem:[#allocation7 + $0xf8] sm:$0xff] }
 0x374   :  { %v4021_v34 = vpop.eup %4020  ;;  %v2384_v5 = vmul.f32 %v4019_v8, %v2324_v41  ;;  %v2385_v24 = vmul.f32 %v4019_v8, %v2325_v21  ;;  %2620 = vmax.xlane.f32.xlu0 %v6025_v3  ;;  %v2532_v61 = vrot.slane %v2531_v4, 1 }
 0x375   :  { %v2291_v40 = vmul.f32 %v4021_v34, %v2207_v55  ;;  %v2252_v11 = vadd.f32 1.0, %v2214_v31  ;;  %v2219_v20 = vadd.f32 %v2218_v12, %v2217_v1  ;;  %v4023_v14 = vpop.eup %4022 }
 0x376   :  { %v2424_v15 = vmul.f32 %v6028_v25, %v2384_v5  ;;  %v2425_v58 = vmul.f32 %v6031_v42, %v2385_v24  ;;  %v6036_v29 = vpop.xlane.xlu1 %2050  ;;  %v6038_v51 = vpop.xlane.xlu0 %2048  ;;  %v2533_v55 = vadd.f32 %v2532_v61, %v2531_v4 }
 0x377   :  { %v2326_v56 = vmul.f32 %v2291_v40, %v5976_v37  ;;  %v2327_v60 = vmul.f32 %v2291_v40, %v5974_v43  ;;  %4024 = vrcp.f32 %v2252_v11  ;;  %v2220_v32 = vrot.slane %v2219_v20, 1  ;;  %v6672_v37 = vld [vmem:[#allocation23_spill] sm:$0xff] }
 0x378   :  { %v2534_v9 = vadd.f32 %v2425_v58, %v2424_v15  ;;  %v2093_v16 = vmul.f32 %v6036_v29, %v6036_v29  ;;  %v2092_v10 = vmul.f32 %v6038_v51, %v6038_v51  ;;  %v6045_v38 = vadd.f32 %v2533_v55, %v6672_v37  ;;  %3330 = vst [vmem:[#allocation8 + $0xd] sm:$0x1] %v2533_v55 }
 0x379   :  { %v2386_v46 = vmul.f32 %v4023_v14, %v2326_v56  ;;  %v2387_v7 = vmul.f32 %v4023_v14, %v2327_v60  ;;  %v2221_v30 = vadd.f32 %v2220_v32, %v2219_v20  ;;  %4026 = vrsqrt.f32 %v2214_v31 }
 0x37a   :  { %v2535_v43 = vrot.slane %v2534_v9, 4  ;;  %v2222_v49 = vadd.f32 %v2093_v16, %v2092_v10  ;;  %2622 = vmax.xlane.f32.xlu1 %v6045_v38 }
 0x37b   :  { %v2426_v28 = vmul.f32 %v6047_v19, %v2386_v46  ;;  %v2427_v41 = vmul.f32 %v6050_v62, %v2387_v7  ;;  %v2253_v1 = vadd.f32 1.0, %v2221_v30 }
 0x37c   :  { %v2536_v21 = vadd.f32 %v2535_v43, %v2534_v9  ;;  %v2223_v35 = vrot.slane %v2222_v49, 4 }
 0x37d   :  { %v6054_v8 = vpop.xlane.xlu1 %2054  ;;  %v6056_v4 = vpop.xlane.xlu0 %2052  ;;  %v2541_v34 = vadd.f32 %v2427_v41, %v2426_v28  ;;  %4028 = vrcp.f32 %v2253_v1 }
 0x37e   :  { %v2095_v5 = vmul.f32 %v6054_v8, %v6054_v8  ;;  %v2094_v24 = vmul.f32 %v6056_v4, %v6056_v4  ;;  %v2224_v12 = vadd.f32 %v2223_v35, %v2222_v49  ;;  %v2537_v40 = vrot.slane %v2536_v21, 2  ;;  %v6673_v35 = vld [vmem:[#allocation24_spill] sm:$0xff] }
 0x37f   :  { %v2542_v11 = vrot.slane %v2541_v34, 4  ;;  %4030 = vrsqrt.f32 %v2221_v30 }
 0x380   :  { %v2229_v61 = vadd.f32 %v2095_v5, %v2094_v24  ;;  %v2225_v15 = vrot.slane %v2224_v12, 2  ;;  %v2538_v58 = vadd.f32 %v2537_v40, %v2536_v21 }
 0x381   :  { %v4025_v20 = vpop.eup %4024  ;;  %v2543_v56 = vadd.f32 %v2542_v11, %v2541_v34 }
 0x382   :  { %v2230_v60 = vrot.slane %v2229_v61, 4  ;;  %v2292_v55 = vmul.f32 %v4025_v20, %v2214_v31  ;;  %v2226_v14 = vadd.f32 %v2225_v15, %v2224_v12  ;;  %v2539_v9 = vrot.slane %v2538_v58, 1  ;;  %v6067_v12 = vld [vmem:[#allocation7 + $0x100] sm:$0xff] }
 0x383   :  { %v2544_v16 = vrot.slane %v2543_v56, 2  ;;  %v4027_v43 = vpop.eup %4026 }
 0x384   :  { %v2231_v32 = vadd.f32 %v2230_v60, %v2229_v61  ;;  %v2328_v10 = vmul.f32 %v2292_v55, %v5998_v48  ;;  %v2329_v46 = vmul.f32 %v2292_v55, %v5996_v59  ;;  %v2227_v7 = vrot.slane %v2226_v14, 1  ;;  %v6070_v59 = vld [vmem:[#allocation7 + $0x108] sm:$0xff] }
 0x385   :  { %v2540_v37 = vadd.f32 %v2539_v9, %v2538_v58  ;;  %v2545_v28 = vadd.f32 %v2544_v16, %v2543_v56 }
 0x386   :  { %v2232_v49 = vrot.slane %v2231_v32, 2  ;;  %v2388_v41 = vmul.f32 %v4027_v43, %v2328_v10  ;;  %v2389_v21 = vmul.f32 %v4027_v43, %v2329_v46  ;;  %v2228_v1 = vadd.f32 %v2227_v7, %v2226_v14  ;;  %v6674_v14 = vld [vmem:[#allocation25_spill] sm:$0xff]  ;;  %v6083_v43 = vld [vmem:[#allocation7 + $0x118] sm:$0xff] }
 0x387   :  { %v6065_v34 = vadd.f32 %v2540_v37, %v6673_v35  ;;  %3331 = vst [vmem:[#allocation8 + $0xe] sm:$0x1] %v2540_v37  ;;  %v2546_v5 = vrot.slane %v2545_v28, 1  ;;  %v4029_v24 = vpop.eup %4028  ;;  %v6080_v37 = vld [vmem:[#allocation7 + $0x110] sm:$0xff] }
 0x388   :  { %v2233_v31 = vadd.f32 %v2232_v49, %v2231_v32  ;;  %v2428_v48 = vmul.f32 %v6067_v12, %v2388_v41  ;;  %v2429_v40 = vmul.f32 %v6070_v59, %v2389_v21  ;;  %v2254_v11 = vadd.f32 1.0, %v2228_v1 }
 0x389   :  { %2624 = vmax.xlane.f32.xlu0 %v6065_v34  ;;  %v2293_v61 = vmul.f32 %v4029_v24, %v2221_v30  ;;  %v2547_v58 = vadd.f32 %v2546_v5, %v2545_v28  ;;  %v4031_v32 = vpop.eup %4030 }
 0x38a   :  { %v2234_v15 = vrot.slane %v2233_v31, 1  ;;  %v2548_v20 = vadd.f32 %v2429_v40, %v2428_v48  ;;  %4032 = vrcp.f32 %v2254_v11 }
 0x38b   :  { %v2330_v56 = vmul.f32 %v2293_v61, %v6016_v39  ;;  %v2331_v60 = vmul.f32 %v2293_v61, %v6014_v57  ;;  %v6077_v9 = vadd.f32 %v2547_v58, %v6674_v14  ;;  %3332 = vst [vmem:[#allocation8 + $0xf] sm:$0x1] %v2547_v58  ;;  %4034 = vrsqrt.f32 %v2228_v1  ;;  %v6675_v58 = vld [vmem:[#allocation26_spill] sm:$0xff] }
 0x38c   :  { %v2235_v55 = vadd.f32 %v2234_v15, %v2233_v31  ;;  %v2549_v16 = vrot.slane %v2548_v20, 4 }
 0x38d   :  { %v2390_v10 = vmul.f32 %v4031_v32, %v2330_v56  ;;  %v2391_v46 = vmul.f32 %v4031_v32, %v2331_v60  ;;  %2626 = vmax.xlane.f32.xlu1 %v6077_v9 }
 0x38e   :  { %v2255_v7 = vadd.f32 1.0, %v2235_v55  ;;  %v2550_v30 = vadd.f32 %v2549_v16, %v2548_v20 }
 0x38f   :  { %v2430_v39 = vmul.f32 %v6080_v37, %v2390_v10  ;;  %v2431_v57 = vmul.f32 %v6083_v43, %v2391_v46  ;;  %v6092_v10 = vld [vmem:[#allocation7 + $0x120] sm:$0xff] }
 0x390   :  { %4036 = vrcp.f32 %v2255_v7  ;;  %v2551_v49 = vrot.slane %v2550_v30, 2 }
 0x391   :  { %v2555_v28 = vadd.f32 %v2431_v57, %v2430_v39  ;;  %4038 = vrsqrt.f32 %v2235_v55 }
 0x392   :  { %v2552_v41 = vadd.f32 %v2551_v49, %v2550_v30 }
 0x393   :  { %v2556_v21 = vrot.slane %v2555_v28, 4 }
 0x394   :  { %v4033_v35 = vpop.eup %4032  ;;  %v2553_v31 = vrot.slane %v2552_v41, 1 }
 0x395   :  { %v2557_v5 = vadd.f32 %v2556_v21, %v2555_v28  ;;  %v2294_v24 = vmul.f32 %v4033_v35, %v2228_v1  ;;  %v4035_v15 = vpop.eup %4034  ;;  %v6676_v21 = vld [vmem:[#allocation27_spill] sm:$0xff] }
 0x396   :  { %v2554_v48 = vadd.f32 %v2553_v31, %v2552_v41  ;;  %v6103_v31 = vld [vmem:[#allocation7 + $0x130] sm:$0xff] }
 0x397   :  { %v2332_v40 = vmul.f32 %v2294_v24, %v6038_v51  ;;  %v2333_v11 = vmul.f32 %v2294_v24, %v6036_v29  ;;  %v2558_v61 = vrot.slane %v2557_v5, 2  ;;  %v6095_v51 = vld [vmem:[#allocation7 + $0x128] sm:$0xff]  ;;  %v6106_v24 = vld [vmem:[#allocation7 + $0x138] sm:$0xff] }
 0x398   :  { %v6089_v20 = vadd.f32 %v2554_v48, %v6675_v58  ;;  %3333 = vst [vmem:[#allocation8 + $0x10] sm:$0x1] %v2554_v48 }
 0x399   :  { %v2392_v60 = vmul.f32 %v4035_v15, %v2332_v40  ;;  %v2393_v14 = vmul.f32 %v4035_v15, %v2333_v11  ;;  %v2559_v32 = vadd.f32 %v2558_v61, %v2557_v5 }
 0x39a   :  { %v4037_v56 = vpop.eup %4036  ;;  %2628 = vmax.xlane.f32.xlu0 %v6089_v20 }
 0x39b   :  { %v2295_v16 = vmul.f32 %v4037_v56, %v2235_v55  ;;  %v2432_v1 = vmul.f32 %v6092_v10, %v2392_v60  ;;  %v2433_v29 = vmul.f32 %v6095_v51, %v2393_v14  ;;  %v2560_v46 = vrot.slane %v2559_v32, 1  ;;  %v4039_v39 = vpop.eup %4038 }
 0x39d   :  { %v2334_v7 = vmul.f32 %v2295_v16, %v6056_v4  ;;  %v2335_v30 = vmul.f32 %v2295_v16, %v6054_v8  ;;  %v2562_v57 = vadd.f32 %v2433_v29, %v2432_v1  ;;  %v2561_v49 = vadd.f32 %v2560_v46, %v2559_v32  ;;  %v6677_v32 = vld [vmem:[#allocation28_spill] sm:$0xff] }
 0x39f   :  { %v2394_v28 = vmul.f32 %v4039_v39, %v2334_v7  ;;  %v2395_v55 = vmul.f32 %v4039_v39, %v2335_v30  ;;  %v2563_v41 = vrot.slane %v2562_v57, 4  ;;  %v6101_v35 = vadd.f32 %v2561_v49, %v6676_v21  ;;  %3334 = vst [vmem:[#allocation8 + $0x11] sm:$0x1] %v2561_v49  ;;  %v6678_v30 = vld [vmem:[#allocation29_spill] sm:$0xff] }
 0x3a1   :  { %v2434_v5 = vmul.f32 %v6103_v31, %v2394_v28  ;;  %v2435_v4 = vmul.f32 %v6106_v24, %v2395_v55  ;;  %v2564_v48 = vadd.f32 %v2563_v41, %v2562_v57  ;;  %2630 = vmax.xlane.f32.xlu1 %v6101_v35 }
 0x3a3   :  { %v2569_v8 = vadd.f32 %v2435_v4, %v2434_v5  ;;  %v2565_v40 = vrot.slane %v2564_v48, 2 }
 0x3a5   :  { %v2570_v11 = vrot.slane %v2569_v8, 4  ;;  %v2566_v61 = vadd.f32 %v2565_v40, %v2564_v48 }
 0x3a7   :  { %v2571_v15 = vadd.f32 %v2570_v11, %v2569_v8  ;;  %v2567_v58 = vrot.slane %v2566_v61, 1 }
 0x3a9   :  { %v2572_v56 = vrot.slane %v2571_v15, 2  ;;  %v2568_v60 = vadd.f32 %v2567_v58, %v2566_v61 }
 0x3ab   :  { %v2573_v14 = vadd.f32 %v2572_v56, %v2571_v15  ;;  %v6111_v16 = vadd.f32 %v2568_v60, %v6677_v32  ;;  %3335 = vst [vmem:[#allocation8 + $0x12] sm:$0x1] %v2568_v60 }
 0x3ad   :  { %v2574_v1 = vrot.slane %v2573_v14, 1  ;;  %2632 = vmax.xlane.f32.xlu0 %v6111_v16 }
 0x3ae   :  { %v2597_v46 = vpop.xlane.xlu0 %2596 }
 0x3af   :  { %v2575_v29 = vadd.f32 %v2574_v1, %v2573_v14  ;;  %v2636_v7 = vsub.f32 %v5852_v22, %v2597_v46 }
 0x3b1   :  { %v6116_v39 = vadd.f32 %v2575_v29, %v6678_v30  ;;  %3336 = vst [vmem:[#allocation8 + $0x13] sm:$0x1] %v2575_v29  ;;  %v2656_v57 = vmul.f32 1.442695, %v2636_v7 }
 0x3b3   :  { %2634 = vmax.xlane.f32.xlu1 %v6116_v39  ;;  %4040 = vpow2.f32 %v2656_v57 }
 0x3b5   :  { %v2599_v49 = vpop.xlane.xlu1 %2598 }
 0x3b6   :  { %v2637_v28 = vsub.f32 %v5861_v45, %v2599_v49 }
 0x3b8   :  { %v2658_v55 = vmul.f32 1.442695, %v2637_v28 }
 0x3ba   :  { %4042 = vpow2.f32 %v2658_v55 }
 0x3bb   :  { %v2601_v41 = vpop.xlane.xlu0 %2600  ;;  %v2603_v21 = vpop.xlane.xlu1 %2602 }
 0x3bc   :  { %v2638_v5 = vsub.f32 %v5880_v13, %v2601_v41  ;;  %v2639_v4 = vsub.f32 %v5883_v47, %v2603_v21 }
 0x3bd   :  { %v6122_v22 = vpop.eup %4040 }
 0x3be   :  { %v2660_v48 = vmul.f32 1.442695, %v2638_v5  ;;  %v2662_v8 = vmul.f32 1.442695, %v2639_v4  ;;  %2696 = vadd.xlane.f32.xlu0 %v6122_v22 }
 0x3bf   :  { %v2605_v40 = vpop.xlane.xlu0 %2604 }
 0x3c0   :  { %4044 = vpow2.f32 %v2660_v48  ;;  %v2640_v11 = vsub.f32 %v5891_v33, %v2605_v40 }
 0x3c1   :  { %4046 = vpow2.f32 %v2662_v8 }
 0x3c2   :  { %v2664_v45 = vmul.f32 1.442695, %v2640_v11 }
 0x3c3   :  { %v2607_v15 = vpop.xlane.xlu1 %2606 }
 0x3c4   :  { %v6126_v61 = vpop.eup %4042  ;;  %4048 = vpow2.f32 %v2664_v45  ;;  %v2641_v13 = vsub.f32 %v5906_v18, %v2607_v15 }
 0x3c5   :  { %2698 = vadd.xlane.f32.xlu1 %v6126_v61 }
 0x3c6   :  { %v2666_v47 = vmul.f32 1.442695, %v2641_v13 }
 0x3c8   :  { %4050 = vpow2.f32 %v2666_v47 }
 0x3ca   :  { %v6130_v58 = vpop.eup %4044 }
 0x3cb   :  { %v6132_v56 = vpop.eup %4046  ;;  %2700 = vadd.xlane.f32.xlu0 %v6130_v58 }
 0x3cc   :  { %2702 = vadd.xlane.f32.xlu1 %v6132_v56 }
 0x3cd   :  { %v2609_v33 = vpop.xlane.xlu0 %2608 }
 0x3ce   :  { %v6136_v60 = vpop.eup %4048  ;;  %v2642_v14 = vsub.f32 %v5923_v27, %v2609_v33 }
 0x3cf   :  { %2704 = vadd.xlane.f32.xlu0 %v6136_v60 }
 0x3d0   :  { %v2668_v18 = vmul.f32 1.442695, %v2642_v14 }
 0x3d2   :  { %4052 = vpow2.f32 %v2668_v18  ;;  %v6140_v32 = vpop.eup %4050 }
 0x3d3   :  { %2706 = vadd.xlane.f32.xlu1 %v6140_v32 }
 0x3d6   :  { %v2611_v1 = vpop.xlane.xlu1 %2610 }
 0x3d7   :  { %v2643_v29 = vsub.f32 %v5939_v50, %v2611_v1 }
 0x3d9   :  { %v2670_v46 = vmul.f32 1.442695, %v2643_v29 }
 0x3db   :  { %v2613_v7 = vpop.xlane.xlu0 %2612  ;;  %4054 = vpow2.f32 %v2670_v46 }
 0x3dc   :  { %v6144_v30 = vpop.eup %4052  ;;  %v2644_v57 = vsub.f32 %v5945_v63, %v2613_v7 }
 0x3dd   :  { %2708 = vadd.xlane.f32.xlu0 %v6144_v30 }
 0x3de   :  { %v2672_v27 = vmul.f32 1.442695, %v2644_v57 }
 0x3e0   :  { %4056 = vpow2.f32 %v2672_v27 }
 0x3e1   :  { %v2615_v49 = vpop.xlane.xlu1 %2614 }
 0x3e2   :  { %v2645_v28 = vsub.f32 %v5965_v6, %v2615_v49 }
 0x3e4   :  { %v2674_v55 = vmul.f32 1.442695, %v2645_v28 }
 0x3e5   :  { %v6149_v41 = vpop.eup %4054 }
 0x3e6   :  { %4058 = vpow2.f32 %v2674_v55  ;;  %2710 = vadd.xlane.f32.xlu1 %v6149_v41 }
 0x3ea   :  { %v6152_v50 = vpop.eup %4056 }
 0x3eb   :  { %2712 = vadd.xlane.f32.xlu0 %v6152_v50 }
 0x3ed   :  { %v2617_v21 = vpop.xlane.xlu0 %2616 }
 0x3ee   :  { %v2646_v63 = vsub.f32 %v5985_v17, %v2617_v21 }
 0x3f0   :  { %v2676_v5 = vmul.f32 1.442695, %v2646_v63  ;;  %v6156_v4 = vpop.eup %4058 }
 0x3f1   :  { %2714 = vadd.xlane.f32.xlu1 %v6156_v4 }
 0x3f2   :  { %4060 = vpow2.f32 %v2676_v5 }
 0x3f4   :  { %v2619_v6 = vpop.xlane.xlu1 %2618 }
 0x3f5   :  { %v2647_v48 = vsub.f32 %v6005_v36, %v2619_v6 }
 0x3f7   :  { %v2678_v8 = vmul.f32 1.442695, %v2647_v48 }
 0x3f9   :  { %4062 = vpow2.f32 %v2678_v8 }
 0x3fc   :  { %v6160_v40 = vpop.eup %4060 }
 0x3fd   :  { %2716 = vadd.xlane.f32.xlu0 %v6160_v40 }
 0x401   :  { %v2621_v11 = vpop.xlane.xlu0 %2620 }
 0x402   :  { %v2648_v45 = vsub.f32 %v6025_v3, %v2621_v11 }
 0x403   :  { %v6164_v17 = vpop.eup %4062 }
 0x404   :  { %v2680_v15 = vmul.f32 1.442695, %v2648_v45  ;;  %2718 = vadd.xlane.f32.xlu1 %v6164_v17 }
 0x406   :  { %4064 = vpow2.f32 %v2680_v15 }
 0x407   :  { %v2623_v13 = vpop.xlane.xlu1 %2622 }
 0x408   :  { %v2649_v47 = vsub.f32 %v6045_v38, %v2623_v13 }
 0x40a   :  { %v2682_v33 = vmul.f32 1.442695, %v2649_v47 }
 0x40c   :  { %4066 = vpow2.f32 %v2682_v33 }
 0x410   :  { %v6168_v36 = vpop.eup %4064 }
 0x411   :  { %2720 = vadd.xlane.f32.xlu0 %v6168_v36 }
 0x416   :  { %v2625_v14 = vpop.xlane.xlu0 %2624  ;;  %v6172_v1 = vpop.eup %4066 }
 0x417   :  { %v2650_v18 = vsub.f32 %v6065_v34, %v2625_v14  ;;  %2722 = vadd.xlane.f32.xlu1 %v6172_v1  ;;  %v4296_v14 = vld [vmem:[#allocation7 + $0x8] sm:$0xff] }
 0x419   :  { %v2684_v3 = vmul.f32 1.442695, %v2650_v18 }
 0x41a   :  { %v2627_v29 = vpop.xlane.xlu1 %2626 }
 0x41b   :  { %4068 = vpow2.f32 %v2684_v3  ;;  %v2651_v46 = vsub.f32 %v6077_v9, %v2627_v29  ;;  %v4297_v3 = vld [vmem:[#allocation7] sm:$0xff] }
 0x41d   :  { %v2686_v7 = vmul.f32 1.442695, %v2651_v46 }
 0x41f   :  { %4070 = vpow2.f32 %v2686_v7 }
 0x425   :  { %v6176_v38 = vpop.eup %4068 }
 0x426   :  { %2724 = vadd.xlane.f32.xlu0 %v6176_v38 }
 0x427   :  { %v2629_v57 = vpop.xlane.xlu0 %2628 }
 0x428   :  { %v2652_v27 = vsub.f32 %v6089_v20, %v2629_v57 }
 0x429   :  { %v6180_v49 = vpop.eup %4070 }
 0x42a   :  { %v2688_v34 = vmul.f32 1.442695, %v2652_v27  ;;  %2726 = vadd.xlane.f32.xlu1 %v6180_v49  ;;  %v4298_v27 = vld [vmem:[#allocation7 + $0x18] sm:$0xff] }
 0x42c   :  { %4072 = vpow2.f32 %v2688_v34 }
 0x42e   :  { %v2631_v28 = vpop.xlane.xlu1 %2630 }
 0x42f   :  { %v2653_v55 = vsub.f32 %v6101_v35, %v2631_v28  ;;  %v4299_v28 = vld [vmem:[#allocation7 + $0x10] sm:$0xff] }
 0x431   :  { %v2690_v21 = vmul.f32 1.442695, %v2653_v55 }
 0x433   :  { %4074 = vpow2.f32 %v2690_v21 }
 0x436   :  { %v6184_v9 = vpop.eup %4072 }
 0x437   :  { %2728 = vadd.xlane.f32.xlu0 %v6184_v9 }
 0x43a   :  { %v2633_v63 = vpop.xlane.xlu0 %2632 }
 0x43b   :  { %v2654_v5 = vsub.f32 %v6111_v16, %v2633_v63 }
 0x43d   :  { %v6188_v6 = vpop.eup %4074  ;;  %v2692_v20 = vmul.f32 1.442695, %v2654_v5 }
 0x43e   :  { %2730 = vadd.xlane.f32.xlu1 %v6188_v6 }
 0x43f   :  { %4076 = vpow2.f32 %v2692_v20 }
 0x440   :  { %v2635_v48 = vpop.xlane.xlu1 %2634 }
 0x441   :  { %v2655_v8 = vsub.f32 %v6116_v39, %v2635_v48  ;;  %v4300_v48 = vld [vmem:[#allocation7 + $0x28] sm:$0xff] }
 0x443   :  { %v2694_v11 = vmul.f32 1.442695, %v2655_v8 }
 0x445   :  { %4078 = vpow2.f32 %v2694_v11  ;;  %v4301_v11 = vld [vmem:[#allocation7 + $0x20] sm:$0xff] }
 0x449   :  { %v6192_v35 = vpop.eup %4076 }
 0x44a   :  { %2732 = vadd.xlane.f32.xlu0 %v6192_v35 }
 0x44b   :  { %v2697_v45 = vpop.xlane.xlu0 %2696 }
 0x44c   :  { %4080 = vrcp.f32 %v2697_v45 }
 0x44f   :  { %v6195_v15 = vpop.eup %4078 }
 0x450   :  { %2734 = vadd.xlane.f32.xlu1 %v6195_v15 }
 0x452   :  { %v2699_v16 = vpop.xlane.xlu1 %2698 }
 0x453   :  { %4082 = vrcp.f32 %v2699_v16 }
 0x456   :  { %v4081_v13 = vpop.eup %4080 }
 0x457   :  { %v2756_v47 = vmul.f32 %v4081_v13, %v6122_v22 }
 0x458   :  { %v2701_v33 = vpop.xlane.xlu0 %2700 }
 0x459   :  { %4084 = vrcp.f32 %v2701_v33  ;;  %v2703_v39 = vpop.xlane.xlu1 %2702  ;;  %v2777_v18 = vmul.f32 %v4296_v14, %v2756_v47  ;;  %v2776_v29 = vmul.f32 %v4297_v3, %v2756_v47  ;;  %v4303_v47 = vld [vmem:[#allocation7 + $0x30] sm:$0xff]  ;;  %v4305_v3 = vld [vmem:[#allocation7 + $0x40] sm:$0xff] }
 0x45a   :  { %4086 = vrcp.f32 %v2703_v39 }
 0x45b   :  { %2818 = vadd.xlane.f32.xlu1 %v2777_v18  ;;  %2816 = vadd.xlane.f32.xlu0 %v2776_v29 }
 0x45c   :  { %v2705_v46 = vpop.xlane.xlu0 %2704 }
 0x45d   :  { %v4083_v7 = vpop.eup %4082  ;;  %4088 = vrcp.f32 %v2705_v46 }
 0x45e   :  { %v2757_v57 = vmul.f32 %v4083_v7, %v6126_v61  ;;  %v4302_v61 = vld [vmem:[#allocation7 + $0x38] sm:$0xff] }
 0x45f   :  { %v4306_v7 = vld [vmem:[#allocation7 + $0x58] sm:$0xff] }
 0x460   :  { %v2779_v34 = vmul.f32 %v4298_v27, %v2757_v57  ;;  %v2778_v55 = vmul.f32 %v4299_v28, %v2757_v57  ;;  %v2707_v22 = vpop.xlane.xlu1 %2706  ;;  %v4307_v27 = vld [vmem:[#allocation7 + $0x50] sm:$0xff] }
 0x461   :  { %4090 = vrcp.f32 %v2707_v22 }
 0x462   :  { %2822 = vadd.xlane.f32.xlu1 %v2779_v34  ;;  %2820 = vadd.xlane.f32.xlu0 %v2778_v55 }
 0x463   :  { %v4085_v21 = vpop.eup %4084 }
 0x464   :  { %v4087_v63 = vpop.eup %4086  ;;  %v2758_v5 = vmul.f32 %v4085_v21, %v6130_v58  ;;  %v4304_v58 = vld [vmem:[#allocation7 + $0x48] sm:$0xff] }
 0x465   :  { %v2759_v20 = vmul.f32 %v4087_v63, %v6132_v56  ;;  %v4308_v21 = vld [vmem:[#allocation7 + $0x68] sm:$0xff] }
 0x466   :  { %v2781_v8 = vmul.f32 %v4300_v48, %v2758_v5  ;;  %v2780_v45 = vmul.f32 %v4301_v11, %v2758_v5  ;;  %v4309_v5 = vld [vmem:[#allocation7 + $0x60] sm:$0xff]  ;;  %v4310_v11 = vld [vmem:[#allocation7 + $0x78] sm:$0xff] }
 0x467   :  { %v4089_v16 = vpop.eup %4088  ;;  %v2783_v13 = vmul.f32 %v4302_v61, %v2759_v20  ;;  %v2782_v33 = vmul.f32 %v4303_v47, %v2759_v20  ;;  %v4312_v47 = vld [vmem:[#allocation7 + $0x88] sm:$0xff] }
 0x468   :  { %2826 = vadd.xlane.f32.xlu1 %v2781_v8  ;;  %2824 = vadd.xlane.f32.xlu0 %v2780_v45  ;;  %v2760_v39 = vmul.f32 %v4089_v16, %v6136_v60  ;;  %v4311_v16 = vld [vmem:[#allocation7 + $0x70] sm:$0xff] }
 0x46a   :  { %v2709_v14 = vpop.xlane.xlu0 %2708  ;;  %v2785_v56 = vmul.f32 %v4304_v58, %v2760_v39  ;;  %v2784_v29 = vmul.f32 %v4305_v3, %v2760_v39  ;;  %v4313_v39 = vld [vmem:[#allocation7 + $0x80] sm:$0xff] }
 0x46b   :  { %4092 = vrcp.f32 %v2709_v14  ;;  %v4091_v18 = vpop.eup %4090 }
 0x46c   :  { %2830 = vadd.xlane.f32.xlu1 %v2783_v13  ;;  %2828 = vadd.xlane.f32.xlu0 %v2782_v33  ;;  %v2761_v46 = vmul.f32 %v4091_v18, %v6140_v32 }
 0x46e   :  { %v2787_v57 = vmul.f32 %v4306_v7, %v2761_v46  ;;  %v2786_v34 = vmul.f32 %v4307_v27, %v2761_v46 }
 0x470   :  { %2834 = vadd.xlane.f32.xlu1 %v2785_v56  ;;  %2832 = vadd.xlane.f32.xlu0 %v2784_v29  ;;  %v4314_v56 = vld [vmem:[#allocation7 + $0x98] sm:$0xff]  ;;  %v4315_v29 = vld [vmem:[#allocation7 + $0x90] sm:$0xff] }
 0x473   :  { %v2711_v28 = vpop.xlane.xlu1 %2710 }
 0x474   :  { %2838 = vadd.xlane.f32.xlu1 %v2787_v57  ;;  %2836 = vadd.xlane.f32.xlu0 %v2786_v34  ;;  %4094 = vrcp.f32 %v2711_v28 }
 0x475   :  { %v4093_v60 = vpop.eup %4092 }
 0x476   :  { %v2762_v55 = vmul.f32 %v4093_v60, %v6144_v30 }
 0x478   :  { %v2713_v22 = vpop.xlane.xlu0 %2712  ;;  %v2789_v63 = vmul.f32 %v4308_v21, %v2762_v55  ;;  %v2788_v20 = vmul.f32 %v4309_v5, %v2762_v55 }
 0x479   :  { %4096 = vrcp.f32 %v2713_v22 }
 0x47a   :  { %2842 = vadd.xlane.f32.xlu1 %v2789_v63  ;;  %2840 = vadd.xlane.f32.xlu0 %v2788_v20 }
 0x47e   :  { %v4095_v32 = vpop.eup %4094  ;;  %v2715_v48 = vpop.xlane.xlu1 %2714 }
 0x47f   :  { %4098 = vrcp.f32 %v2715_v48  ;;  %v2763_v8 = vmul.f32 %v4095_v32, %v6149_v41 }
 0x481   :  { %v2791_v45 = vmul.f32 %v4310_v11, %v2763_v8  ;;  %v2790_v61 = vmul.f32 %v4311_v16, %v2763_v8 }
 0x483   :  { %v4097_v13 = vpop.eup %4096  ;;  %2846 = vadd.xlane.f32.xlu1 %v2791_v45  ;;  %2844 = vadd.xlane.f32.xlu0 %v2790_v61 }
 0x484   :  { %v2764_v30 = vmul.f32 %v4097_v13, %v6152_v50 }
 0x486   :  { %v2793_v33 = vmul.f32 %v4312_v47, %v2764_v30  ;;  %v2792_v14 = vmul.f32 %v4313_v39, %v2764_v30 }
 0x488   :  { %2850 = vadd.xlane.f32.xlu1 %v2793_v33  ;;  %2848 = vadd.xlane.f32.xlu0 %v2792_v14 }
 0x489   :  { %v4099_v18 = vpop.eup %4098 }
 0x48a   :  { %v2717_v58 = vpop.xlane.xlu0 %2716  ;;  %v2765_v41 = vmul.f32 %v4099_v18, %v6156_v4 }
 0x48b   :  { %4100 = vrcp.f32 %v2717_v58 }
 0x48c   :  { %v2795_v3 = vmul.f32 %v4314_v56, %v2765_v41  ;;  %v2794_v46 = vmul.f32 %v4315_v29, %v2765_v41 }
 0x48e   :  { %2854 = vadd.xlane.f32.xlu1 %v2795_v3  ;;  %2852 = vadd.xlane.f32.xlu0 %v2794_v46 }
 0x491   :  { %v2719_v7 = vpop.xlane.xlu1 %2718 }
 0x492   :  { %4102 = vrcp.f32 %v2719_v7 }
 0x495   :  { %v4101_v50 = vpop.eup %4100 }
 0x496   :  { %v2766_v57 = vmul.f32 %v4101_v50, %v6160_v40 }
 0x498   :  { %v2797_v27 = vmul.f32 %v5950_v2, %v2766_v57  ;;  %v2796_v34 = vmul.f32 %v5947_v26, %v2766_v57 }
 0x49a   :  { %2858 = vadd.xlane.f32.xlu1 %v2797_v27  ;;  %2856 = vadd.xlane.f32.xlu0 %v2796_v34 }
 0x49c   :  { %v4103_v28 = vpop.eup %4102 }
 0x49d   :  { %v2767_v4 = vmul.f32 %v4103_v28, %v6164_v17 }
 0x49e   :  { %v2721_v60 = vpop.xlane.xlu0 %2720 }
 0x49f   :  { %4104 = vrcp.f32 %v2721_v60  ;;  %v2799_v55 = vmul.f32 %v5971_v53, %v2767_v4  ;;  %v2798_v22 = vmul.f32 %v5968_v52, %v2767_v4 }
 0x4a1   :  { %2862 = vadd.xlane.f32.xlu1 %v2799_v55  ;;  %2860 = vadd.xlane.f32.xlu0 %v2798_v22 }
 0x4a4   :  { %v2723_v21 = vpop.xlane.xlu1 %2722 }
 0x4a5   :  { %4106 = vrcp.f32 %v2723_v21 }
 0x4a9   :  { %v4105_v40 = vpop.eup %4104 }
 0x4aa   :  { %v2768_v2 = vmul.f32 %v4105_v40, %v6168_v36 }
 0x4ac   :  { %v2801_v26 = vmul.f32 %v5991_v44, %v2768_v2  ;;  %v2800_v63 = vmul.f32 %v5988_v0, %v2768_v2 }
 0x4ae   :  { %2866 = vadd.xlane.f32.xlu1 %v2801_v26  ;;  %2864 = vadd.xlane.f32.xlu0 %v2800_v63 }
 0x4af   :  { %v4107_v5 = vpop.eup %4106 }
 0x4b0   :  { %v2769_v17 = vmul.f32 %v4107_v5, %v6172_v1 }
 0x4b2   :  { %v2803_v52 = vmul.f32 %v6010_v54, %v2769_v17  ;;  %v2802_v53 = vmul.f32 %v6007_v23, %v2769_v17 }
 0x4b3   :  { %v2725_v20 = vpop.xlane.xlu0 %2724 }
 0x4b4   :  { %4108 = vrcp.f32 %v2725_v20  ;;  %2870 = vadd.xlane.f32.xlu1 %v2803_v52  ;;  %2868 = vadd.xlane.f32.xlu0 %v2802_v53 }
 0x4b7   :  { %v2727_v32 = vpop.xlane.xlu1 %2726 }
 0x4b8   :  { %4110 = vrcp.f32 %v2727_v32 }
 0x4be   :  { %v4109_v36 = vpop.eup %4108 }
 0x4bf   :  { %v2770_v44 = vmul.f32 %v4109_v36, %v6176_v38 }
 0x4c1   :  { %v2805_v0 = vmul.f32 %v6031_v42, %v2770_v44  ;;  %v2804_v48 = vmul.f32 %v6028_v25, %v2770_v44 }
 0x4c2   :  { %v4111_v8 = vpop.eup %4110 }
 0x4c3   :  { %2874 = vadd.xlane.f32.xlu1 %v2805_v0  ;;  %2872 = vadd.xlane.f32.xlu0 %v2804_v48  ;;  %v2771_v1 = vmul.f32 %v4111_v8, %v6180_v49 }
 0x4c4   :  { %v2729_v11 = vpop.xlane.xlu0 %2728 }
 0x4c5   :  { %4112 = vrcp.f32 %v2729_v11  ;;  %v2807_v23 = vmul.f32 %v6050_v62, %v2771_v1  ;;  %v2806_v54 = vmul.f32 %v6047_v19, %v2771_v1 }
 0x4c7   :  { %2878 = vadd.xlane.f32.xlu1 %v2807_v23  ;;  %2876 = vadd.xlane.f32.xlu0 %v2806_v54 }
 0x4cb   :  { %v2731_v45 = vpop.xlane.xlu1 %2730 }
 0x4cc   :  { %4114 = vrcp.f32 %v2731_v45 }
 0x4cf   :  { %v4113_v38 = vpop.eup %4112 }
 0x4d0   :  { %v2772_v42 = vmul.f32 %v4113_v38, %v6184_v9 }
 0x4d2   :  { %v2809_v25 = vmul.f32 %v6070_v59, %v2772_v42  ;;  %v2808_v16 = vmul.f32 %v6067_v12, %v2772_v42 }
 0x4d4   :  { %2882 = vadd.xlane.f32.xlu1 %v2809_v25  ;;  %2880 = vadd.xlane.f32.xlu0 %v2808_v16 }
 0x4d6   :  { %v4115_v49 = vpop.eup %4114 }
 0x4d7   :  { %v2733_v61 = vpop.xlane.xlu0 %2732  ;;  %v2773_v13 = vmul.f32 %v4115_v49, %v6188_v6 }
 0x4d8   :  { %4116 = vrcp.f32 %v2733_v61 }
 0x4d9   :  { %v2811_v19 = vmul.f32 %v6083_v43, %v2773_v13  ;;  %v2810_v62 = vmul.f32 %v6080_v37, %v2773_v13 }
 0x4db   :  { %2886 = vadd.xlane.f32.xlu1 %v2811_v19  ;;  %2884 = vadd.xlane.f32.xlu0 %v2810_v62 }
 0x4dd   :  { %v2735_v30 = vpop.xlane.xlu1 %2734 }
 0x4de   :  { %4118 = vrcp.f32 %v2735_v30 }
 0x4e2   :  { %v4117_v9 = vpop.eup %4116 }
 0x4e3   :  { %v2774_v59 = vmul.f32 %v4117_v9, %v6192_v35 }
 0x4e5   :  { %v2813_v12 = vmul.f32 %v6095_v51, %v2774_v59  ;;  %v2812_v47 = vmul.f32 %v6092_v10, %v2774_v59 }
 0x4e7   :  { %2890 = vadd.xlane.f32.xlu1 %v2813_v12  ;;  %2888 = vadd.xlane.f32.xlu0 %v2812_v47 }
 0x4e8   :  { %v4119_v33 = vpop.eup %4118  ;;  %v6236_v39 = vpop.xlane.xlu1 %2818 }
 0x4e9   :  { %v2775_v6 = vmul.f32 %v4119_v33, %v6195_v15  ;;  %v6238_v43 = vpop.xlane.xlu0 %2816  ;;  %v2897_v37 = vmul.f32 %v6236_v39, %v6236_v39 }
 0x4ea   :  { %v2896_v14 = vmul.f32 %v6238_v43, %v6238_v43 }
 0x4eb   :  { %v2815_v35 = vmul.f32 %v6106_v24, %v2775_v6  ;;  %v2814_v51 = vmul.f32 %v6103_v31, %v2775_v6 }
 0x4ec   :  { %v2936_v10 = vadd.f32 %v2897_v37, %v2896_v14 }
 0x4ed   :  { %2894 = vadd.xlane.f32.xlu1 %v2815_v35  ;;  %2892 = vadd.xlane.f32.xlu0 %v2814_v51 }
 0x4ee   :  { %v2937_v18 = vrot.slane %v2936_v10, 4 }
 0x4ef   :  { %v6246_v15 = vpop.xlane.xlu1 %2822  ;;  %v6248_v41 = vpop.xlane.xlu0 %2820 }
 0x4f0   :  { %v2938_v58 = vadd.f32 %v2937_v18, %v2936_v10  ;;  %v2899_v56 = vmul.f32 %v6246_v15, %v6246_v15  ;;  %v2898_v3 = vmul.f32 %v6248_v41, %v6248_v41 }
 0x4f2   :  { %v2939_v29 = vrot.slane %v2938_v58, 2  ;;  %v2943_v46 = vadd.f32 %v2899_v56, %v2898_v3 }
 0x4f4   :  { %v2940_v24 = vadd.f32 %v2939_v29, %v2938_v58  ;;  %v2944_v7 = vrot.slane %v2943_v46, 4 }
 0x4f5   :  { %v6254_v50 = vpop.xlane.xlu1 %2826  ;;  %v6256_v57 = vpop.xlane.xlu0 %2824 }
 0x4f6   :  { %v2941_v31 = vrot.slane %v2940_v24, 1  ;;  %v2945_v27 = vadd.f32 %v2944_v7, %v2943_v46  ;;  %v2901_v34 = vmul.f32 %v6254_v50, %v6254_v50  ;;  %v2900_v28 = vmul.f32 %v6256_v57, %v6256_v57 }
 0x4f8   :  { %v2942_v60 = vadd.f32 %v2941_v31, %v2940_v24  ;;  %v2946_v4 = vrot.slane %v2945_v27, 2  ;;  %v2950_v55 = vadd.f32 %v2901_v34, %v2900_v28 }
 0x4f9   :  { %v6262_v21 = vpop.xlane.xlu1 %2830  ;;  %v6264_v40 = vpop.xlane.xlu0 %2828 }
 0x4fa   :  { %v3076_v22 = vadd.f32 1.0, %v2942_v60  ;;  %v2947_v2 = vadd.f32 %v2946_v4, %v2945_v27  ;;  %v2951_v26 = vrot.slane %v2950_v55, 4  ;;  %v2903_v63 = vmul.f32 %v6262_v21, %v6262_v21 }
 0x4fb   :  { %v2902_v5 = vmul.f32 %v6264_v40, %v6264_v40 }
 0x4fc   :  { %4120 = vrcp.f32 %v3076_v22  ;;  %v2948_v17 = vrot.slane %v2947_v2, 1  ;;  %v2952_v20 = vadd.f32 %v2951_v26, %v2950_v55 }
 0x4fd   :  { %v2957_v52 = vadd.f32 %v2903_v63, %v2902_v5  ;;  %v6270_v53 = vpop.xlane.xlu1 %2834  ;;  %v6272_v32 = vpop.xlane.xlu0 %2832  ;;  %4122 = vrsqrt.f32 %v2942_v60 }
 0x4fe   :  { %v2949_v36 = vadd.f32 %v2948_v17, %v2947_v2  ;;  %v2953_v44 = vrot.slane %v2952_v20, 2  ;;  %v2905_v48 = vmul.f32 %v6270_v53, %v6270_v53  ;;  %v2904_v8 = vmul.f32 %v6272_v32, %v6272_v32 }
 0x4ff   :  { %v2958_v0 = vrot.slane %v2957_v52, 4 }
 0x500   :  { %v3077_v1 = vadd.f32 1.0, %v2949_v36  ;;  %v2954_v11 = vadd.f32 %v2953_v44, %v2952_v20  ;;  %v2964_v54 = vadd.f32 %v2905_v48, %v2904_v8 }
 0x501   :  { %v2959_v23 = vadd.f32 %v2958_v0, %v2957_v52  ;;  %v6278_v45 = vpop.xlane.xlu1 %2838  ;;  %v6280_v38 = vpop.xlane.xlu0 %2836 }
 0x502   :  { %4124 = vrcp.f32 %v3077_v1  ;;  %v2955_v42 = vrot.slane %v2954_v11, 1  ;;  %v2907_v16 = vmul.f32 %v6278_v45, %v6278_v45  ;;  %v2965_v49 = vrot.slane %v2964_v54, 4 }
 0x503   :  { %v2960_v25 = vrot.slane %v2959_v23, 2  ;;  %v2906_v61 = vmul.f32 %v6280_v38, %v6280_v38  ;;  %4126 = vrsqrt.f32 %v2949_v36 }
 0x504   :  { %v2956_v13 = vadd.f32 %v2955_v42, %v2954_v11  ;;  %v2966_v30 = vadd.f32 %v2965_v49, %v2964_v54 }
 0x505   :  { %v2961_v19 = vadd.f32 %v2960_v25, %v2959_v23  ;;  %v2971_v9 = vadd.f32 %v2907_v16, %v2906_v61 }
 0x506   :  { %v4121_v62 = vpop.eup %4120  ;;  %v3078_v12 = vadd.f32 1.0, %v2956_v13  ;;  %v2967_v33 = vrot.slane %v2966_v30, 2 }
 0x507   :  { %v3116_v59 = vmul.f32 %v4121_v62, %v2942_v60  ;;  %v2962_v47 = vrot.slane %v2961_v19, 1  ;;  %v2972_v6 = vrot.slane %v2971_v9, 4  ;;  %v6286_v37 = vpop.xlane.xlu1 %2842  ;;  %v6288_v14 = vpop.xlane.xlu0 %2840 }
 0x508   :  { %4128 = vrcp.f32 %v3078_v12  ;;  %v4123_v18 = vpop.eup %4122  ;;  %v2968_v58 = vadd.f32 %v2967_v33, %v2966_v30  ;;  %v2909_v3 = vmul.f32 %v6286_v37, %v6286_v37  ;;  %v2908_v29 = vmul.f32 %v6288_v14, %v6288_v14 }
 0x509   :  { %v3136_v35 = vmul.f32 %v3116_v59, %v6238_v43  ;;  %v3137_v51 = vmul.f32 %v3116_v59, %v6236_v39  ;;  %v2963_v10 = vadd.f32 %v2962_v47, %v2961_v19  ;;  %v2973_v56 = vadd.f32 %v2972_v6, %v2971_v9 }
 0x50a   :  { %4130 = vrsqrt.f32 %v2956_v13  ;;  %v2969_v31 = vrot.slane %v2968_v58, 1  ;;  %v2978_v43 = vadd.f32 %v2909_v3, %v2908_v29 }
 0x50b   :  { %v3196_v46 = vmul.f32 %v4123_v18, %v3136_v35  ;;  %v3197_v24 = vmul.f32 %v4123_v18, %v3137_v51  ;;  %v3079_v7 = vadd.f32 1.0, %v2963_v10  ;;  %v2974_v27 = vrot.slane %v2973_v56, 2 }
 0x50c   :  { %v4125_v34 = vpop.eup %4124  ;;  %v2970_v28 = vadd.f32 %v2969_v31, %v2968_v58  ;;  %v2979_v4 = vrot.slane %v2978_v43, 4 }
 0x50d   :  { %3277 = vst.msk [vmem:[%s6623_s3] sm:$0xff] %vm3276_vm0, %v3196_v46  ;;  %3278 = vst.msk [vmem:[%s6623_s3 + $0x8] sm:$0xff] %vm3276_vm0, %v3197_v24  ;;  %4132 = vrcp.f32 %v3079_v7  ;;  %v3117_v39 = vmul.f32 %v4125_v34, %v2949_v36  ;;  %v2975_v60 = vadd.f32 %v2974_v27, %v2973_v56  ;;  %v4127_v26 = vpop.eup %4126 }
 0x50e   :  { %v3080_v2 = vadd.f32 1.0, %v2970_v28  ;;  %4134 = vrsqrt.f32 %v2963_v10  ;;  %v2980_v5 = vadd.f32 %v2979_v4, %v2978_v43 }
 0x50f   :  { %v3138_v55 = vmul.f32 %v3117_v39, %v6248_v41  ;;  %v3139_v22 = vmul.f32 %v3117_v39, %v6246_v15  ;;  %v2976_v63 = vrot.slane %v2975_v60, 1 }
 0x510   :  { %4136 = vrcp.f32 %v3080_v2  ;;  %v6306_v52 = vpop.xlane.xlu1 %2846  ;;  %v6308_v44 = vpop.xlane.xlu0 %2844  ;;  %v2981_v48 = vrot.slane %v2980_v5, 2 }
 0x511   :  { %v3198_v17 = vmul.f32 %v4127_v26, %v3138_v55  ;;  %v3199_v20 = vmul.f32 %v4127_v26, %v3139_v22  ;;  %v6310_v0 = vadd.f32 %v2976_v63, %v2975_v60  ;;  %v2911_v41 = vmul.f32 %v6306_v52, %v6306_v52 }
 0x512   :  { %v4129_v36 = vpop.eup %4128  ;;  %v2910_v15 = vmul.f32 %v6308_v44, %v6308_v44  ;;  %v2982_v11 = vadd.f32 %v2981_v48, %v2980_v5  ;;  %4138 = vrsqrt.f32 %v2970_v28 }
 0x513   :  { %3279 = vst.msk [vmem:[%s6623_s3 + $0x10] sm:$0xff] %vm3276_vm0, %v3198_v17  ;;  %3280 = vst.msk [vmem:[%s6623_s3 + $0x18] sm:$0xff] %vm3276_vm0, %v3199_v20  ;;  %v3118_v8 = vmul.f32 %v4129_v36, %v2956_v13  ;;  %v3081_v1 = vadd.f32 1.0, %v6310_v0 }
 0x514   :  { %v2985_v23 = vadd.f32 %v2911_v41, %v2910_v15  ;;  %v4131_v54 = vpop.eup %4130  ;;  %v2983_v19 = vrot.slane %v2982_v11, 1 }
 0x515   :  { %v3140_v42 = vmul.f32 %v3118_v8, %v6256_v57  ;;  %v3141_v25 = vmul.f32 %v3118_v8, %v6254_v50  ;;  %v6327_v16 = vpop.xlane.xlu1 %2850  ;;  %v6329_v49 = vpop.xlane.xlu0 %2848  ;;  %4140 = vrcp.f32 %v3081_v1 }
 0x516   :  { %v2986_v62 = vrot.slane %v2985_v23, 4  ;;  %v2913_v13 = vmul.f32 %v6327_v16, %v6327_v16  ;;  %v2912_v57 = vmul.f32 %v6329_v49, %v6329_v49  ;;  %v6335_v12 = vadd.f32 %v2983_v19, %v2982_v11 }
 0x517   :  { %v4133_v61 = vpop.eup %4132  ;;  %v3200_v30 = vmul.f32 %v4131_v54, %v3140_v42  ;;  %v3201_v9 = vmul.f32 %v4131_v54, %v3141_v25  ;;  %4142 = vrsqrt.f32 %v6310_v0 }
 0x518   :  { %v3119_v59 = vmul.f32 %v4133_v61, %v2963_v10  ;;  %v2987_v50 = vadd.f32 %v2986_v62, %v2985_v23  ;;  %v2992_v6 = vadd.f32 %v2913_v13, %v2912_v57  ;;  %v4135_v35 = vpop.eup %4134  ;;  %v3082_v51 = vadd.f32 1.0, %v6335_v12 }
 0x519   :  { %3281 = vst.msk [vmem:[%s6623_s3 + $0x20] sm:$0xff] %vm3276_vm0, %v3200_v30  ;;  %3282 = vst.msk [vmem:[%s6623_s3 + $0x28] sm:$0xff] %vm3276_vm0, %v3201_v9 }
 0x51a   :  { %v3142_v47 = vmul.f32 %v3119_v59, %v6264_v40  ;;  %v3143_v33 = vmul.f32 %v3119_v59, %v6262_v21  ;;  %v2988_v10 = vrot.slane %v2987_v50, 2  ;;  %v4137_v18 = vpop.eup %4136  ;;  %v2993_v3 = vrot.slane %v2992_v6, 4 }
 0x51b   :  { %v3120_v29 = vmul.f32 %v4137_v18, %v2970_v28  ;;  %4144 = vrcp.f32 %v3082_v51  ;;  %v6349_v24 = vpop.xlane.xlu1 %2854  ;;  %v6351_v7 = vpop.xlane.xlu0 %2852 }
 0x51c   :  { %v3202_v58 = vmul.f32 %v4135_v35, %v3142_v47  ;;  %v3203_v56 = vmul.f32 %v4135_v35, %v3143_v33  ;;  %v2989_v46 = vadd.f32 %v2988_v10, %v2987_v50  ;;  %v2994_v21 = vadd.f32 %v2993_v3, %v2992_v6  ;;  %v4139_v39 = vpop.eup %4138 }
 0x51d   :  { %v2915_v40 = vmul.f32 %v6349_v24, %v6349_v24  ;;  %v2914_v31 = vmul.f32 %v6351_v7, %v6351_v7  ;;  %v3144_v27 = vmul.f32 %v3120_v29, %v6272_v32  ;;  %v3145_v43 = vmul.f32 %v3120_v29, %v6270_v53 }
 0x51e   :  { %3283 = vst.msk [vmem:[%s6623_s3 + $0x30] sm:$0xff] %vm3276_vm0, %v3202_v58  ;;  %3284 = vst.msk [vmem:[%s6623_s3 + $0x38] sm:$0xff] %vm3276_vm0, %v3203_v56  ;;  %v2990_v34 = vrot.slane %v2989_v46, 1  ;;  %v2995_v28 = vrot.slane %v2994_v21, 2  ;;  %4146 = vrsqrt.f32 %v6335_v12 }
 0x51f   :  { %v2999_v60 = vadd.f32 %v2915_v40, %v2914_v31  ;;  %v4141_v4 = vpop.eup %4140  ;;  %v3204_v55 = vmul.f32 %v4139_v39, %v3144_v27  ;;  %v3205_v22 = vmul.f32 %v4139_v39, %v3145_v43 }
 0x520   :  { %v6368_v2 = vadd.f32 %v2990_v34, %v2989_v46 }
 0x521   :  { %4371 = shalt.err (!%p4368_p6)
}
 0x522   :  { %s4372_s10 = scalar_lea.hbm %s6622_s2, 5120 }
 0x523   :  { %p4373_p7 = scmp.ne.s32.totalorder %s6622_s2, %s4372_s10  ;;  %p4376_p8 = scmp.lt.u32.totalorder %s4372_s10, %s6622_s2 }
 0x525   :  { %p4378_p9 = pnand %p4376_p8, %p4373_p7 }
 0x527   :  { %4381 = shalt.err (!%p4378_p9)
}
 0x528   :  { %s4419_s1 = smov 128   ;;  %s4420_s16 = smov 8   ;;  %v3121_v53 = vmul.f32 %v4141_v4, %v6310_v0  ;;  %v2996_v32 = vadd.f32 %v2995_v28, %v2994_v21  ;;  %v3000_v26 = vrot.slane %v2999_v60, 4  ;;  %3285 = vst.msk [vmem:[%s6623_s3 + $0x40] sm:$0xff] %vm3276_vm0, %v3204_v55  ;;  %3286 = vst.msk [vmem:[%s6623_s3 + $0x48] sm:$0xff] %vm3276_vm0, %v3205_v22  ;;  %v3083_v63 = vadd.f32 1.0, %v6368_v2 }
 0x529   :  { %3348 = dma.vmem_to_hbm [thread:$0]  %s3343_s6, 5120, %s6622_s2, [#allocation4], %s4419_s1, %s4419_s1, %s4420_s16  }
 0x52a   :  { %s4421_s19 = smov [#allocation8]   ;;  %v3146_v5 = vmul.f32 %v3121_v53, %v6280_v38  ;;  %v3147_v17 = vmul.f32 %v3121_v53, %v6278_v45  ;;  %v2997_v20 = vrot.slane %v2996_v32, 1  ;;  %v3001_v36 = vadd.f32 %v3000_v26, %v2999_v60 }
 0x52b   :  { %s3356_s20 = sshll.u32 %s4421_s19, 4  ;;  %s3357_s20 = int_to_ptr.vmem [resolvable:$true] %s3356_s20 }
 0x52c   :  { %s4382_s2 = scalar_lea.vmem %s3357_s20, 320  ;;  %p4387_p11 = scmp.lt.s32.totalorder %s3357_s20, %s3357_s20 }
 0x52d   :  { %p4383_p10 = scmp.ne.s32.totalorder %s3357_s20, %s4382_s2  ;;  %p4388_p12 = scmp.lt.s32.totalorder %s4382_s2, %s4382_s2 }
 0x52f   :  { %p4389_p13 = por %p4388_p12, %p4387_p11 }
 0x531   :  { %p4390_p0 = pnand %p4389_p13, %p4383_p10 }
 0x533   :  { %4393 = shalt.err (!%p4390_p0)
}
 0x534   :  { %s4394_s27 = scalar_lea.hbm %s6624_s4, 320 }
 0x535   :  { %p4395_p1 = scmp.ne.s32.totalorder %s6624_s4, %s4394_s27  ;;  %p4398_p2 = scmp.lt.u32.totalorder %s4394_s27, %s6624_s4 }
 0x537   :  { %p4400_p3 = pnand %p4398_p2, %p4395_p1 }
 0x539   :  { %4403 = shalt.err (!%p4400_p3)
}
 0x53a   :  { %3362 = dma.vmem_to_hbm [thread:$0]  %s3357_s20, 320, %s6624_s4, [#allocation9], %s4416_s0, %s4416_s0, %s4417_s13   ;;  %v4143_v45 = vpop.eup %4142  ;;  %4148 = vrcp.f32 %v3083_v63  ;;  %v2998_v48 = vadd.f32 %v2997_v20, %v2996_v32  ;;  %v3002_v41 = vrot.slane %v3001_v36, 2  ;;  %v6418_v23 = vpop.xlane.xlu1 %2858 }
 0x53b   :  { %v3206_v38 = vmul.f32 %v4143_v45, %v3146_v5  ;;  %v3207_v0 = vmul.f32 %v4143_v45, %v3147_v17  ;;  %v4145_v15 = vpop.eup %4144  ;;  %v6420_v54 = vpop.xlane.xlu0 %2856  ;;  %4150 = vrsqrt.f32 %v6368_v2  ;;  %v2917_v42 = vmul.f32 %v6418_v23, %v6418_v23 }
 0x53c   :  { %v3122_v8 = vmul.f32 %v4145_v15, %v6335_v12  ;;  %v3084_v1 = vadd.f32 1.0, %v2998_v48  ;;  %v3003_v11 = vadd.f32 %v3002_v41, %v3001_v36  ;;  %v2916_v25 = vmul.f32 %v6420_v54, %v6420_v54  ;;  %v4147_v13 = vpop.eup %4146 }
 0x53d   :  { %3287 = vst.msk [vmem:[%s6623_s3 + $0x50] sm:$0xff] %vm3276_vm0, %v3206_v38  ;;  %3288 = vst.msk [vmem:[%s6623_s3 + $0x58] sm:$0xff] %vm3276_vm0, %v3207_v0 }
 0x53e   :  { %v3148_v61 = vmul.f32 %v3122_v8, %v6288_v14  ;;  %v3149_v19 = vmul.f32 %v3122_v8, %v6286_v37  ;;  %4152 = vrcp.f32 %v3084_v1  ;;  %v3004_v62 = vrot.slane %v3003_v11, 1  ;;  %v6438_v6 = vpop.xlane.xlu1 %2862 }
 0x53f   :  { %v3006_v30 = vadd.f32 %v2917_v42, %v2916_v25  ;;  %4154 = vrsqrt.f32 %v2998_v48  ;;  %v6440_v35 = vpop.xlane.xlu0 %2860  ;;  %v2919_v18 = vmul.f32 %v6438_v6, %v6438_v6 }
 0x540   :  { %v3208_v9 = vmul.f32 %v4147_v13, %v3148_v61  ;;  %v3209_v59 = vmul.f32 %v4147_v13, %v3149_v19  ;;  %v3005_v57 = vadd.f32 %v3004_v62, %v3003_v11  ;;  %v2918_v58 = vmul.f32 %v6440_v35, %v6440_v35 }
 0x541   :  { %v3007_v12 = vrot.slane %v3006_v30, 4 }
 0x542   :  { %3289 = vst.msk [vmem:[%s6623_s3 + $0x60] sm:$0xff] %vm3276_vm0, %v3208_v9  ;;  %3290 = vst.msk [vmem:[%s6623_s3 + $0x68] sm:$0xff] %vm3276_vm0, %v3209_v59  ;;  %v3085_v37 = vadd.f32 1.0, %v3005_v57  ;;  %v3013_v40 = vadd.f32 %v2919_v18, %v2918_v58  ;;  %v6466_v53 = vpop.xlane.xlu1 %2866 }
 0x543   :  { %v3008_v50 = vadd.f32 %v3007_v12, %v3006_v30  ;;  %v6468_v32 = vpop.xlane.xlu0 %2864  ;;  %v2921_v5 = vmul.f32 %v6466_v53, %v6466_v53 }
 0x544   :  { %v4149_v14 = vpop.eup %4148  ;;  %4156 = vrcp.f32 %v3085_v37  ;;  %v2920_v17 = vmul.f32 %v6468_v32, %v6468_v32 }
 0x545   :  { %v3123_v47 = vmul.f32 %v4149_v14, %v6368_v2  ;;  %v3009_v33 = vrot.slane %v3008_v50, 2  ;;  %v4151_v56 = vpop.eup %4150  ;;  %4158 = vrsqrt.f32 %v3005_v57 }
 0x546   :  { %v3020_v0 = vadd.f32 %v2921_v5, %v2920_v17  ;;  %v6484_v15 = vpop.xlane.xlu1 %2870 }
 0x547   :  { %v3150_v51 = vmul.f32 %v3123_v47, %v6308_v44  ;;  %v3151_v10 = vmul.f32 %v3123_v47, %v6306_v52  ;;  %v3010_v3 = vadd.f32 %v3009_v33, %v3008_v50  ;;  %v3014_v52 = vrot.slane %v3013_v40, 4  ;;  %v6486_v8 = vpop.xlane.xlu0 %2868 }
 0x548   :  { %v4153_v29 = vpop.eup %4152  ;;  %v2923_v1 = vmul.f32 %v6484_v15, %v6484_v15  ;;  %v2922_v11 = vmul.f32 %v6486_v8, %v6486_v8 }
 0x549   :  { %v3210_v46 = vmul.f32 %v4151_v56, %v3150_v51  ;;  %v3211_v21 = vmul.f32 %v4151_v56, %v3151_v10  ;;  %v3124_v31 = vmul.f32 %v4153_v29, %v2998_v48  ;;  %v3011_v27 = vrot.slane %v3010_v3, 1  ;;  %v4155_v39 = vpop.eup %4154 }
 0x54a   :  { %v3015_v28 = vadd.f32 %v3014_v52, %v3013_v40  ;;  %v3027_v19 = vadd.f32 %v2923_v1, %v2922_v11 }
 0x54b   :  { %3291 = vst.msk [vmem:[%s6623_s3 + $0x70] sm:$0xff] %vm3276_vm0, %v3210_v46  ;;  %3292 = vst.msk [vmem:[%s6623_s3 + $0x78] sm:$0xff] %vm3276_vm0, %v3211_v21  ;;  %v3152_v44 = vmul.f32 %v3124_v31, %v6329_v49  ;;  %v3153_v43 = vmul.f32 %v3124_v31, %v6327_v16  ;;  %v3012_v34 = vadd.f32 %v3011_v27, %v3010_v3 }
 0x54c   :  { %v3016_v2 = vrot.slane %v3015_v28, 2  ;;  %v3028_v9 = vrot.slane %v3027_v19, 4 }
 0x54d   :  { %v3212_v60 = vmul.f32 %v4155_v39, %v3152_v44  ;;  %v3213_v4 = vmul.f32 %v4155_v39, %v3153_v43  ;;  %v3086_v55 = vadd.f32 1.0, %v3012_v34 }
 0x54e   :  { %v4157_v22 = vpop.eup %4156  ;;  %v3017_v16 = vadd.f32 %v3016_v2, %v3015_v28  ;;  %v3029_v14 = vadd.f32 %v3028_v9, %v3027_v19 }
 0x54f   :  { %3293 = vst.msk [vmem:[%s6623_s3 + $0x80] sm:$0xff] %vm3276_vm0, %v3212_v60  ;;  %3294 = vst.msk [vmem:[%s6623_s3 + $0x88] sm:$0xff] %vm3276_vm0, %v3213_v4  ;;  %v3125_v49 = vmul.f32 %v4157_v22, %v3005_v57  ;;  %4160 = vrcp.f32 %v3086_v55  ;;  %v4159_v20 = vpop.eup %4158 }
 0x550   :  { %v3018_v36 = vrot.slane %v3017_v16, 1  ;;  %4162 = vrsqrt.f32 %v3012_v34  ;;  %v6502_v18 = vpop.xlane.xlu1 %2874  ;;  %v6504_v58 = vpop.xlane.xlu0 %2872 }
 0x551   :  { %v3154_v26 = vmul.f32 %v3125_v49, %v6351_v7  ;;  %v3155_v63 = vmul.f32 %v3125_v49, %v6349_v24  ;;  %v3021_v24 = vrot.slane %v3020_v0, 4  ;;  %v2925_v29 = vmul.f32 %v6502_v18, %v6502_v18 }
 0x552   :  { %v3019_v48 = vadd.f32 %v3018_v36, %v3017_v16  ;;  %v2924_v46 = vmul.f32 %v6504_v58, %v6504_v58 }
 0x553   :  { %v3214_v45 = vmul.f32 %v4159_v20, %v3154_v26  ;;  %v3215_v38 = vmul.f32 %v4159_v20, %v3155_v63  ;;  %v3022_v41 = vadd.f32 %v3021_v24, %v3020_v0 }
 0x554   :  { %v3087_v7 = vadd.f32 1.0, %v3019_v48  ;;  %v3034_v52 = vadd.f32 %v2925_v29, %v2924_v46  ;;  %v6522_v43 = vpop.xlane.xlu0 %2876 }
 0x555   :  { %3295 = vst.msk [vmem:[%s6623_s3 + $0x90] sm:$0xff] %vm3276_vm0, %v3214_v45  ;;  %3296 = vst.msk [vmem:[%s6623_s3 + $0x98] sm:$0xff] %vm3276_vm0, %v3215_v38  ;;  %v3023_v25 = vrot.slane %v3022_v41, 2  ;;  %v2926_v39 = vmul.f32 %v6522_v43, %v6522_v43 }
 0x556   :  { %4164 = vrcp.f32 %v3087_v7 }
 0x557   :  { %v3024_v62 = vadd.f32 %v3023_v25, %v3022_v41  ;;  %4166 = vrsqrt.f32 %v3019_v48 }
 0x559   :  { %v4161_v42 = vpop.eup %4160  ;;  %v3025_v57 = vrot.slane %v3024_v62, 1 }
 0x55a   :  { %v3126_v61 = vmul.f32 %v4161_v42, %v3012_v34  ;;  %v4163_v59 = vpop.eup %4162 }
 0x55b   :  { %v3026_v50 = vadd.f32 %v3025_v57, %v3024_v62 }
 0x55c   :  { %v3156_v13 = vmul.f32 %v3126_v61, %v6420_v54  ;;  %v3157_v30 = vmul.f32 %v3126_v61, %v6418_v23  ;;  %v3030_v54 = vrot.slane %v3029_v14, 2 }
 0x55d   :  { %v3088_v23 = vadd.f32 1.0, %v3026_v50 }
 0x55e   :  { %v3216_v12 = vmul.f32 %v4163_v59, %v3156_v13  ;;  %v3217_v37 = vmul.f32 %v4163_v59, %v3157_v30  ;;  %v3031_v33 = vadd.f32 %v3030_v54, %v3029_v14 }
 0x55f   :  { %4168 = vrcp.f32 %v3088_v23 }
 0x560   :  { %3297 = vst.msk [vmem:[%s6623_s3 + $0xa0] sm:$0xff] %vm3276_vm0, %v3216_v12  ;;  %3298 = vst.msk [vmem:[%s6623_s3 + $0xa8] sm:$0xff] %vm3276_vm0, %v3217_v37  ;;  %v4165_v47 = vpop.eup %4164  ;;  %v3032_v10 = vrot.slane %v3031_v33, 1  ;;  %4170 = vrsqrt.f32 %v3026_v50 }
 0x561   :  { %v3127_v51 = vmul.f32 %v4165_v47, %v3019_v48  ;;  %v4167_v21 = vpop.eup %4166  ;;  %v6540_v41 = vpop.xlane.xlu0 %2880 }
 0x562   :  { %v3033_v40 = vadd.f32 %v3032_v10, %v3031_v33  ;;  %v2928_v19 = vmul.f32 %v6540_v41, %v6540_v41 }
 0x563   :  { %v3158_v56 = vmul.f32 %v3127_v51, %v6440_v35  ;;  %v3159_v3 = vmul.f32 %v3127_v51, %v6438_v6  ;;  %v3035_v6 = vrot.slane %v3034_v52, 4  ;;  %v6520_v35 = vpop.xlane.xlu1 %2878 }
 0x564   :  { %v3089_v44 = vadd.f32 1.0, %v3033_v40  ;;  %v2927_v34 = vmul.f32 %v6520_v35, %v6520_v35 }
 0x565   :  { %v3218_v31 = vmul.f32 %v4167_v21, %v3158_v56  ;;  %v3219_v27 = vmul.f32 %v4167_v21, %v3159_v3  ;;  %v3036_v28 = vadd.f32 %v3035_v6, %v3034_v52 }
 0x566   :  { %4172 = vrcp.f32 %v3089_v44  ;;  %v3041_v60 = vadd.f32 %v2927_v34, %v2926_v39 }
 0x567   :  { %3299 = vst.msk [vmem:[%s6623_s3 + $0xb0] sm:$0xff] %vm3276_vm0, %v3218_v31  ;;  %3300 = vst.msk [vmem:[%s6623_s3 + $0xb8] sm:$0xff] %vm3276_vm0, %v3219_v27  ;;  %v3037_v55 = vrot.slane %v3036_v28, 2  ;;  %4174 = vrsqrt.f32 %v3033_v40  ;;  %v6538_v7 = vpop.xlane.xlu1 %2882 }
 0x568   :  { %v3042_v2 = vrot.slane %v3041_v60, 4  ;;  %v2929_v42 = vmul.f32 %v6538_v7, %v6538_v7  ;;  %v6558_v59 = vpop.xlane.xlu0 %2884 }
 0x569   :  { %v4169_v4 = vpop.eup %4168  ;;  %v3038_v49 = vadd.f32 %v3037_v55, %v3036_v28  ;;  %v2930_v37 = vmul.f32 %v6558_v59, %v6558_v59 }
 0x56a   :  { %v3128_v22 = vmul.f32 %v4169_v4, %v3026_v50  ;;  %v3043_v63 = vadd.f32 %v3042_v2, %v3041_v60  ;;  %v4171_v5 = vpop.eup %4170  ;;  %v3048_v9 = vadd.f32 %v2929_v42, %v2928_v19 }
 0x56b   :  { %v3039_v17 = vrot.slane %v3038_v49, 1 }
 0x56c   :  { %v3160_v16 = vmul.f32 %v3128_v22, %v6468_v32  ;;  %v3161_v26 = vmul.f32 %v3128_v22, %v6466_v53  ;;  %v3044_v45 = vrot.slane %v3043_v63, 2 }
 0x56d   :  { %v3040_v38 = vadd.f32 %v3039_v17, %v3038_v49 }
 0x56e   :  { %v3220_v20 = vmul.f32 %v4171_v5, %v3160_v16  ;;  %v3221_v36 = vmul.f32 %v4171_v5, %v3161_v26  ;;  %v3045_v32 = vadd.f32 %v3044_v45, %v3043_v63 }
 0x56f   :  { %v3090_v48 = vadd.f32 1.0, %v3040_v38 }
 0x570   :  { %v4173_v0 = vpop.eup %4172  ;;  %3301 = vst.msk [vmem:[%s6623_s3 + $0xc0] sm:$0xff] %vm3276_vm0, %v3220_v20  ;;  %3302 = vst.msk [vmem:[%s6623_s3 + $0xc8] sm:$0xff] %vm3276_vm0, %v3221_v36  ;;  %v3046_v24 = vrot.slane %v3045_v32, 1 }
 0x571   :  { %v3129_v53 = vmul.f32 %v4173_v0, %v3033_v40  ;;  %4176 = vrcp.f32 %v3090_v48  ;;  %v4175_v25 = vpop.eup %4174 }
 0x572   :  { %v3047_v61 = vadd.f32 %v3046_v24, %v3045_v32  ;;  %4178 = vrsqrt.f32 %v3040_v38 }
 0x573   :  { %v3162_v1 = vmul.f32 %v3129_v53, %v6486_v8  ;;  %v3163_v11 = vmul.f32 %v3129_v53, %v6484_v15  ;;  %v3049_v15 = vrot.slane %v3048_v9, 4  ;;  %v6556_v8 = vpop.xlane.xlu1 %2886 }
 0x574   :  { %v3091_v30 = vadd.f32 1.0, %v3047_v61  ;;  %v2931_v12 = vmul.f32 %v6556_v8, %v6556_v8  ;;  %v2889_v39 = vpop.xlane.xlu0 %2888 }
 0x575   :  { %v3222_v62 = vmul.f32 %v4175_v25, %v3162_v1  ;;  %v3223_v13 = vmul.f32 %v4175_v25, %v3163_v11  ;;  %v3050_v57 = vadd.f32 %v3049_v15, %v3048_v9  ;;  %v2932_v55 = vmul.f32 %v2889_v39, %v2889_v39 }
 0x576   :  { %4180 = vrcp.f32 %v3091_v30  ;;  %v3055_v50 = vadd.f32 %v2931_v12, %v2930_v37 }
 0x577   :  { %3303 = vst.msk [vmem:[%s6623_s3 + $0xd0] sm:$0xff] %vm3276_vm0, %v3222_v62  ;;  %3304 = vst.msk [vmem:[%s6623_s3 + $0xd8] sm:$0xff] %vm3276_vm0, %v3223_v13  ;;  %4182 = vrsqrt.f32 %v3047_v61  ;;  %v3051_v14 = vrot.slane %v3050_v57, 2  ;;  %v2891_v34 = vpop.xlane.xlu1 %2890 }
 0x578   :  { %v3056_v33 = vrot.slane %v3055_v50, 4  ;;  %v2933_v4 = vmul.f32 %v2891_v34, %v2891_v34 }
 0x579   :  { %v3052_v47 = vadd.f32 %v3051_v14, %v3050_v57 }
 0x57a   :  { %v3057_v3 = vadd.f32 %v3056_v33, %v3055_v50  ;;  %v3062_v16 = vadd.f32 %v2933_v4, %v2932_v55  ;;  %v2893_v63 = vpop.xlane.xlu0 %2892 }
 0x57b   :  { %v4177_v54 = vpop.eup %4176  ;;  %v3053_v56 = vrot.slane %v3052_v47, 1  ;;  %v2895_v26 = vpop.xlane.xlu1 %2894  ;;  %v2934_v17 = vmul.f32 %v2893_v63, %v2893_v63 }
 0x57c   :  { %v3130_v23 = vmul.f32 %v4177_v54, %v3040_v38  ;;  %v4179_v29 = vpop.eup %4178  ;;  %v3058_v27 = vrot.slane %v3057_v3, 2  ;;  %v2935_v5 = vmul.f32 %v2895_v26, %v2895_v26 }
 0x57d   :  { %v3054_v31 = vadd.f32 %v3053_v56, %v3052_v47 }
 0x57e   :  { %v3164_v51 = vmul.f32 %v3130_v23, %v6504_v58  ;;  %v3165_v10 = vmul.f32 %v3130_v23, %v6502_v18  ;;  %v3059_v58 = vadd.f32 %v3058_v27, %v3057_v3  ;;  %v3069_v36 = vadd.f32 %v2935_v5, %v2934_v17 }
 0x57f   :  { %v3092_v18 = vadd.f32 1.0, %v3054_v31 }
 0x580   :  { %v4181_v46 = vpop.eup %4180  ;;  %v3224_v21 = vmul.f32 %v4179_v29, %v3164_v51  ;;  %v3225_v40 = vmul.f32 %v4179_v29, %v3165_v10  ;;  %v3060_v60 = vrot.slane %v3059_v58, 1  ;;  %v3070_v38 = vrot.slane %v3069_v36, 4 }
 0x581   :  { %v3131_v52 = vmul.f32 %v4181_v46, %v3047_v61  ;;  %v4183_v28 = vpop.eup %4182  ;;  %4184 = vrcp.f32 %v3092_v18 }
 0x582   :  { %3305 = vst.msk [vmem:[%s6623_s3 + $0xe0] sm:$0xff] %vm3276_vm0, %v3224_v21  ;;  %3306 = vst.msk [vmem:[%s6623_s3 + $0xe8] sm:$0xff] %vm3276_vm0, %v3225_v40  ;;  %v3061_v49 = vadd.f32 %v3060_v60, %v3059_v58  ;;  %4186 = vrsqrt.f32 %v3054_v31  ;;  %v3071_v48 = vadd.f32 %v3070_v38, %v3069_v36 }
 0x583   :  { %v3166_v44 = vmul.f32 %v3131_v52, %v6522_v43  ;;  %v3167_v6 = vmul.f32 %v3131_v52, %v6520_v35  ;;  %v3063_v43 = vrot.slane %v3062_v16, 4 }
 0x584   :  { %v3093_v35 = vadd.f32 1.0, %v3061_v49  ;;  %v3072_v42 = vrot.slane %v3071_v48, 2 }
 0x585   :  { %v3226_v22 = vmul.f32 %v4183_v28, %v3166_v44  ;;  %v3227_v2 = vmul.f32 %v4183_v28, %v3167_v6  ;;  %v3064_v20 = vadd.f32 %v3063_v43, %v3062_v16 }
 0x586   :  { %4188 = vrcp.f32 %v3093_v35  ;;  %v3073_v13 = vadd.f32 %v3072_v42, %v3071_v48 }
 0x587   :  { %3307 = vst.msk [vmem:[%s6623_s3 + $0xf0] sm:$0xff] %vm3276_vm0, %v3226_v22  ;;  %3308 = vst.msk [vmem:[%s6623_s3 + $0xf8] sm:$0xff] %vm3276_vm0, %v3227_v2  ;;  %v3065_v45 = vrot.slane %v3064_v20, 2  ;;  %4190 = vrsqrt.f32 %v3061_v49 }
 0x589   :  { %v3066_v32 = vadd.f32 %v3065_v45, %v3064_v20 }
 0x58b   :  { %v4185_v0 = vpop.eup %4184  ;;  %v3067_v24 = vrot.slane %v3066_v32, 1 }
 0x58c   :  { %v3132_v53 = vmul.f32 %v4185_v0, %v3054_v31  ;;  %v4187_v25 = vpop.eup %4186 }
 0x58d   :  { %v3068_v61 = vadd.f32 %v3067_v24, %v3066_v32 }
 0x58e   :  { %v3168_v1 = vmul.f32 %v3132_v53, %v6540_v41  ;;  %v3169_v11 = vmul.f32 %v3132_v53, %v6538_v7  ;;  %v3074_v7 = vrot.slane %v3073_v13, 1 }
 0x58f   :  { %v3094_v9 = vadd.f32 1.0, %v3068_v61 }
 0x590   :  { %v3228_v19 = vmul.f32 %v4187_v25, %v3168_v1  ;;  %v3229_v62 = vmul.f32 %v4187_v25, %v3169_v11  ;;  %v4189_v30 = vpop.eup %4188  ;;  %v3075_v12 = vadd.f32 %v3074_v7, %v3073_v13 }
 0x591   :  { %v3133_v41 = vmul.f32 %v4189_v30, %v3061_v49  ;;  %4192 = vrcp.f32 %v3094_v9  ;;  %v4191_v37 = vpop.eup %4190 }
 0x592   :  { %3309 = vst.msk [vmem:[%s6623_s3 + $0x100] sm:$0xff] %vm3276_vm0, %v3228_v19  ;;  %3310 = vst.msk [vmem:[%s6623_s3 + $0x108] sm:$0xff] %vm3276_vm0, %v3229_v62  ;;  %v3095_v54 = vadd.f32 1.0, %v3075_v12  ;;  %4194 = vrsqrt.f32 %v3068_v61 }
 0x593   :  { %v3170_v15 = vmul.f32 %v3133_v41, %v6558_v59  ;;  %v3171_v57 = vmul.f32 %v3133_v41, %v6556_v8 }
 0x594   :  { %4196 = vrcp.f32 %v3095_v54 }
 0x595   :  { %v3230_v14 = vmul.f32 %v4191_v37, %v3170_v15  ;;  %v3231_v50 = vmul.f32 %v4191_v37, %v3171_v57  ;;  %4198 = vrsqrt.f32 %v3075_v12 }
 0x597   :  { %3311 = vst.msk [vmem:[%s6623_s3 + $0x110] sm:$0xff] %vm3276_vm0, %v3230_v14  ;;  %3312 = vst.msk [vmem:[%s6623_s3 + $0x118] sm:$0xff] %vm3276_vm0, %v3231_v50 }
 0x59b   :  { %v4193_v59 = vpop.eup %4192 }
 0x59c   :  { %v3134_v8 = vmul.f32 %v4193_v59, %v3068_v61  ;;  %v4195_v33 = vpop.eup %4194 }
 0x59e   :  { %v3172_v23 = vmul.f32 %v3134_v8, %v2889_v39  ;;  %v3173_v47 = vmul.f32 %v3134_v8, %v2891_v34  ;;  %v4197_v51 = vpop.eup %4196 }
 0x59f   :  { %v3135_v3 = vmul.f32 %v4197_v51, %v3075_v12  ;;  %v4199_v21 = vpop.eup %4198 }
 0x5a0   :  { %v3232_v10 = vmul.f32 %v4195_v33, %v3172_v23  ;;  %v3233_v56 = vmul.f32 %v4195_v33, %v3173_v47 }
 0x5a1   :  { %v3174_v29 = vmul.f32 %v3135_v3, %v2893_v63  ;;  %v3175_v46 = vmul.f32 %v3135_v3, %v2895_v26 }
 0x5a2   :  { %3313 = vst.msk [vmem:[%s6623_s3 + $0x120] sm:$0xff] %vm3276_vm0, %v3232_v10  ;;  %3314 = vst.msk [vmem:[%s6623_s3 + $0x128] sm:$0xff] %vm3276_vm0, %v3233_v56 }
 0x5a3   :  { %v3234_v40 = vmul.f32 %v4199_v21, %v3174_v29  ;;  %v3235_v31 = vmul.f32 %v4199_v21, %v3175_v46 }
 0x5a5   :  { %3315 = vst.msk [vmem:[%s6623_s3 + $0x130] sm:$0xff] %vm3276_vm0, %v3234_v40  ;;  %3316 = vst.msk [vmem:[%s6623_s3 + $0x138] sm:$0xff] %vm3276_vm0, %v3235_v31 }
 0x5a6   :  { %4408 = dma.done.wait [#allocation4], 5120  }
 0x5a7   :  { %4409 = vsyncadd [#allocation4], 4294962176 }
 0x5a8   :  { %4410 = dma.done.wait [#allocation9], 320  }
 0x5a9   :  { %4411 = vsyncadd [#allocation9], 4294966976 }
 0x5aa   :  { %3371 = vsyncpa [#allocation3], 1 }
 0x5ab   :  { %3372 = vsyncpa [#allocation6], 1 }
 0x5ac   :  { %3373 = vsyncpa [#allocation4], 1 }
 0x5ad   :  { %3374 = vsyncpa [#allocation9], 1 }

</bundles_post_ra>
